<compile_context>
chip_gen: v6e
topology: v6e:2x2x1
jax: 0.10.0
libtpu: 0.0.40
codegen_flags: <defaults>
</compile_context>

<pallas_src>
from functools import partial

import numpy as np
import jax
import jax.numpy as jnp
from jax import lax
from jax.experimental import pallas as pl
from jax.experimental.pallas import tpu as pltpu

# Shapes implied by fc1 in_features = 4*4*16 + 2*2*14*32
D_IN, H_IN, W_IN = 4, 4, 16
C_OUT, K = 32, 3
D_O, H_O, W_O = D_IN - K + 1, H_IN - K + 1, W_IN - K + 1      # 2, 2, 14
N_X = D_IN * H_IN * W_IN                                      # 256
N_C = C_OUT * D_O * H_O * W_O                                 # 1792
HID = 200
HID_PAD = 256                                                 # lane-dense hidden
N_CLS = 4
OUT_PAD = 128                                                 # lane-dense output
NEG_BIG = -1e30                                               # masks padded logit lanes


def _conv_gather_indices():
    """Static (256, 1792) gather indices into the flattened conv weight (+1 zero slot)."""
    zero_slot = C_OUT * K ** 3
    G = np.full((N_X, N_C), zero_slot, dtype=np.int32)
    for c in range(C_OUT):
        for d in range(D_O):
            for h in range(H_O):
                for w in range(W_O):
                    out_idx = ((c * D_O + d) * H_O + h) * W_O + w
                    for kd in range(K):
                        for kh in range(K):
                            for kw in range(K):
                                in_idx = ((d + kd) * H_IN + (h + kh)) * W_IN + (w + kw)
                                G[in_idx, out_idx] = ((c * K + kd) * K + kh) * K + kw
    return G


_CONV_IDX = _conv_gather_indices()   # weight-independent; built once at import time


def fused_kernel(x_ref, wx_ref, bc_ref, w1c_ref, b1_ref, w2_ref, b2_ref, o_ref):
    x = x_ref[...]                                                   # (TB, 256) bf16

    # One GEMM covers both the conv-as-GEMM and the x-contribution to fc1.
    # Slice points (1792 / 256) are multiples of 128 -> zero-copy views.
    t = jnp.dot(x, wx_ref[...], preferred_element_type=jnp.float32)  # (TB, 2048) f32
    conv = jnp.maximum(t[:, :N_C] + bc_ref[...], 0.0)                # (TB, 1792) f32
    hx = t[:, N_C:]                                                  # (TB, 256)  f32

    # TODO(synk): Dropout(p=0.2) is identity at inference; training-mode
    # stochastic dropout is not implemented in this kernel.

    h = hx + jnp.dot(conv.astype(jnp.bfloat16), w1c_ref[...],
                     preferred_element_type=jnp.float32) + b1_ref[...]
    h = jnp.maximum(h, 0.0)                                          # (TB, 256)

    logits = jnp.dot(h.astype(jnp.bfloat16), w2_ref[...],
                     preferred_element_type=jnp.float32) + b2_ref[...]  # (TB, 128)
    m = jnp.max(logits, axis=1, keepdims=True)
    e = jnp.exp(logits - m)                                          # padded lanes -> 0
    inv = pl.reciprocal(jnp.sum(e, axis=1, keepdims=True), approx=True)
    o_ref[...] = (e * inv).astype(o_ref.dtype)                       # bf16 writeback


def prepare_params(wc, bc, w1, b1, w2, b2):
    """One-time weight preparation (pure jnp ops; safe to call under jit/trace)."""
    wc_flat = jnp.concatenate([wc.astype(jnp.float32).reshape(-1),
                               jnp.zeros((1,), jnp.float32)])
    M = wc_flat[_CONV_IDX]                                           # (256, 1792)

    w1 = w1.astype(jnp.float32)
    w1x = jnp.pad(w1[:N_X], ((0, 0), (0, HID_PAD - HID)))            # (256, 256)
    w1c = jnp.pad(w1[N_X:], ((0, 0), (0, HID_PAD - HID)))            # (1792, 256)

    wx = jnp.concatenate([M, w1x], axis=1).astype(jnp.bfloat16)      # (256, 2048) fused [M | W1x]
    w1c_b = w1c.astype(jnp.bfloat16)                                 # (1792, 256)

    w2p = jnp.pad(w2.astype(jnp.float32),
                  ((0, HID_PAD - HID), (0, OUT_PAD - N_CLS)))        # (256, 128)
    w2_b = w2p.astype(jnp.bfloat16)

    bc_vec = jnp.repeat(bc.astype(jnp.float32), D_O * H_O * W_O).reshape(1, N_C)
    b1p = jnp.pad(b1.astype(jnp.float32), (0, HID_PAD - HID)).reshape(1, HID_PAD)
    b2p = jnp.concatenate(
        [b2.astype(jnp.float32),
         jnp.full((OUT_PAD - N_CLS,), NEG_BIG, jnp.float32)]).reshape(1, OUT_PAD)

    return (wx, bc_vec, w1c_b, b1p, w2_b, b2p)


def _resident_spec(shape, use_buffered):
    """Constant-index weight/bias BlockSpec, single-buffered when supported."""
    if use_buffered:
        return pl.BlockSpec(shape, lambda i: (0, 0), pipeline_mode=pl.Buffered(1))
    return pl.BlockSpec(shape, lambda i: (0, 0))


@partial(jax.jit, static_argnames=("use_buffered",))
def _forward_impl(x, params, use_buffered):
    wx, bc_vec, w1c_b, b1p, w2_b, b2p = params
    B = x.shape[0]
    # bf16 activations: halves the only per-grid-step streaming DMA at large B.
    x_flat = x.reshape(B, N_X).astype(jnp.bfloat16)

    # Batch tiling: 512-row tiles only when the grid stays >= 2 steps (keeps both
    # v7x TensorCores busy via the "parallel" axis); tiny batches pad to a
    # multiple of 8 and run as a single step.
    if B >= 1024:
        TB = 512
    elif B >= 256:
        TB = 256
    else:
        TB = max(8, ((B + 7) // 8) * 8)
    B_pad = ((B + TB - 1) // TB) * TB
    if B_pad != B:
        x_flat = jnp.pad(x_flat, ((0, B_pad - B), (0, 0)))
    grid = (B_pad // TB,)

    cp_kwargs = dict(dimension_semantics=("parallel",))
    if TB >= 512:
        # Room for the (TB, 2048) f32 intermediate + conv copies; < 64 MiB (v7x).
        cp_kwargs["vmem_limit_bytes"] = 48 * 1024 * 1024
    compiler_params = pltpu.CompilerParams(**cp_kwargs)

    out = pl.pallas_call(
        fused_kernel,
        out_shape=jax.ShapeDtypeStruct((B_pad, OUT_PAD), jnp.bfloat16),
        grid_spec=pltpu.PrefetchScalarGridSpec(
            num_scalar_prefetch=0,
            grid=grid,
            in_specs=[
                pl.BlockSpec((TB, N_X), lambda i: (i, 0)),                    # x batch tile
                _resident_spec((N_X, N_C + HID_PAD), use_buffered),           # fused [M | W1x]
                _resident_spec((1, N_C), use_buffered),                       # conv bias
                _resident_spec((N_C, HID_PAD), use_buffered),                 # W1c
                _resident_spec((1, HID_PAD), use_buffered),                   # b1
                _resident_spec((HID_PAD, OUT_PAD), use_buffered),             # W2
                _resident_spec((1, OUT_PAD), use_buffered),                   # b2
            ],
            out_specs=pl.BlockSpec((TB, OUT_PAD), lambda i: (i, 0)),
        ),
        compiler_params=compiler_params,
    )(x_flat, wx, bc_vec, w1c_b, b1p, w2_b, b2p)

    return out[:B, :N_CLS].astype(jnp.float32)


_USE_BUFFERED = True


def network_forward(x, params):
    """Forward pass; falls back to default (double) buffering for the resident
    weights if this build rejects pipeline_mode=pl.Buffered(1)."""
    global _USE_BUFFERED
    if _USE_BUFFERED:
        try:
            return _forward_impl(x, params, use_buffered=True)
        except Exception:
            _USE_BUFFERED = False
    return _forward_impl(x, params, use_buffered=False)


def reference(x, wc, bc, w1, b1, w2, b2):
    """Pure-JAX f32 reference mirroring the PyTorch forward (eval mode)."""
    B = x.shape[0]
    conv = lax.conv_general_dilated(
        x, wc, window_strides=(1, 1, 1), padding="VALID",
        dimension_numbers=("NCDHW", "OIDHW", "NCDHW"))
    conv = jnp.maximum(conv + bc.reshape(1, -1, 1, 1, 1), 0.0)
    x1 = conv.reshape(B, -1)
    xf = x.reshape(B, -1)
    feat = jnp.concatenate([xf, x1], axis=1)
    h = jnp.maximum(feat @ w1 + b1, 0.0)
    logits = h @ w2 + b2
    return jax.nn.softmax(logits, axis=1)


if __name__ == "__main__":
    key = jax.random.PRNGKey(0)
    ks = jax.random.split(key, 7)
    B = 2

    x = jax.random.normal(ks[0], (B, 1, D_IN, H_IN, W_IN), jnp.float32)

    # PyTorch-default-like uniform(-1/sqrt(fan_in), 1/sqrt(fan_in)) init.
    fan_c = 1 * K ** 3
    bnd_c = 1.0 / np.sqrt(fan_c)
    wc = jax.random.uniform(ks[1], (C_OUT, 1, K, K, K), jnp.float32, -bnd_c, bnd_c)
    bc = jax.random.uniform(ks[2], (C_OUT,), jnp.float32, -bnd_c, bnd_c)

    fan1 = N_X + N_C
    bnd1 = 1.0 / np.sqrt(fan1)
    w1 = jax.random.uniform(ks[3], (fan1, HID), jnp.float32, -bnd1, bnd1)
    b1 = jax.random.uniform(ks[4], (HID,), jnp.float32, -bnd1, bnd1)

    bnd2 = 1.0 / np.sqrt(HID)
    w2 = jax.random.uniform(ks[5], (HID, N_CLS), jnp.float32, -bnd2, bnd2)
    b2 = jax.random.uniform(ks[6], (N_CLS,), jnp.float32, -bnd2, bnd2)

    # One-time weight prep (cached / reused across calls).
    params = jax.tree_util.tree_map(jax.block_until_ready,
                                    prepare_params(wc, bc, w1, b1, w2, b2))

    out = jax.block_until_ready(network_forward(x, params))
    ref = jax.block_until_ready(reference(x, wc, bc, w1, b1, w2, b2))

    assert out.shape == (B, N_CLS)
    # bf16 weights/activations/output + f32 accumulation: tolerance reflects
    # bf16 quantization only (probabilities are O(0.25); observed error << 1e-2).
    np.testing.assert_allclose(np.asarray(out), np.asarray(ref), rtol=2e-2, atol=8e-3)
    print("KERNEL_OK")
</pallas_src>

<mosaic_0001>
module attributes {stable_mosaic.version = 11 : i64} {
  func.func @fused_kernel(%arg0: i32, %arg1: memref<8x256xbf16, #tpu.memory_space<vmem>>, %arg2: memref<256x2048xbf16, #tpu.memory_space<vmem>>, %arg3: memref<1x1792xf32, #tpu.memory_space<vmem>>, %arg4: memref<1792x256xbf16, #tpu.memory_space<vmem>>, %arg5: memref<1x256xf32, #tpu.memory_space<vmem>>, %arg6: memref<256x128xbf16, #tpu.memory_space<vmem>>, %arg7: memref<1x128xf32, #tpu.memory_space<vmem>>, %arg8: memref<8x128xbf16, #tpu.memory_space<vmem>>) attributes {dimension_semantics = [#tpu.dimension_semantics<parallel>], iteration_bounds = array<i64: 1>, scalar_prefetch = 0 : i64, scratch_operands = 0 : i64, tpu.core_type = #tpu.core_type<tc>, window_params = [{transform_indices = @transform_0, window_bounds = array<i64: 8, 256>}, {pipeline_mode = #tpu.pipeline_mode<synchronous>, transform_indices = @transform_1, window_bounds = array<i64: 256, 2048>}, {pipeline_mode = #tpu.pipeline_mode<synchronous>, transform_indices = @transform_2, window_bounds = array<i64: 1, 1792>}, {pipeline_mode = #tpu.pipeline_mode<synchronous>, transform_indices = @transform_3, window_bounds = array<i64: 1792, 256>}, {pipeline_mode = #tpu.pipeline_mode<synchronous>, transform_indices = @transform_4, window_bounds = array<i64: 1, 256>}, {pipeline_mode = #tpu.pipeline_mode<synchronous>, transform_indices = @transform_5, window_bounds = array<i64: 256, 128>}, {pipeline_mode = #tpu.pipeline_mode<synchronous>, transform_indices = @transform_6, window_bounds = array<i64: 1, 128>}, {transform_indices = @transform_7, window_bounds = array<i64: 8, 128>}]} {
    %c0 = arith.constant 0 : index
    %c0_0 = arith.constant 0 : index
    %0 = vector.load %arg1[%c0, %c0_0] : memref<8x256xbf16, #tpu.memory_space<vmem>>, vector<8x256xbf16>
    %c0_1 = arith.constant 0 : index
    %c0_2 = arith.constant 0 : index
    %1 = vector.load %arg2[%c0_1, %c0_2] : memref<256x2048xbf16, #tpu.memory_space<vmem>>, vector<256x2048xbf16>
    %cst = arith.constant dense<0.000000e+00> : vector<8x2048xf32>
    %2 = tpu.matmul %0, %1, %cst {dimension_numbers = #tpu.dot_dimension_numbers<[1], [0], [0], [1], [0, 0, 1, 1], [], []>} : vector<8x256xbf16>, vector<256x2048xbf16>, vector<8x2048xf32> -> vector<8x2048xf32>
    %3 = vector.extract_strided_slice %2 {offsets = [0, 0], sizes = [8, 1792], strides = [1, 1]} : vector<8x2048xf32> to vector<8x1792xf32>
    %c0_3 = arith.constant 0 : index
    %c0_4 = arith.constant 0 : index
    %4 = vector.load %arg3[%c0_3, %c0_4] : memref<1x1792xf32, #tpu.memory_space<vmem>>, vector<1x1792xf32>
    %5 = vector.broadcast %4 : vector<1x1792xf32> to vector<8x1792xf32>
    %6 = arith.addf %3, %5 : vector<8x1792xf32>
    %cst_5 = arith.constant 0.000000e+00 : f32
    %7 = vector.broadcast %cst_5 : f32 to vector<8x1792xf32>
    %8 = arith.maximumf %6, %7 : vector<8x1792xf32>
    %9 = vector.extract_strided_slice %2 {offsets = [0, 1792], sizes = [8, 256], strides = [1, 1]} : vector<8x2048xf32> to vector<8x256xf32>
    %10 = arith.truncf %8 : vector<8x1792xf32> to vector<8x1792xbf16>
    %c0_6 = arith.constant 0 : index
    %c0_7 = arith.constant 0 : index
    %11 = vector.load %arg4[%c0_6, %c0_7] : memref<1792x256xbf16, #tpu.memory_space<vmem>>, vector<1792x256xbf16>
    %cst_8 = arith.constant dense<0.000000e+00> : vector<8x256xf32>
    %12 = tpu.matmul %10, %11, %cst_8 {dimension_numbers = #tpu.dot_dimension_numbers<[1], [0], [0], [1], [0, 0, 1, 1], [], []>} : vector<8x1792xbf16>, vector<1792x256xbf16>, vector<8x256xf32> -> vector<8x256xf32>
    %13 = arith.addf %9, %12 : vector<8x256xf32>
    %c0_9 = arith.constant 0 : index
    %c0_10 = arith.constant 0 : index
    %14 = vector.load %arg5[%c0_9, %c0_10] : memref<1x256xf32, #tpu.memory_space<vmem>>, vector<1x256xf32>
    %15 = vector.broadcast %14 : vector<1x256xf32> to vector<8x256xf32>
    %16 = arith.addf %13, %15 : vector<8x256xf32>
    %cst_11 = arith.constant 0.000000e+00 : f32
    %17 = vector.broadcast %cst_11 : f32 to vector<8x256xf32>
    %18 = arith.maximumf %16, %17 : vector<8x256xf32>
    %19 = arith.truncf %18 : vector<8x256xf32> to vector<8x256xbf16>
    %c0_12 = arith.constant 0 : index
    %c0_13 = arith.constant 0 : index
    %20 = vector.load %arg6[%c0_12, %c0_13] : memref<256x128xbf16, #tpu.memory_space<vmem>>, vector<256x128xbf16>
    %cst_14 = arith.constant dense<0.000000e+00> : vector<8x128xf32>
    %21 = tpu.matmul %19, %20, %cst_14 {dimension_numbers = #tpu.dot_dimension_numbers<[1], [0], [0], [1], [0, 0, 1, 1], [], []>} : vector<8x256xbf16>, vector<256x128xbf16>, vector<8x128xf32> -> vector<8x128xf32>
    %c0_15 = arith.constant 0 : index
    %c0_16 = arith.constant 0 : index
    %22 = vector.load %arg7[%c0_15, %c0_16] : memref<1x128xf32, #tpu.memory_space<vmem>>, vector<1x128xf32>
    %23 = vector.broadcast %22 : vector<1x128xf32> to vector<8x128xf32>
    %24 = arith.addf %21, %23 : vector<8x128xf32>
    %cst_17 = arith.constant dense<0xFF800000> : vector<8xf32>
    %25 = vector.multi_reduction <maximumf>, %24, %cst_17 [1] : vector<8x128xf32> to vector<8xf32>
    %26 = vector.shape_cast %25 : vector<8xf32> to vector<8x1xf32>
    %27 = vector.broadcast %26 : vector<8x1xf32> to vector<8x128xf32>
    %28 = arith.subf %24, %27 : vector<8x128xf32>
    %29 = math.exp %28 : vector<8x128xf32>
    %cst_18 = arith.constant dense<0.000000e+00> : vector<8xf32>
    %30 = vector.multi_reduction <add>, %29, %cst_18 [1] : vector<8x128xf32> to vector<8xf32>
    %31 = vector.shape_cast %30 : vector<8xf32> to vector<8x1xf32>
    %32 = tpu.reciprocal %31 {approx = true} : vector<8x1xf32> -> vector<8x1xf32>
    %33 = vector.broadcast %32 : vector<8x1xf32> to vector<8x128xf32>
    %34 = arith.mulf %29, %33 : vector<8x128xf32>
    %35 = arith.truncf %34 : vector<8x128xf32> to vector<8x128xbf16>
    %c0_19 = arith.constant 0 : index
    %c0_20 = arith.constant 0 : index
    %36 = vector.load %arg8[%c0_19, %c0_20] : memref<8x128xbf16, #tpu.memory_space<vmem>>, vector<8x128xbf16>
    tpu.vector_store %arg8[%c0_19, %c0_20], %35 {strides = array<i32>} : memref<8x128xbf16, #tpu.memory_space<vmem>>, vector<8x128xbf16>,
    return
  }
  func.func @transform_0(%arg0: i32) -> (i32, i32) {
    %c0_i32 = arith.constant 0 : i32
    %c0_i32_0 = arith.constant 0 : i32
    return %arg0, %c0_i32 : i32, i32
  }
  func.func @transform_1(%arg0: i32) -> (i32, i32) {
    %c0_i32 = arith.constant 0 : i32
    %c0_i32_0 = arith.constant 0 : i32
    %c0_i32_1 = arith.constant 0 : i32
    return %c0_i32, %c0_i32_0 : i32, i32
  }
  func.func @transform_2(%arg0: i32) -> (i32, i32) {
    %c0_i32 = arith.constant 0 : i32
    %c0_i32_0 = arith.constant 0 : i32
    %c0_i32_1 = arith.constant 0 : i32
    return %c0_i32, %c0_i32_0 : i32, i32
  }
  func.func @transform_3(%arg0: i32) -> (i32, i32) {
    %c0_i32 = arith.constant 0 : i32
    %c0_i32_0 = arith.constant 0 : i32
    %c0_i32_1 = arith.constant 0 : i32
    return %c0_i32, %c0_i32_0 : i32, i32
  }
  func.func @transform_4(%arg0: i32) -> (i32, i32) {
    %c0_i32 = arith.constant 0 : i32
    %c0_i32_0 = arith.constant 0 : i32
    %c0_i32_1 = arith.constant 0 : i32
    return %c0_i32, %c0_i32_0 : i32, i32
  }
  func.func @transform_5(%arg0: i32) -> (i32, i32) {
    %c0_i32 = arith.constant 0 : i32
    %c0_i32_0 = arith.constant 0 : i32
    %c0_i32_1 = arith.constant 0 : i32
    return %c0_i32, %c0_i32_0 : i32, i32
  }
  func.func @transform_6(%arg0: i32) -> (i32, i32) {
    %c0_i32 = arith.constant 0 : i32
    %c0_i32_0 = arith.constant 0 : i32
    %c0_i32_1 = arith.constant 0 : i32
    return %c0_i32, %c0_i32_0 : i32, i32
  }
  func.func @transform_7(%arg0: i32) -> (i32, i32) {
    %c0_i32 = arith.constant 0 : i32
    %c0_i32_0 = arith.constant 0 : i32
    return %arg0, %c0_i32 : i32, i32
  }
}

module attributes {stable_mosaic.version = 11 : i64} {
  func.func @fused_kernel(%arg0: i32, %arg1: memref<8x256xbf16, #tpu.memory_space<vmem>>, %arg2: memref<256x2048xbf16, #tpu.memory_space<vmem>>, %arg3: memref<1x1792xf32, #tpu.memory_space<vmem>>, %arg4: memref<1792x256xbf16, #tpu.memory_space<vmem>>, %arg5: memref<1x256xf32, #tpu.memory_space<vmem>>, %arg6: memref<256x128xbf16, #tpu.memory_space<vmem>>, %arg7: memref<1x128xf32, #tpu.memory_space<vmem>>, %arg8: memref<8x128xbf16, #tpu.memory_space<vmem>>) attributes {dimension_semantics = [#tpu.dimension_semantics<parallel>], iteration_bounds = array<i64: 1>, scalar_prefetch = 0 : i64, scratch_operands = 0 : i64, tpu.core_type = #tpu.core_type<tc>, window_params = [{transform_indices = @transform_0, window_bounds = array<i64: 8, 256>}, {pipeline_mode = #tpu.pipeline_mode<synchronous>, transform_indices = @transform_1, window_bounds = array<i64: 256, 2048>}, {pipeline_mode = #tpu.pipeline_mode<synchronous>, transform_indices = @transform_2, window_bounds = array<i64: 1, 1792>}, {pipeline_mode = #tpu.pipeline_mode<synchronous>, transform_indices = @transform_3, window_bounds = array<i64: 1792, 256>}, {pipeline_mode = #tpu.pipeline_mode<synchronous>, transform_indices = @transform_4, window_bounds = array<i64: 1, 256>}, {pipeline_mode = #tpu.pipeline_mode<synchronous>, transform_indices = @transform_5, window_bounds = array<i64: 256, 128>}, {pipeline_mode = #tpu.pipeline_mode<synchronous>, transform_indices = @transform_6, window_bounds = array<i64: 1, 128>}, {transform_indices = @transform_7, window_bounds = array<i64: 8, 128>}]} {
    %c0 = arith.constant 0 : index
    %c0_0 = arith.constant 0 : index
    %0 = vector.load %arg1[%c0, %c0_0] : memref<8x256xbf16, #tpu.memory_space<vmem>>, vector<8x256xbf16>
    %c0_1 = arith.constant 0 : index
    %c0_2 = arith.constant 0 : index
    %1 = vector.load %arg2[%c0_1, %c0_2] : memref<256x2048xbf16, #tpu.memory_space<vmem>>, vector<256x2048xbf16>
    %cst = arith.constant dense<0.000000e+00> : vector<8x2048xf32>
    %2 = tpu.matmul %0, %1, %cst {dimension_numbers = #tpu.dot_dimension_numbers<[1], [0], [0], [1], [0, 0, 1, 1], [], []>} : vector<8x256xbf16>, vector<256x2048xbf16>, vector<8x2048xf32> -> vector<8x2048xf32>
    %3 = vector.extract_strided_slice %2 {offsets = [0, 0], sizes = [8, 1792], strides = [1, 1]} : vector<8x2048xf32> to vector<8x1792xf32>
    %c0_3 = arith.constant 0 : index
    %c0_4 = arith.constant 0 : index
    %4 = vector.load %arg3[%c0_3, %c0_4] : memref<1x1792xf32, #tpu.memory_space<vmem>>, vector<1x1792xf32>
    %5 = vector.broadcast %4 : vector<1x1792xf32> to vector<8x1792xf32>
    %6 = arith.addf %3, %5 : vector<8x1792xf32>
    %cst_5 = arith.constant 0.000000e+00 : f32
    %7 = vector.broadcast %cst_5 : f32 to vector<8x1792xf32>
    %8 = arith.maximumf %6, %7 : vector<8x1792xf32>
    %9 = vector.extract_strided_slice %2 {offsets = [0, 1792], sizes = [8, 256], strides = [1, 1]} : vector<8x2048xf32> to vector<8x256xf32>
    %10 = arith.truncf %8 : vector<8x1792xf32> to vector<8x1792xbf16>
    %c0_6 = arith.constant 0 : index
    %c0_7 = arith.constant 0 : index
    %11 = vector.load %arg4[%c0_6, %c0_7] : memref<1792x256xbf16, #tpu.memory_space<vmem>>, vector<1792x256xbf16>
    %cst_8 = arith.constant dense<0.000000e+00> : vector<8x256xf32>
    %12 = tpu.matmul %10, %11, %cst_8 {dimension_numbers = #tpu.dot_dimension_numbers<[1], [0], [0], [1], [0, 0, 1, 1], [], []>} : vector<8x1792xbf16>, vector<1792x256xbf16>, vector<8x256xf32> -> vector<8x256xf32>
    %13 = arith.addf %9, %12 : vector<8x256xf32>
    %c0_9 = arith.constant 0 : index
    %c0_10 = arith.constant 0 : index
    %14 = vector.load %arg5[%c0_9, %c0_10] : memref<1x256xf32, #tpu.memory_space<vmem>>, vector<1x256xf32>
    %15 = vector.broadcast %14 : vector<1x256xf32> to vector<8x256xf32>
    %16 = arith.addf %13, %15 : vector<8x256xf32>
    %cst_11 = arith.constant 0.000000e+00 : f32
    %17 = vector.broadcast %cst_11 : f32 to vector<8x256xf32>
    %18 = arith.maximumf %16, %17 : vector<8x256xf32>
    %19 = arith.truncf %18 : vector<8x256xf32> to vector<8x256xbf16>
    %c0_12 = arith.constant 0 : index
    %c0_13 = arith.constant 0 : index
    %20 = vector.load %arg6[%c0_12, %c0_13] : memref<256x128xbf16, #tpu.memory_space<vmem>>, vector<256x128xbf16>
    %cst_14 = arith.constant dense<0.000000e+00> : vector<8x128xf32>
    %21 = tpu.matmul %19, %20, %cst_14 {dimension_numbers = #tpu.dot_dimension_numbers<[1], [0], [0], [1], [0, 0, 1, 1], [], []>} : vector<8x256xbf16>, vector<256x128xbf16>, vector<8x128xf32> -> vector<8x128xf32>
    %c0_15 = arith.constant 0 : index
    %c0_16 = arith.constant 0 : index
    %22 = vector.load %arg7[%c0_15, %c0_16] : memref<1x128xf32, #tpu.memory_space<vmem>>, vector<1x128xf32>
    %23 = vector.broadcast %22 : vector<1x128xf32> to vector<8x128xf32>
    %24 = arith.addf %21, %23 : vector<8x128xf32>
    %cst_17 = arith.constant dense<0xFF800000> : vector<8xf32>
    %25 = vector.multi_reduction <maximumf>, %24, %cst_17 [1] : vector<8x128xf32> to vector<8xf32>
    %26 = vector.shape_cast %25 : vector<8xf32> to vector<8x1xf32>
    %27 = vector.broadcast %26 : vector<8x1xf32> to vector<8x128xf32>
    %28 = arith.subf %24, %27 : vector<8x128xf32>
    %29 = math.exp %28 : vector<8x128xf32>
    %cst_18 = arith.constant dense<0.000000e+00> : vector<8xf32>
    %30 = vector.multi_reduction <add>, %29, %cst_18 [1] : vector<8x128xf32> to vector<8xf32>
    %31 = vector.shape_cast %30 : vector<8xf32> to vector<8x1xf32>
    %32 = tpu.reciprocal %31 {approx = true} : vector<8x1xf32> -> vector<8x1xf32>
    %33 = vector.broadcast %32 : vector<8x1xf32> to vector<8x128xf32>
    %34 = arith.mulf %29, %33 : vector<8x128xf32>
    %35 = arith.truncf %34 : vector<8x128xf32> to vector<8x128xbf16>
    %c0_19 = arith.constant 0 : index
    %c0_20 = arith.constant 0 : index
    %36 = vector.load %arg8[%c0_19, %c0_20] : memref<8x128xbf16, #tpu.memory_space<vmem>>, vector<8x128xbf16>
    tpu.vector_store %arg8[%c0_19, %c0_20], %35 {strides = array<i32>} : memref<8x128xbf16, #tpu.memory_space<vmem>>, vector<8x128xbf16>,
    return
  }
  func.func @transform_0(%arg0: i32) -> (i32, i32) {
    %c0_i32 = arith.constant 0 : i32
    %c0_i32_0 = arith.constant 0 : i32
    return %arg0, %c0_i32 : i32, i32
  }
  func.func @transform_1(%arg0: i32) -> (i32, i32) {
    %c0_i32 = arith.constant 0 : i32
    %c0_i32_0 = arith.constant 0 : i32
    %c0_i32_1 = arith.constant 0 : i32
    return %c0_i32, %c0_i32_0 : i32, i32
  }
  func.func @transform_2(%arg0: i32) -> (i32, i32) {
    %c0_i32 = arith.constant 0 : i32
    %c0_i32_0 = arith.constant 0 : i32
    %c0_i32_1 = arith.constant 0 : i32
    return %c0_i32, %c0_i32_0 : i32, i32
  }
  func.func @transform_3(%arg0: i32) -> (i32, i32) {
    %c0_i32 = arith.constant 0 : i32
    %c0_i32_0 = arith.constant 0 : i32
    %c0_i32_1 = arith.constant 0 : i32
    return %c0_i32, %c0_i32_0 : i32, i32
  }
  func.func @transform_4(%arg0: i32) -> (i32, i32) {
    %c0_i32 = arith.constant 0 : i32
    %c0_i32_0 = arith.constant 0 : i32
    %c0_i32_1 = arith.constant 0 : i32
    return %c0_i32, %c0_i32_0 : i32, i32
  }
  func.func @transform_5(%arg0: i32) -> (i32, i32) {
    %c0_i32 = arith.constant 0 : i32
    %c0_i32_0 = arith.constant 0 : i32
    %c0_i32_1 = arith.constant 0 : i32
    return %c0_i32, %c0_i32_0 : i32, i32
  }
  func.func @transform_6(%arg0: i32) -> (i32, i32) {
    %c0_i32 = arith.constant 0 : i32
    %c0_i32_0 = arith.constant 0 : i32
    %c0_i32_1 = arith.constant 0 : i32
    return %c0_i32, %c0_i32_0 : i32, i32
  }
  func.func @transform_7(%arg0: i32) -> (i32, i32) {
    %c0_i32 = arith.constant 0 : i32
    %c0_i32_0 = arith.constant 0 : i32
    return %arg0, %c0_i32 : i32, i32
  }
}

</mosaic_0001>

<bundles_post_ra>
// kernel: _forward_impl.1
= control target key start
LH: loop header
LB: loop body
LE: loop exit
PB: predicated region body
PF: predicated region fallthrough
CT: control target
= control target key end

     0   :  { %12 = vsyncpa [#allocation3], 0  ;;  %s5032_s0 = inlined_call_operand.vmem [shape: bf16[8,256], index: 0, kind: input, shape index: {}]   ;;  %s5033_s1 = inlined_call_operand.hbm [shape: bf16[256,2048], index: 1, kind: input, shape index: {}]   ;;  %s5034_s2 = inlined_call_operand.vmem [shape: f32[1,1792], index: 2, kind: input, shape index: {}]   ;;  %s5035_s3 = inlined_call_operand.hbm [shape: bf16[1792,256], index: 3, kind: input, shape index: {}]   ;;  %s5036_s4 = inlined_call_operand.vmem [shape: f32[1,256], index: 4, kind: input, shape index: {}]   ;;  %s5037_s5 = inlined_call_operand.hbm [shape: bf16[256,128], index: 5, kind: input, shape index: {}]   ;;  %s5038_s6 = inlined_call_operand.vmem [shape: f32[1,128], index: 6, kind: input, shape index: {}]   ;;  %s5039_s7 = inlined_call_operand.vmem [shape: bf16[8,128], index: 7, kind: output, shape index: {}]  }
   0x1   :  { %13 = vsyncpa [#allocation5], 0  ;;  %s4850_s24 = smov [#allocation4]  }
   0x2   :  { %s35_s25 = sshll.u32 %s4850_s24, 4  ;;  %s36_s25 = int_to_ptr.vmem [resolvable:$true] %s35_s25 }
   0x3   :  { %s4794_s26 = scalar_lea.vmem %s36_s25, 28672  ;;  %p4799_p1 = scmp.lt.s32.totalorder %s36_s25, %s36_s25 }
   0x4   :  { %p4795_p0 = scmp.ne.s32.totalorder %s36_s25, %s4794_s26  ;;  %p4800_p2 = scmp.lt.s32.totalorder %s4794_s26, %s4794_s26 }
   0x6   :  { %p4801_p3 = por %p4800_p2, %p4799_p1 }
   0x8   :  { %p4802_p4 = pnand %p4801_p3, %p4795_p0 }
   0xa   :  { %4805 = shalt.err (!%p4802_p4)
}
   0xb   :  { %s4851_s27 = smov 128   ;;  %s4852_s28 = smov 8  }
   0xc   :  { %41 = dma.hbm_to_vmem [thread:$0]  %s5035_s3, 28672, %s36_s25, [#allocation5], %s4851_s27, %s4851_s27, %s4852_s28  }
   0xd   :  { %s4853_s8 = smov [#allocation2]  }
   0xe   :  { %s21_s9 = sshll.u32 %s4853_s8, 4  ;;  %s22_s9 = int_to_ptr.vmem [resolvable:$true] %s21_s9 }
   0xf   :  { %s4814_s10 = scalar_lea.vmem %s22_s9, 32768  ;;  %p4819_p6 = scmp.lt.s32.totalorder %s22_s9, %s22_s9 }
  0x10   :  { %p4815_p5 = scmp.ne.s32.totalorder %s22_s9, %s4814_s10  ;;  %p4820_p7 = scmp.lt.s32.totalorder %s4814_s10, %s4814_s10 }
  0x12   :  { %p4821_p8 = por %p4820_p7, %p4819_p6 }
  0x14   :  { %p4822_p9 = pnand %p4821_p8, %p4815_p5 }
  0x16   :  { %4825 = shalt.err (!%p4822_p9)
}
  0x17   :  { %s4854_s11 = smov 1024   ;;  %s4855_s12 = smov 64  }
  0x18   :  { %27 = dma.hbm_to_vmem [thread:$0]  %s5033_s1, 32768, %s22_s9, [#allocation3], %s4854_s11, %s4854_s11, %s4855_s12  }
  0x19   :  { %s4856_s15 = smov [#allocation6]  }
  0x1a   :  { %s49_s16 = sshll.u32 %s4856_s15, 4  ;;  %s50_s16 = int_to_ptr.vmem [resolvable:$true] %s49_s16 }
  0x1b   :  { %s4834_s3 = scalar_lea.vmem %s50_s16, 2048  ;;  %p4839_p11 = scmp.lt.s32.totalorder %s50_s16, %s50_s16 }
  0x1c   :  { %p4835_p10 = scmp.ne.s32.totalorder %s50_s16, %s4834_s3  ;;  %p4840_p12 = scmp.lt.s32.totalorder %s4834_s3, %s4834_s3 }
  0x1e   :  { %p4841_p13 = por %p4840_p12, %p4839_p11 }
  0x20   :  { %p4842_p0 = pnand %p4841_p13, %p4835_p10 }
  0x22   :  { %4845 = shalt.err (!%p4842_p0)
}
  0x23   :  { %s4857_s17 = smov 4  }
  0x24   :  { %55 = dma.hbm_to_vmem [thread:$0]  %s5037_s5, 2048, %s50_s16, [#allocation5], %s4855_s12, %s4855_s12, %s4857_s17  }
  0x25   :  { %4846 = dma.done.wait [#allocation3], 32768  }
  0x26   :  { %4847 = vsyncadd [#allocation3], 4294934528 }
  0x27   :  { %4848 = dma.done.wait [#allocation5], 30720  }
  0x28   :  { %4849 = vsyncadd [#allocation5], 4294936576  ;;  %v181_v0 = vld [vmem:[#allocation2 + $0x380] sm:$0xff]  ;;  %v182_v2 = vld [vmem:[#allocation2 + $0x388] sm:$0xff] }
  0x29   :  { %v189_v1 = vld [vmem:[#allocation2 + $0x3c0] sm:$0xff]  ;;  %v190_v4 = vld [vmem:[#allocation2 + $0x3c8] sm:$0xff] }
  0x2a   :  { %v4014_v3 = vcombine.high %v181_v0, %v189_v1  ;;  %v4013_v5 = vcombine.low %v181_v0, %v189_v1  ;;  %v165_v6 = vld [vmem:[#allocation2 + $0x300] sm:$0xff]  ;;  %v4016_v8 = vcombine.high %v182_v2, %v190_v4  ;;  %v4015_v9 = vcombine.low %v182_v2, %v190_v4  ;;  %v166_v11 = vld [vmem:[#allocation2 + $0x308] sm:$0xff] }
  0x2b   :  { %v173_v7 = vld [vmem:[#allocation2 + $0x340] sm:$0xff]  ;;  %v174_v12 = vld [vmem:[#allocation2 + $0x348] sm:$0xff] }
  0x2c   :  { %v3998_v10 = vcombine.high %v165_v6, %v173_v7  ;;  %v149_v13 = vld [vmem:[#allocation2 + $0x280] sm:$0xff]  ;;  %1612 = vmatprep.subr.bf16.mxu0 %v4014_v3  ;;  %v4000_v14 = vcombine.high %v166_v11, %v174_v12  ;;  %v150_v16 = vld [vmem:[#allocation2 + $0x288] sm:$0xff]  ;;  %1653 = vmatprep.subr.bf16.mxu1 %v4016_v8  ;;  %v3997_v18 = vcombine.low %v165_v6, %v173_v7 }
  0x2d   :  { %v157_v15 = vld [vmem:[#allocation2 + $0x2c0] sm:$0xff]  ;;  %v158_v17 = vld [vmem:[#allocation2 + $0x2c8] sm:$0xff]  ;;  %1613 = vmatpush1.bf16.msra.mxu0 %v4013_v5  ;;  %1654 = vmatpush1.bf16.msra.mxu1 %v4015_v9  ;;  %v3999_v19 = vcombine.low %v166_v11, %v174_v12 }
  0x2e   :  { %1614 = vmatprep.subr.bf16.mxu0 %v3998_v10  ;;  %v3982_v20 = vcombine.high %v149_v13, %v157_v15  ;;  %1655 = vmatprep.subr.bf16.mxu1 %v4000_v14  ;;  %v3984_v21 = vcombine.high %v150_v16, %v158_v17  ;;  %v133_v22 = vld [vmem:[#allocation2 + $0x200] sm:$0xff]  ;;  %v134_v24 = vld [vmem:[#allocation2 + $0x208] sm:$0xff]  ;;  %v3981_v26 = vcombine.low %v149_v13, %v157_v15 }
  0x2f   :  { %v141_v23 = vld [vmem:[#allocation2 + $0x240] sm:$0xff]  ;;  %v142_v25 = vld [vmem:[#allocation2 + $0x248] sm:$0xff]  ;;  %v3983_v27 = vcombine.low %v150_v16, %v158_v17 }
  0x30   :  { %v3966_v28 = vcombine.high %v133_v22, %v141_v23  ;;  %v3968_v29 = vcombine.high %v134_v24, %v142_v25  ;;  %v117_v30 = vld [vmem:[#allocation2 + $0x180] sm:$0xff]  ;;  %v118_v32 = vld [vmem:[#allocation2 + $0x188] sm:$0xff]  ;;  %v3965_v34 = vcombine.low %v133_v22, %v141_v23  ;;  %v3967_v35 = vcombine.low %v134_v24, %v142_v25 }
  0x31   :  { %1615 = vmatpush1.bf16.msra.mxu0 %v3997_v18  ;;  %1656 = vmatpush1.bf16.msra.mxu1 %v3999_v19  ;;  %v125_v31 = vld [vmem:[#allocation2 + $0x1c0] sm:$0xff]  ;;  %v126_v33 = vld [vmem:[#allocation2 + $0x1c8] sm:$0xff] }
  0x32   :  { %1616 = vmatprep.subr.bf16.mxu0 %v3982_v20  ;;  %1657 = vmatprep.subr.bf16.mxu1 %v3984_v21  ;;  %v3950_v36 = vcombine.high %v117_v30, %v125_v31  ;;  %v3952_v37 = vcombine.high %v118_v32, %v126_v33  ;;  %v101_v38 = vld [vmem:[#allocation2 + $0x100] sm:$0xff]  ;;  %v102_v40 = vld [vmem:[#allocation2 + $0x108] sm:$0xff]  ;;  %v3949_v42 = vcombine.low %v117_v30, %v125_v31 }
  0x33   :  { %v109_v39 = vld [vmem:[#allocation2 + $0x140] sm:$0xff]  ;;  %v110_v41 = vld [vmem:[#allocation2 + $0x148] sm:$0xff]  ;;  %v3951_v43 = vcombine.low %v118_v32, %v126_v33 }
  0x34   :  { %v3934_v44 = vcombine.high %v101_v38, %v109_v39  ;;  %v3936_v45 = vcombine.high %v102_v40, %v110_v41  ;;  %v85_v46 = vld [vmem:[#allocation2 + $0x80] sm:$0xff]  ;;  %v86_v48 = vld [vmem:[#allocation2 + $0x88] sm:$0xff]  ;;  %v3933_v50 = vcombine.low %v101_v38, %v109_v39  ;;  %v3935_v51 = vcombine.low %v102_v40, %v110_v41 }
  0x35   :  { %1617 = vmatpush1.bf16.msra.mxu0 %v3981_v26  ;;  %1658 = vmatpush1.bf16.msra.mxu1 %v3983_v27  ;;  %v93_v47 = vld [vmem:[#allocation2 + $0xc0] sm:$0xff]  ;;  %v94_v49 = vld [vmem:[#allocation2 + $0xc8] sm:$0xff] }
  0x36   :  { %1618 = vmatprep.subr.bf16.mxu0 %v3966_v28  ;;  %1659 = vmatprep.subr.bf16.mxu1 %v3968_v29  ;;  %v3918_v52 = vcombine.high %v85_v46, %v93_v47  ;;  %v4910_v53 = vld [vmem:[%s5032_s0] sm:$0xff]  ;;  %v3920_v54 = vcombine.high %v86_v48, %v94_v49  ;;  %v70_v58 = vld [vmem:[#allocation2 + $0x8] sm:$0xff]  ;;  %v3917_v60 = vcombine.low %v85_v46, %v93_v47 }
  0x37   :  { %v69_v55 = vld [vmem:[#allocation2] sm:$0xff]  ;;  %v4914_v57 = vcombine.high %v4910_v53, %v4910_v53  ;;  %v78_v59 = vld [vmem:[#allocation2 + $0x48] sm:$0xff]  ;;  %v3919_v61 = vcombine.low %v86_v48, %v94_v49 }
  0x38   :  { %v77_v56 = vld [vmem:[#allocation2 + $0x40] sm:$0xff]  ;;  %v3904_v63 = vcombine.high %v70_v58, %v78_v59  ;;  %v310_v2 = vld [vmem:[#allocation2 + $0x788] sm:$0xff]  ;;  %v3903_v5 = vcombine.low %v70_v58, %v78_v59 }
  0x39   :  { %1619 = vmatpush1.bf16.msra.mxu0 %v3965_v34  ;;  %1660 = vmatpush1.bf16.msra.mxu1 %v3967_v35  ;;  %v3902_v62 = vcombine.high %v69_v55, %v77_v56  ;;  %v309_v0 = vld [vmem:[#allocation2 + $0x780] sm:$0xff]  ;;  %v318_v3 = vld [vmem:[#allocation2 + $0x7c8] sm:$0xff]  ;;  %v3901_v4 = vcombine.low %v69_v55, %v77_v56 }
  0x3a   :  { %1620 = vmatprep.subr.bf16.mxu0 %v3950_v36  ;;  %1661 = vmatprep.subr.bf16.mxu1 %v3952_v37  ;;  %v317_v1 = vld [vmem:[#allocation2 + $0x7c0] sm:$0xff]  ;;  %v4144_v7 = vcombine.high %v310_v2, %v318_v3  ;;  %v294_v10 = vld [vmem:[#allocation2 + $0x708] sm:$0xff]  ;;  %v4143_v13 = vcombine.low %v310_v2, %v318_v3  ;;  %v183_v2 = vld [vmem:[#allocation2 + $0x390] sm:$0xff] }
  0x3b   :  { %1644 = vmatprep.mubr.bf16.mxu0 %v4914_v57  ;;  %1685 = vmatprep.mubr.bf16.mxu1 %v4914_v57  ;;  %v4142_v6 = vcombine.high %v309_v0, %v317_v1  ;;  %v293_v8 = vld [vmem:[#allocation2 + $0x700] sm:$0xff]  ;;  %v302_v11 = vld [vmem:[#allocation2 + $0x748] sm:$0xff]  ;;  %v4141_v12 = vcombine.low %v309_v0, %v317_v1  ;;  %v191_v3 = vld [vmem:[#allocation2 + $0x3d0] sm:$0xff] }
  0x3c   :  { %v301_v9 = vld [vmem:[#allocation2 + $0x740] sm:$0xff]  ;;  %v4128_v15 = vcombine.high %v294_v10, %v302_v11  ;;  %v278_v18 = vld [vmem:[#allocation2 + $0x688] sm:$0xff]  ;;  %v4127_v21 = vcombine.low %v294_v10, %v302_v11  ;;  %v167_v10 = vld [vmem:[#allocation2 + $0x310] sm:$0xff] }
  0x3d   :  { %1621 = vmatpush1.bf16.msra.mxu0 %v3949_v42  ;;  %1662 = vmatpush1.bf16.msra.mxu1 %v3951_v43  ;;  %v4126_v14 = vcombine.high %v293_v8, %v301_v9  ;;  %v277_v16 = vld [vmem:[#allocation2 + $0x680] sm:$0xff]  ;;  %v286_v19 = vld [vmem:[#allocation2 + $0x6c8] sm:$0xff]  ;;  %v4125_v20 = vcombine.low %v293_v8, %v301_v9  ;;  %v4018_v8 = vcombine.high %v183_v2, %v191_v3  ;;  %v175_v11 = vld [vmem:[#allocation2 + $0x350] sm:$0xff] }
  0x3e   :  { %1622 = vmatprep.subr.bf16.mxu0 %v3934_v44  ;;  %1663 = vmatprep.subr.bf16.mxu1 %v3936_v45  ;;  %v285_v17 = vld [vmem:[#allocation2 + $0x6c0] sm:$0xff]  ;;  %v4112_v23 = vcombine.high %v278_v18, %v286_v19  ;;  %v262_v26 = vld [vmem:[#allocation2 + $0x608] sm:$0xff]  ;;  %v4111_v29 = vcombine.low %v278_v18, %v286_v19  ;;  %v151_v18 = vld [vmem:[#allocation2 + $0x290] sm:$0xff] }
  0x3f   :  { %v4110_v22 = vcombine.high %v277_v16, %v285_v17  ;;  %v261_v24 = vld [vmem:[#allocation2 + $0x600] sm:$0xff]  ;;  %v270_v27 = vld [vmem:[#allocation2 + $0x648] sm:$0xff]  ;;  %v4109_v28 = vcombine.low %v277_v16, %v285_v17  ;;  %v4002_v17 = vcombine.high %v167_v10, %v175_v11  ;;  %v159_v19 = vld [vmem:[#allocation2 + $0x2d0] sm:$0xff] }
  0x40   :  { %v269_v25 = vld [vmem:[#allocation2 + $0x640] sm:$0xff]  ;;  %v4096_v31 = vcombine.high %v262_v26, %v270_v27  ;;  %v246_v34 = vld [vmem:[#allocation2 + $0x588] sm:$0xff]  ;;  %v4095_v37 = vcombine.low %v262_v26, %v270_v27  ;;  %v143_v26 = vld [vmem:[#allocation2 + $0x250] sm:$0xff] }
  0x41   :  { %1623 = vmatpush1.bf16.msra.mxu0 %v3933_v50  ;;  %1664 = vmatpush1.bf16.msra.mxu1 %v3935_v51  ;;  %v4094_v30 = vcombine.high %v261_v24, %v269_v25  ;;  %v245_v32 = vld [vmem:[#allocation2 + $0x580] sm:$0xff]  ;;  %v254_v35 = vld [vmem:[#allocation2 + $0x5c8] sm:$0xff]  ;;  %v4093_v36 = vcombine.low %v261_v24, %v269_v25  ;;  %v3986_v24 = vcombine.high %v151_v18, %v159_v19  ;;  %v135_v25 = vld [vmem:[#allocation2 + $0x210] sm:$0xff] }
  0x42   :  { %1624 = vmatprep.subr.bf16.mxu0 %v3918_v52  ;;  %1665 = vmatprep.subr.bf16.mxu1 %v3920_v54  ;;  %v253_v33 = vld [vmem:[#allocation2 + $0x5c0] sm:$0xff]  ;;  %v4080_v39 = vcombine.high %v246_v34, %v254_v35  ;;  %v230_v42 = vld [vmem:[#allocation2 + $0x508] sm:$0xff]  ;;  %v4079_v45 = vcombine.low %v246_v34, %v254_v35  ;;  %v136_v27 = vld [vmem:[#allocation2 + $0x218] sm:$0xff] }
  0x43   :  { %v4078_v38 = vcombine.high %v245_v32, %v253_v33  ;;  %v229_v40 = vld [vmem:[#allocation2 + $0x500] sm:$0xff]  ;;  %v238_v43 = vld [vmem:[#allocation2 + $0x548] sm:$0xff]  ;;  %v4077_v44 = vcombine.low %v245_v32, %v253_v33  ;;  %v3970_v32 = vcombine.high %v135_v25, %v143_v26  ;;  %v119_v33 = vld [vmem:[#allocation2 + $0x190] sm:$0xff] }
  0x44   :  { %v237_v41 = vld [vmem:[#allocation2 + $0x540] sm:$0xff]  ;;  %v4064_v47 = vcombine.high %v230_v42, %v238_v43  ;;  %v214_v50 = vld [vmem:[#allocation2 + $0x488] sm:$0xff]  ;;  %v4063_v54 = vcombine.low %v230_v42, %v238_v43  ;;  %v127_v34 = vld [vmem:[#allocation2 + $0x1d0] sm:$0xff] }
  0x45   :  { %1625 = vmatpush1.bf16.msra.mxu0 %v3917_v60  ;;  %1666 = vmatpush1.bf16.msra.mxu1 %v3919_v61  ;;  %v4062_v46 = vcombine.high %v229_v40, %v237_v41  ;;  %v213_v48 = vld [vmem:[#allocation2 + $0x480] sm:$0xff]  ;;  %v222_v51 = vld [vmem:[#allocation2 + $0x4c8] sm:$0xff]  ;;  %v4061_v52 = vcombine.low %v229_v40, %v237_v41  ;;  %v120_v35 = vld [vmem:[#allocation2 + $0x198] sm:$0xff]  ;;  %v3954_v40 = vcombine.high %v119_v33, %v127_v34 }
  0x46   :  { %1626 = vmatprep.subr.bf16.mxu0 %v3902_v62  ;;  %1667 = vmatprep.subr.bf16.mxu1 %v3904_v63  ;;  %v221_v49 = vld [vmem:[#allocation2 + $0x4c0] sm:$0xff]  ;;  %v4048_v56 = vcombine.high %v214_v50, %v222_v51  ;;  %v198_v60 = vld [vmem:[#allocation2 + $0x408] sm:$0xff]  ;;  %v4047_v63 = vcombine.low %v214_v50, %v222_v51  ;;  %v103_v41 = vld [vmem:[#allocation2 + $0x110] sm:$0xff] }
  0x47   :  { %v4046_v55 = vcombine.high %v213_v48, %v221_v49  ;;  %v197_v58 = vld [vmem:[#allocation2 + $0x400] sm:$0xff]  ;;  %v206_v61 = vld [vmem:[#allocation2 + $0x448] sm:$0xff]  ;;  %v4045_v62 = vcombine.low %v213_v48, %v221_v49  ;;  %v111_v42 = vld [vmem:[#allocation2 + $0x150] sm:$0xff] }
  0x48   :  { %v205_v59 = vld [vmem:[#allocation2 + $0x440] sm:$0xff]  ;;  %v4032_v1 = vcombine.high %v198_v60, %v206_v61  ;;  %v104_v43 = vld [vmem:[#allocation2 + $0x118] sm:$0xff]  ;;  %v3938_v48 = vcombine.high %v103_v41, %v111_v42  ;;  %v87_v49 = vld [vmem:[#allocation2 + $0x90] sm:$0xff] }
  0x49   :  { %1627 = vmatpush1.bf16.msra.mxu0 %v3901_v4  ;;  %1668 = vmatpush1.bf16.msra.mxu1 %v3903_v5  ;;  %v4030_v0 = vcombine.high %v197_v58, %v205_v59  ;;  %v184_v4 = vld [vmem:[#allocation2 + $0x398] sm:$0xff]  ;;  %v95_v50 = vld [vmem:[#allocation2 + $0xd0] sm:$0xff] }
  0x4a   :  { %1628 = vmatprep.subr.bf16.mxu0 %v4142_v6  ;;  %1669 = vmatprep.subr.bf16.mxu1 %v4144_v7  ;;  %v192_v5 = vld [vmem:[#allocation2 + $0x3d8] sm:$0xff]  ;;  %v4029_v6 = vcombine.low %v197_v58, %v205_v59  ;;  %v4031_v7 = vcombine.low %v198_v60, %v206_v61  ;;  %v3922_v58 = vcombine.high %v87_v49, %v95_v50  ;;  %v71_v59 = vld [vmem:[#allocation2 + $0x10] sm:$0xff] }
  0x4b   :  { %v4020_v9 = vcombine.high %v184_v4, %v192_v5  ;;  %v4019_v16 = vcombine.low %v184_v4, %v192_v5  ;;  %v88_v51 = vld [vmem:[#allocation2 + $0x98] sm:$0xff]  ;;  %v79_v60 = vld [vmem:[#allocation2 + $0x50] sm:$0xff] }
  0x4c   :  { %v72_v61 = vld [vmem:[#allocation2 + $0x18] sm:$0xff]  ;;  %v319_v4 = vld [vmem:[#allocation2 + $0x7d0] sm:$0xff] }
  0x4d   :  { %1629 = vmatpush2.bf16.msra.mxu0 %v4141_v12  ;;  %1670 = vmatpush2.bf16.msra.mxu1 %v4143_v13  ;;  %v4920_v12 = vcombine.low %v4910_v53, %v4910_v53  ;;  %v168_v13 = vld [vmem:[#allocation2 + $0x318] sm:$0xff]  ;;  %v4001_v53 = vcombine.low %v167_v10, %v175_v11  ;;  %v295_v11 = vld [vmem:[#allocation2 + $0x710] sm:$0xff] }
  0x4e   :  { %1630 = vmatprep.subr.bf16.mxu0 %v4126_v14  ;;  %1671 = vmatprep.subr.bf16.mxu1 %v4128_v15  ;;  %v176_v14 = vld [vmem:[#allocation2 + $0x358] sm:$0xff]  ;;  %v4017_v15 = vcombine.low %v183_v2, %v191_v3  ;;  %v3906_v2 = vcombine.high %v71_v59, %v79_v60  ;;  %v311_v3 = vld [vmem:[#allocation2 + $0x790] sm:$0xff] }
  0x4f   :  { %v312_v5 = vld [vmem:[#allocation2 + $0x798] sm:$0xff]  ;;  %v4146_v10 = vcombine.high %v311_v3, %v319_v4 }
  0x51   :  { %1631 = vmatpush2.bf16.msra.mxu0 %v4125_v20  ;;  %1672 = vmatpush2.bf16.msra.mxu1 %v4127_v21  ;;  %v152_v20 = vld [vmem:[#allocation2 + $0x298] sm:$0xff]  ;;  %v4004_v21 = vcombine.high %v168_v13, %v176_v14 }
  0x52   :  { %1632 = vmatprep.subr.bf16.mxu0 %v4110_v22  ;;  %1673 = vmatprep.subr.bf16.mxu1 %v4112_v23  ;;  %v160_v22 = vld [vmem:[#allocation2 + $0x2d8] sm:$0xff]  ;;  %v4003_v23 = vcombine.low %v168_v13, %v176_v14  ;;  %v303_v13 = vld [vmem:[#allocation2 + $0x750] sm:$0xff] }
  0x53   :  { %v296_v14 = vld [vmem:[#allocation2 + $0x718] sm:$0xff] }
  0x55   :  { %1633 = vmatpush2.bf16.msra.mxu0 %v4109_v28  ;;  %1674 = vmatpush2.bf16.msra.mxu1 %v4111_v29  ;;  %v3988_v28 = vcombine.high %v152_v20, %v160_v22  ;;  %v144_v29 = vld [vmem:[#allocation2 + $0x258] sm:$0xff] }
  0x56   :  { %1634 = vmatprep.subr.bf16.mxu0 %v4094_v30  ;;  %1675 = vmatprep.subr.bf16.mxu1 %v4096_v31  ;;  %v3985_v30 = vcombine.low %v151_v18, %v159_v19  ;;  %v3987_v31 = vcombine.low %v152_v20, %v160_v22  ;;  %v4130_v19 = vcombine.high %v295_v11, %v303_v13  ;;  %v279_v20 = vld [vmem:[#allocation2 + $0x690] sm:$0xff]  ;;  %v280_v22 = vld [vmem:[#allocation2 + $0x698] sm:$0xff] }
  0x59   :  { %1635 = vmatpush2.bf16.msra.mxu0 %v4093_v36  ;;  %1676 = vmatpush2.bf16.msra.mxu1 %v4095_v37  ;;  %v3972_v36 = vcombine.high %v136_v27, %v144_v29  ;;  %v128_v37 = vld [vmem:[#allocation2 + $0x1d8] sm:$0xff] }
  0x5a   :  { %1636 = vmatprep.subr.bf16.mxu0 %v4078_v38  ;;  %1677 = vmatprep.subr.bf16.mxu1 %v4080_v39  ;;  %v3969_v38 = vcombine.low %v135_v25, %v143_v26  ;;  %v3971_v39 = vcombine.low %v136_v27, %v144_v29  ;;  %v263_v27 = vld [vmem:[#allocation2 + $0x610] sm:$0xff]  ;;  %v264_v29 = vld [vmem:[#allocation2 + $0x618] sm:$0xff] }
  0x5d   :  { %1637 = vmatpush2.bf16.msra.mxu0 %v4077_v44  ;;  %1678 = vmatpush2.bf16.msra.mxu1 %v4079_v45  ;;  %v3956_v44 = vcombine.high %v120_v35, %v128_v37  ;;  %v112_v45 = vld [vmem:[#allocation2 + $0x158] sm:$0xff] }
  0x5e   :  { %1638 = vmatprep.subr.bf16.mxu0 %v4062_v46  ;;  %1679 = vmatprep.subr.bf16.mxu1 %v4064_v47  ;;  %v3953_v46 = vcombine.low %v119_v33, %v127_v34  ;;  %v3955_v47 = vcombine.low %v120_v35, %v128_v37  ;;  %v247_v35 = vld [vmem:[#allocation2 + $0x590] sm:$0xff]  ;;  %v248_v37 = vld [vmem:[#allocation2 + $0x598] sm:$0xff] }
  0x61   :  { %1639 = vmatpush2.bf16.msra.mxu0 %v4061_v52  ;;  %1680 = vmatpush2.bf16.msra.mxu1 %v4063_v54  ;;  %v3940_v52 = vcombine.high %v104_v43, %v112_v45  ;;  %v96_v54 = vld [vmem:[#allocation2 + $0xd8] sm:$0xff] }
  0x62   :  { %1640 = vmatprep.subr.bf16.mxu0 %v4046_v55  ;;  %1681 = vmatprep.subr.bf16.mxu1 %v4048_v56  ;;  %v3937_v55 = vcombine.low %v103_v41, %v111_v42  ;;  %v3939_v56 = vcombine.low %v104_v43, %v112_v45  ;;  %v231_v43 = vld [vmem:[#allocation2 + $0x510] sm:$0xff]  ;;  %v232_v45 = vld [vmem:[#allocation2 + $0x518] sm:$0xff] }
  0x65   :  { %1641 = vmatpush2.bf16.msra.mxu0 %v4045_v62  ;;  %1682 = vmatpush2.bf16.msra.mxu1 %v4047_v63  ;;  %v3924_v62 = vcombine.high %v88_v51, %v96_v54  ;;  %v80_v63 = vld [vmem:[#allocation2 + $0x58] sm:$0xff] }
  0x66   :  { %1642 = vmatprep.subr.bf16.mxu0 %v4030_v0  ;;  %1683 = vmatprep.subr.bf16.mxu1 %v4032_v1  ;;  %v3921_v0 = vcombine.low %v87_v49, %v95_v50  ;;  %v3923_v1 = vcombine.low %v88_v51, %v96_v54  ;;  %v215_v51 = vld [vmem:[#allocation2 + $0x490] sm:$0xff]  ;;  %v216_v54 = vld [vmem:[#allocation2 + $0x498] sm:$0xff] }
  0x69   :  { %1643 = vmatpush2.bf16.msra.mxu0 %v4029_v6  ;;  %1684 = vmatpush2.bf16.msra.mxu1 %v4031_v7  ;;  %v3908_v6 = vcombine.high %v72_v61, %v80_v63  ;;  %v320_v7 = vld [vmem:[#allocation2 + $0x7d8] sm:$0xff] }
  0x6a   :  { %1694 = vmatprep.subr.bf16.mxu0 %v4018_v8  ;;  %1735 = vmatprep.subr.bf16.mxu1 %v4020_v9  ;;  %v3905_v8 = vcombine.low %v71_v59, %v79_v60  ;;  %v3907_v9 = vcombine.low %v72_v61, %v80_v63  ;;  %v4147_v18 = vcombine.low %v312_v5, %v320_v7  ;;  %v199_v61 = vld [vmem:[#allocation2 + $0x410] sm:$0xff]  ;;  %v200_v63 = vld [vmem:[#allocation2 + $0x418] sm:$0xff] }
  0x6c   :  { %1645 = vmatmul.mubr.bf16.vlgmr.msra.gmra.mxu0 %v4920_v12  ;;  %1686 = vmatmul.mubr.bf16.vlgmr.msra.gmra.mxu1 %v4920_v12 }
  0x6d   :  { %1695 = vmatpush1.bf16.msra.mxu0 %v4017_v15  ;;  %1736 = vmatpush1.bf16.msra.mxu1 %v4019_v16  ;;  %v4148_v15 = vcombine.high %v312_v5, %v320_v7  ;;  %v304_v16 = vld [vmem:[#allocation2 + $0x758] sm:$0xff]  ;;  %v185_v5 = vld [vmem:[#allocation2 + $0x3a0] sm:$0xff]  ;;  %v186_v7 = vld [vmem:[#allocation2 + $0x3a8] sm:$0xff] }
  0x6e   :  { %1696 = vmatprep.subr.bf16.mxu0 %v4002_v17  ;;  %1737 = vmatprep.subr.bf16.mxu1 %v4004_v21  ;;  %v4145_v17 = vcombine.low %v311_v3, %v319_v4  ;;  %v287_v21 = vld [vmem:[#allocation2 + $0x6d0] sm:$0xff]  ;;  %v4131_v25 = vcombine.low %v296_v14, %v304_v16 }
  0x6f   :  { %1726 = vmatprep.mubr.bf16.mxu0 %v4914_v57  ;;  %1767 = vmatprep.mubr.bf16.mxu1 %v4914_v57  ;;  %v4114_v26 = vcombine.high %v279_v20, %v287_v21 }
  0x71   :  { %1697 = vmatpush1.bf16.msra.mxu0 %v4001_v53  ;;  %1738 = vmatpush1.bf16.msra.mxu1 %v4003_v23  ;;  %v4132_v53 = vcombine.high %v296_v14, %v304_v16  ;;  %v288_v23 = vld [vmem:[#allocation2 + $0x6d8] sm:$0xff]  ;;  %v169_v14 = vld [vmem:[#allocation2 + $0x320] sm:$0xff]  ;;  %v170_v16 = vld [vmem:[#allocation2 + $0x328] sm:$0xff] }
  0x72   :  { %1698 = vmatprep.subr.bf16.mxu0 %v3986_v24  ;;  %1739 = vmatprep.subr.bf16.mxu1 %v3988_v28  ;;  %v4129_v24 = vcombine.low %v295_v11, %v303_v13  ;;  %v271_v28 = vld [vmem:[#allocation2 + $0x650] sm:$0xff]  ;;  %v4115_v33 = vcombine.low %v280_v22, %v288_v23 }
  0x73   :  { %v4098_v34 = vcombine.high %v263_v27, %v271_v28 }
  0x75   :  { %1699 = vmatpush1.bf16.msra.mxu0 %v3985_v30  ;;  %1740 = vmatpush1.bf16.msra.mxu1 %v3987_v31  ;;  %v4116_v30 = vcombine.high %v280_v22, %v288_v23  ;;  %v272_v31 = vld [vmem:[#allocation2 + $0x658] sm:$0xff]  ;;  %v161_v23 = vld [vmem:[#allocation2 + $0x2e0] sm:$0xff] }
  0x76   :  { %1700 = vmatprep.subr.bf16.mxu0 %v3970_v32  ;;  %1741 = vmatprep.subr.bf16.mxu1 %v3972_v36  ;;  %v4113_v32 = vcombine.low %v279_v20, %v287_v21  ;;  %v255_v36 = vld [vmem:[#allocation2 + $0x5d0] sm:$0xff]  ;;  %v4099_v41 = vcombine.low %v264_v29, %v272_v31 }
  0x77   :  { %v4082_v42 = vcombine.high %v247_v35, %v255_v36 }
  0x79   :  { %1701 = vmatpush1.bf16.msra.mxu0 %v3969_v38  ;;  %1742 = vmatpush1.bf16.msra.mxu1 %v3971_v39  ;;  %v4100_v38 = vcombine.high %v264_v29, %v272_v31  ;;  %v256_v39 = vld [vmem:[#allocation2 + $0x5d8] sm:$0xff]  ;;  %v145_v31 = vld [vmem:[#allocation2 + $0x260] sm:$0xff] }
  0x7a   :  { %1702 = vmatprep.subr.bf16.mxu0 %v3954_v40  ;;  %1743 = vmatprep.subr.bf16.mxu1 %v3956_v44  ;;  %v4097_v40 = vcombine.low %v263_v27, %v271_v28  ;;  %v239_v44 = vld [vmem:[#allocation2 + $0x550] sm:$0xff]  ;;  %v4083_v49 = vcombine.low %v248_v37, %v256_v39 }
  0x7b   :  { %v4066_v50 = vcombine.high %v231_v43, %v239_v44 }
  0x7d   :  { %1703 = vmatpush1.bf16.msra.mxu0 %v3953_v46  ;;  %1744 = vmatpush1.bf16.msra.mxu1 %v3955_v47  ;;  %v4084_v46 = vcombine.high %v248_v37, %v256_v39  ;;  %v240_v47 = vld [vmem:[#allocation2 + $0x558] sm:$0xff]  ;;  %v129_v39 = vld [vmem:[#allocation2 + $0x1e0] sm:$0xff] }
  0x7e   :  { %1704 = vmatprep.subr.bf16.mxu0 %v3938_v48  ;;  %1745 = vmatprep.subr.bf16.mxu1 %v3940_v52  ;;  %v4081_v48 = vcombine.low %v247_v35, %v255_v36  ;;  %v223_v52 = vld [vmem:[#allocation2 + $0x4d0] sm:$0xff]  ;;  %v4067_v59 = vcombine.low %v232_v45, %v240_v47 }
  0x7f   :  { %v4050_v60 = vcombine.high %v215_v51, %v223_v52 }
  0x81   :  { %1705 = vmatpush1.bf16.msra.mxu0 %v3937_v55  ;;  %1746 = vmatpush1.bf16.msra.mxu1 %v3939_v56  ;;  %v4068_v55 = vcombine.high %v232_v45, %v240_v47  ;;  %v224_v56 = vld [vmem:[#allocation2 + $0x4d8] sm:$0xff]  ;;  %v105_v45 = vld [vmem:[#allocation2 + $0x120] sm:$0xff]  ;;  %v106_v47 = vld [vmem:[#allocation2 + $0x128] sm:$0xff] }
  0x82   :  { %1706 = vmatprep.subr.bf16.mxu0 %v3922_v58  ;;  %1747 = vmatprep.subr.bf16.mxu1 %v3924_v62  ;;  %v4065_v58 = vcombine.low %v231_v43, %v239_v44  ;;  %v207_v62 = vld [vmem:[#allocation2 + $0x450] sm:$0xff]  ;;  %v4051_v3 = vcombine.low %v216_v54, %v224_v56 }
  0x83   :  { %v4034_v4 = vcombine.high %v199_v61, %v207_v62 }
  0x85   :  { %1707 = vmatpush1.bf16.msra.mxu0 %v3921_v0  ;;  %1748 = vmatpush1.bf16.msra.mxu1 %v3923_v1  ;;  %v4052_v0 = vcombine.high %v216_v54, %v224_v56  ;;  %v208_v1 = vld [vmem:[#allocation2 + $0x458] sm:$0xff]  ;;  %v89_v54 = vld [vmem:[#allocation2 + $0xa0] sm:$0xff]  ;;  %v90_v56 = vld [vmem:[#allocation2 + $0xa8] sm:$0xff] }
  0x86   :  { %1708 = vmatprep.subr.bf16.mxu0 %v3906_v2  ;;  %1749 = vmatprep.subr.bf16.mxu1 %v3908_v6  ;;  %v4049_v2 = vcombine.low %v215_v51, %v223_v52  ;;  %v193_v6 = vld [vmem:[#allocation2 + $0x3e0] sm:$0xff]  ;;  %v4035_v11 = vcombine.low %v200_v63, %v208_v1 }
  0x87   :  { %v4022_v13 = vcombine.high %v185_v5, %v193_v6 }
  0x89   :  { %1709 = vmatpush1.bf16.msra.mxu0 %v3905_v8  ;;  %1750 = vmatpush1.bf16.msra.mxu1 %v3907_v9  ;;  %v4036_v8 = vcombine.high %v200_v63, %v208_v1  ;;  %v194_v9 = vld [vmem:[#allocation2 + $0x3e8] sm:$0xff]  ;;  %v73_v63 = vld [vmem:[#allocation2 + $0x20] sm:$0xff] }
  0x8a   :  { %1710 = vmatprep.subr.bf16.mxu0 %v4146_v10  ;;  %1751 = vmatprep.subr.bf16.mxu1 %v4148_v15  ;;  %v4033_v10 = vcombine.low %v199_v61, %v207_v62  ;;  %v177_v15 = vld [vmem:[#allocation2 + $0x360] sm:$0xff]  ;;  %v4023_v20 = vcombine.low %v186_v7, %v194_v9  ;;  %v74_v1 = vld [vmem:[#allocation2 + $0x28] sm:$0xff] }
  0x8b   :  { %v4006_v21 = vcombine.high %v169_v14, %v177_v15 }
  0x8d   :  { %1711 = vmatpush2.bf16.msra.mxu0 %v4145_v17  ;;  %1752 = vmatpush2.bf16.msra.mxu1 %v4147_v18  ;;  %v4024_v17 = vcombine.high %v186_v7, %v194_v9  ;;  %v178_v18 = vld [vmem:[#allocation2 + $0x368] sm:$0xff]  ;;  %v313_v7 = vld [vmem:[#allocation2 + $0x7a0] sm:$0xff] }
  0x8e   :  { %1712 = vmatprep.subr.bf16.mxu0 %v4130_v19  ;;  %1753 = vmatprep.subr.bf16.mxu1 %v4132_v53  ;;  %v4021_v19 = vcombine.low %v185_v5, %v193_v6  ;;  %v4008_v22 = vcombine.high %v170_v16, %v178_v18  ;;  %v153_v53 = vld [vmem:[#allocation2 + $0x2a0] sm:$0xff]  ;;  %v4007_v27 = vcombine.low %v170_v16, %v178_v18  ;;  %v314_v9 = vld [vmem:[#allocation2 + $0x7a8] sm:$0xff] }
  0x8f   :  { %v3990_v28 = vcombine.high %v153_v53, %v161_v23  ;;  %v297_v16 = vld [vmem:[#allocation2 + $0x720] sm:$0xff]  ;;  %v298_v18 = vld [vmem:[#allocation2 + $0x728] sm:$0xff] }
  0x91   :  { %1713 = vmatpush2.bf16.msra.mxu0 %v4129_v24  ;;  %1754 = vmatpush2.bf16.msra.mxu1 %v4131_v25  ;;  %v154_v24 = vld [vmem:[#allocation2 + $0x2a8] sm:$0xff] }
  0x92   :  { %1714 = vmatprep.subr.bf16.mxu0 %v4114_v26  ;;  %1755 = vmatprep.subr.bf16.mxu1 %v4116_v30  ;;  %v162_v25 = vld [vmem:[#allocation2 + $0x2e8] sm:$0xff]  ;;  %v4005_v26 = vcombine.low %v169_v14, %v177_v15  ;;  %v137_v30 = vld [vmem:[#allocation2 + $0x220] sm:$0xff] }
  0x93   :  { %v3992_v29 = vcombine.high %v154_v24, %v162_v25  ;;  %v3991_v35 = vcombine.low %v154_v24, %v162_v25  ;;  %v3974_v36 = vcombine.high %v137_v30, %v145_v31  ;;  %v289_v24 = vld [vmem:[#allocation2 + $0x6e0] sm:$0xff]  ;;  %v282_v25 = vld [vmem:[#allocation2 + $0x6a8] sm:$0xff] }
  0x95   :  { %1715 = vmatpush2.bf16.msra.mxu0 %v4113_v32  ;;  %1756 = vmatpush2.bf16.msra.mxu1 %v4115_v33  ;;  %v138_v32 = vld [vmem:[#allocation2 + $0x228] sm:$0xff] }
  0x96   :  { %1716 = vmatprep.subr.bf16.mxu0 %v4098_v34  ;;  %1757 = vmatprep.subr.bf16.mxu1 %v4100_v38  ;;  %v146_v33 = vld [vmem:[#allocation2 + $0x268] sm:$0xff]  ;;  %v3989_v34 = vcombine.low %v153_v53, %v161_v23  ;;  %v121_v38 = vld [vmem:[#allocation2 + $0x1a0] sm:$0xff] }
  0x97   :  { %v3976_v37 = vcombine.high %v138_v32, %v146_v33  ;;  %v3975_v43 = vcombine.low %v138_v32, %v146_v33  ;;  %v3958_v44 = vcombine.high %v121_v38, %v129_v39  ;;  %v281_v23 = vld [vmem:[#allocation2 + $0x6a0] sm:$0xff]  ;;  %v266_v33 = vld [vmem:[#allocation2 + $0x628] sm:$0xff] }
  0x98   :  { %v273_v32 = vld [vmem:[#allocation2 + $0x660] sm:$0xff] }
  0x99   :  { %1717 = vmatpush2.bf16.msra.mxu0 %v4097_v40  ;;  %1758 = vmatpush2.bf16.msra.mxu1 %v4099_v41  ;;  %v122_v40 = vld [vmem:[#allocation2 + $0x1a8] sm:$0xff] }
  0x9a   :  { %1718 = vmatprep.subr.bf16.mxu0 %v4082_v42  ;;  %1759 = vmatprep.subr.bf16.mxu1 %v4084_v46  ;;  %v130_v41 = vld [vmem:[#allocation2 + $0x1e8] sm:$0xff]  ;;  %v3973_v42 = vcombine.low %v137_v30, %v145_v31  ;;  %v113_v46 = vld [vmem:[#allocation2 + $0x160] sm:$0xff]  ;;  %v4118_v30 = vcombine.high %v281_v23, %v289_v24 }
  0x9b   :  { %v3959_v51 = vcombine.low %v122_v40, %v130_v41  ;;  %v3942_v52 = vcombine.high %v105_v45, %v113_v46  ;;  %v265_v31 = vld [vmem:[#allocation2 + $0x620] sm:$0xff] }
  0x9d   :  { %1719 = vmatpush2.bf16.msra.mxu0 %v4081_v48  ;;  %1760 = vmatpush2.bf16.msra.mxu1 %v4083_v49  ;;  %v3960_v48 = vcombine.high %v122_v40, %v130_v41  ;;  %v114_v49 = vld [vmem:[#allocation2 + $0x168] sm:$0xff]  ;;  %v257_v40 = vld [vmem:[#allocation2 + $0x5e0] sm:$0xff] }
  0x9e   :  { %1720 = vmatprep.subr.bf16.mxu0 %v4066_v50  ;;  %1761 = vmatprep.subr.bf16.mxu1 %v4068_v55  ;;  %v3957_v50 = vcombine.low %v121_v38, %v129_v39  ;;  %v97_v55 = vld [vmem:[#allocation2 + $0xe0] sm:$0xff]  ;;  %v3943_v61 = vcombine.low %v106_v47, %v114_v49  ;;  %v4102_v38 = vcombine.high %v265_v31, %v273_v32  ;;  %v250_v41 = vld [vmem:[#allocation2 + $0x5a8] sm:$0xff] }
  0x9f   :  { %v3926_v62 = vcombine.high %v89_v54, %v97_v55  ;;  %v249_v39 = vld [vmem:[#allocation2 + $0x5a0] sm:$0xff] }
  0xa1   :  { %1721 = vmatpush2.bf16.msra.mxu0 %v4065_v58  ;;  %1762 = vmatpush2.bf16.msra.mxu1 %v4067_v59  ;;  %v3944_v58 = vcombine.high %v106_v47, %v114_v49  ;;  %v98_v59 = vld [vmem:[#allocation2 + $0xe8] sm:$0xff]  ;;  %v233_v47 = vld [vmem:[#allocation2 + $0x520] sm:$0xff] }
  0xa2   :  { %1722 = vmatprep.subr.bf16.mxu0 %v4050_v60  ;;  %1763 = vmatprep.subr.bf16.mxu1 %v4052_v0  ;;  %v3941_v60 = vcombine.low %v105_v45, %v113_v46  ;;  %v81_v0 = vld [vmem:[#allocation2 + $0x60] sm:$0xff]  ;;  %v3927_v5 = vcombine.low %v90_v56, %v98_v59  ;;  %v4086_v46 = vcombine.high %v249_v39, %v257_v40  ;;  %v234_v49 = vld [vmem:[#allocation2 + $0x528] sm:$0xff] }
  0xa3   :  { %v3910_v6 = vcombine.high %v73_v63, %v81_v0 }
  0xa5   :  { %1723 = vmatpush2.bf16.msra.mxu0 %v4049_v2  ;;  %1764 = vmatpush2.bf16.msra.mxu1 %v4051_v3  ;;  %v3928_v2 = vcombine.high %v90_v56, %v98_v59  ;;  %v82_v3 = vld [vmem:[#allocation2 + $0x68] sm:$0xff]  ;;  %v217_v56 = vld [vmem:[#allocation2 + $0x4a0] sm:$0xff] }
  0xa6   :  { %1724 = vmatprep.subr.bf16.mxu0 %v4034_v4  ;;  %1765 = vmatprep.subr.bf16.mxu1 %v4036_v8  ;;  %v3925_v4 = vcombine.low %v89_v54, %v97_v55  ;;  %v321_v8 = vld [vmem:[#allocation2 + $0x7e0] sm:$0xff]  ;;  %v3911_v14 = vcombine.low %v74_v1, %v82_v3  ;;  %v218_v59 = vld [vmem:[#allocation2 + $0x4a8] sm:$0xff] }
  0xa7   :  { %v4150_v15 = vcombine.high %v313_v7, %v321_v8 }
  0xa9   :  { %1725 = vmatpush2.bf16.msra.mxu0 %v4033_v10  ;;  %1766 = vmatpush2.bf16.msra.mxu1 %v4035_v11  ;;  %v3912_v10 = vcombine.high %v74_v1, %v82_v3  ;;  %v322_v11 = vld [vmem:[#allocation2 + $0x7e8] sm:$0xff]  ;;  %v201_v1 = vld [vmem:[#allocation2 + $0x420] sm:$0xff] }
  0xaa   :  { %1776 = vmatprep.subr.bf16.mxu0 %v4022_v13  ;;  %1817 = vmatprep.subr.bf16.mxu1 %v4024_v17  ;;  %v3909_v13 = vcombine.low %v73_v63, %v81_v0  ;;  %v305_v17 = vld [vmem:[#allocation2 + $0x760] sm:$0xff]  ;;  %v202_v3 = vld [vmem:[#allocation2 + $0x428] sm:$0xff] }
  0xab   :  { %v4134_v53 = vcombine.high %v297_v16, %v305_v17 }
  0xac   :  { %1727 = vmatmul.mubr.bf16.vlgmr.msra.gmra.mxu0 %v4920_v12  ;;  %1768 = vmatmul.mubr.bf16.vlgmr.msra.gmra.mxu1 %v4920_v12 }
  0xad   :  { %1777 = vmatpush1.bf16.msra.mxu0 %v4021_v19  ;;  %1818 = vmatpush1.bf16.msra.mxu1 %v4023_v20  ;;  %v4152_v19 = vcombine.high %v314_v9, %v322_v11  ;;  %v306_v20 = vld [vmem:[#allocation2 + $0x768] sm:$0xff] }
  0xae   :  { %1778 = vmatprep.subr.bf16.mxu0 %v4006_v21  ;;  %1819 = vmatprep.subr.bf16.mxu1 %v4008_v22  ;;  %v4149_v21 = vcombine.low %v313_v7, %v321_v8  ;;  %v4151_v22 = vcombine.low %v314_v9, %v322_v11  ;;  %v187_v9 = vld [vmem:[#allocation2 + $0x3b0] sm:$0xff] }
  0xaf   :  { %1808 = vmatprep.mubr.bf16.mxu0 %v4914_v57  ;;  %1849 = vmatprep.mubr.bf16.mxu1 %v4914_v57 }
  0xb1   :  { %1779 = vmatpush1.bf16.msra.mxu0 %v4005_v26  ;;  %1820 = vmatpush1.bf16.msra.mxu1 %v4007_v27  ;;  %v4136_v26 = vcombine.high %v298_v18, %v306_v20  ;;  %v290_v27 = vld [vmem:[#allocation2 + $0x6e8] sm:$0xff] }
  0xb2   :  { %1780 = vmatprep.subr.bf16.mxu0 %v3990_v28  ;;  %1821 = vmatprep.subr.bf16.mxu1 %v3992_v29  ;;  %v4133_v28 = vcombine.low %v297_v16, %v305_v17  ;;  %v4135_v29 = vcombine.low %v298_v18, %v306_v20  ;;  %v171_v18 = vld [vmem:[#allocation2 + $0x330] sm:$0xff]  ;;  %v172_v20 = vld [vmem:[#allocation2 + $0x338] sm:$0xff] }
  0xb5   :  { %1781 = vmatpush1.bf16.msra.mxu0 %v3989_v34  ;;  %1822 = vmatpush1.bf16.msra.mxu1 %v3991_v35  ;;  %v4120_v34 = vcombine.high %v282_v25, %v290_v27  ;;  %v274_v35 = vld [vmem:[#allocation2 + $0x668] sm:$0xff] }
  0xb6   :  { %1782 = vmatprep.subr.bf16.mxu0 %v3974_v36  ;;  %1823 = vmatprep.subr.bf16.mxu1 %v3976_v37  ;;  %v4117_v36 = vcombine.low %v281_v23, %v289_v24  ;;  %v4119_v37 = vcombine.low %v282_v25, %v290_v27  ;;  %v4103_v45 = vcombine.low %v266_v33, %v274_v35  ;;  %v163_v27 = vld [vmem:[#allocation2 + $0x2f0] sm:$0xff] }
  0xb9   :  { %1783 = vmatpush1.bf16.msra.mxu0 %v3973_v42  ;;  %1824 = vmatpush1.bf16.msra.mxu1 %v3975_v43  ;;  %v4104_v42 = vcombine.high %v266_v33, %v274_v35  ;;  %v258_v43 = vld [vmem:[#allocation2 + $0x5e8] sm:$0xff]  ;;  %v147_v35 = vld [vmem:[#allocation2 + $0x270] sm:$0xff] }
  0xba   :  { %1784 = vmatprep.subr.bf16.mxu0 %v3958_v44  ;;  %1825 = vmatprep.subr.bf16.mxu1 %v3960_v48  ;;  %v4101_v44 = vcombine.low %v265_v31, %v273_v32  ;;  %v241_v48 = vld [vmem:[#allocation2 + $0x560] sm:$0xff]  ;;  %v4087_v54 = vcombine.low %v250_v41, %v258_v43 }
  0xbb   :  { %v4070_v55 = vcombine.high %v233_v47, %v241_v48 }
  0xbd   :  { %1785 = vmatpush1.bf16.msra.mxu0 %v3957_v50  ;;  %1826 = vmatpush1.bf16.msra.mxu1 %v3959_v51  ;;  %v4088_v50 = vcombine.high %v250_v41, %v258_v43  ;;  %v242_v51 = vld [vmem:[#allocation2 + $0x568] sm:$0xff]  ;;  %v131_v43 = vld [vmem:[#allocation2 + $0x1f0] sm:$0xff] }
  0xbe   :  { %1786 = vmatprep.subr.bf16.mxu0 %v3942_v52  ;;  %1827 = vmatprep.subr.bf16.mxu1 %v3944_v58  ;;  %v4085_v52 = vcombine.low %v249_v39, %v257_v40  ;;  %v225_v58 = vld [vmem:[#allocation2 + $0x4e0] sm:$0xff]  ;;  %v4071_v63 = vcombine.low %v234_v49, %v242_v51 }
  0xbf   :  { %v4054_v0 = vcombine.high %v217_v56, %v225_v58 }
  0xc1   :  { %1787 = vmatpush1.bf16.msra.mxu0 %v3941_v60  ;;  %1828 = vmatpush1.bf16.msra.mxu1 %v3943_v61  ;;  %v4072_v60 = vcombine.high %v234_v49, %v242_v51  ;;  %v226_v61 = vld [vmem:[#allocation2 + $0x4e8] sm:$0xff]  ;;  %v107_v49 = vld [vmem:[#allocation2 + $0x130] sm:$0xff]  ;;  %v108_v51 = vld [vmem:[#allocation2 + $0x138] sm:$0xff] }
  0xc2   :  { %1788 = vmatprep.subr.bf16.mxu0 %v3926_v62  ;;  %1829 = vmatprep.subr.bf16.mxu1 %v3928_v2  ;;  %v4069_v62 = vcombine.low %v233_v47, %v241_v48  ;;  %v209_v2 = vld [vmem:[#allocation2 + $0x460] sm:$0xff]  ;;  %v4055_v7 = vcombine.low %v218_v59, %v226_v61 }
  0xc3   :  { %v4038_v8 = vcombine.high %v201_v1, %v209_v2 }
  0xc5   :  { %1789 = vmatpush1.bf16.msra.mxu0 %v3925_v4  ;;  %1830 = vmatpush1.bf16.msra.mxu1 %v3927_v5  ;;  %v4056_v4 = vcombine.high %v218_v59, %v226_v61  ;;  %v210_v5 = vld [vmem:[#allocation2 + $0x468] sm:$0xff]  ;;  %v91_v59 = vld [vmem:[#allocation2 + $0xb0] sm:$0xff]  ;;  %v92_v61 = vld [vmem:[#allocation2 + $0xb8] sm:$0xff] }
  0xc6   :  { %1790 = vmatprep.subr.bf16.mxu0 %v3910_v6  ;;  %1831 = vmatprep.subr.bf16.mxu1 %v3912_v10  ;;  %v4053_v6 = vcombine.low %v217_v56, %v225_v58  ;;  %v195_v10 = vld [vmem:[#allocation2 + $0x3f0] sm:$0xff]  ;;  %v4040_v11 = vcombine.high %v202_v3, %v210_v5  ;;  %v4039_v16 = vcombine.low %v202_v3, %v210_v5  ;;  %v76_v5 = vld [vmem:[#allocation2 + $0x38] sm:$0xff] }
  0xc7   :  { %v4026_v17 = vcombine.high %v187_v9, %v195_v10  ;;  %v75_v3 = vld [vmem:[#allocation2 + $0x30] sm:$0xff] }
  0xc9   :  { %1791 = vmatpush1.bf16.msra.mxu0 %v3909_v13  ;;  %1832 = vmatpush1.bf16.msra.mxu1 %v3911_v14  ;;  %v188_v13 = vld [vmem:[#allocation2 + $0x3b8] sm:$0xff] }
  0xca   :  { %1792 = vmatprep.subr.bf16.mxu0 %v4150_v15  ;;  %1833 = vmatprep.subr.bf16.mxu1 %v4152_v19  ;;  %v196_v14 = vld [vmem:[#allocation2 + $0x3f8] sm:$0xff]  ;;  %v4037_v15 = vcombine.low %v201_v1, %v209_v2  ;;  %v179_v19 = vld [vmem:[#allocation2 + $0x370] sm:$0xff] }
  0xcb   :  { %v4027_v23 = vcombine.low %v188_v13, %v196_v14  ;;  %v4010_v24 = vcombine.high %v171_v18, %v179_v19 }
  0xcd   :  { %1793 = vmatpush2.bf16.msra.mxu0 %v4149_v21  ;;  %1834 = vmatpush2.bf16.msra.mxu1 %v4151_v22  ;;  %v4028_v21 = vcombine.high %v188_v13, %v196_v14  ;;  %v180_v22 = vld [vmem:[#allocation2 + $0x378] sm:$0xff]  ;;  %v323_v13 = vld [vmem:[#allocation2 + $0x7f0] sm:$0xff] }
  0xce   :  { %1794 = vmatprep.subr.bf16.mxu0 %v4134_v53  ;;  %1835 = vmatprep.subr.bf16.mxu1 %v4136_v26  ;;  %v4025_v53 = vcombine.low %v187_v9, %v195_v10  ;;  %v4012_v25 = vcombine.high %v172_v20, %v180_v22  ;;  %v155_v26 = vld [vmem:[#allocation2 + $0x2b0] sm:$0xff]  ;;  %v4011_v31 = vcombine.low %v172_v20, %v180_v22  ;;  %v316_v14 = vld [vmem:[#allocation2 + $0x7b8] sm:$0xff] }
  0xcf   :  { %v3994_v32 = vcombine.high %v155_v26, %v163_v27  ;;  %v299_v20 = vld [vmem:[#allocation2 + $0x730] sm:$0xff]  ;;  %v300_v22 = vld [vmem:[#allocation2 + $0x738] sm:$0xff] }
  0xd1   :  { %1795 = vmatpush2.bf16.msra.mxu0 %v4133_v28  ;;  %1836 = vmatpush2.bf16.msra.mxu1 %v4135_v29  ;;  %v156_v28 = vld [vmem:[#allocation2 + $0x2b8] sm:$0xff] }
  0xd2   :  { %1796 = vmatprep.subr.bf16.mxu0 %v4118_v30  ;;  %1837 = vmatprep.subr.bf16.mxu1 %v4120_v34  ;;  %v164_v29 = vld [vmem:[#allocation2 + $0x2f8] sm:$0xff]  ;;  %v4009_v30 = vcombine.low %v171_v18, %v179_v19  ;;  %v139_v34 = vld [vmem:[#allocation2 + $0x230] sm:$0xff] }
  0xd3   :  { %v3996_v33 = vcombine.high %v156_v28, %v164_v29  ;;  %v3995_v39 = vcombine.low %v156_v28, %v164_v29  ;;  %v3978_v40 = vcombine.high %v139_v34, %v147_v35  ;;  %v291_v28 = vld [vmem:[#allocation2 + $0x6f0] sm:$0xff]  ;;  %v284_v29 = vld [vmem:[#allocation2 + $0x6b8] sm:$0xff] }
  0xd5   :  { %1797 = vmatpush2.bf16.msra.mxu0 %v4117_v36  ;;  %1838 = vmatpush2.bf16.msra.mxu1 %v4119_v37  ;;  %v140_v36 = vld [vmem:[#allocation2 + $0x238] sm:$0xff] }
  0xd6   :  { %1798 = vmatprep.subr.bf16.mxu0 %v4102_v38  ;;  %1839 = vmatprep.subr.bf16.mxu1 %v4104_v42  ;;  %v148_v37 = vld [vmem:[#allocation2 + $0x278] sm:$0xff]  ;;  %v3993_v38 = vcombine.low %v155_v26, %v163_v27  ;;  %v123_v42 = vld [vmem:[#allocation2 + $0x1b0] sm:$0xff] }
  0xd7   :  { %v3980_v41 = vcombine.high %v140_v36, %v148_v37  ;;  %v3979_v47 = vcombine.low %v140_v36, %v148_v37  ;;  %v3962_v48 = vcombine.high %v123_v42, %v131_v43  ;;  %v283_v27 = vld [vmem:[#allocation2 + $0x6b0] sm:$0xff]  ;;  %v268_v37 = vld [vmem:[#allocation2 + $0x638] sm:$0xff] }
  0xd8   :  { %v275_v36 = vld [vmem:[#allocation2 + $0x670] sm:$0xff] }
  0xd9   :  { %1799 = vmatpush2.bf16.msra.mxu0 %v4101_v44  ;;  %1840 = vmatpush2.bf16.msra.mxu1 %v4103_v45  ;;  %v124_v44 = vld [vmem:[#allocation2 + $0x1b8] sm:$0xff] }
  0xda   :  { %1800 = vmatprep.subr.bf16.mxu0 %v4086_v46  ;;  %1841 = vmatprep.subr.bf16.mxu1 %v4088_v50  ;;  %v132_v45 = vld [vmem:[#allocation2 + $0x1f8] sm:$0xff]  ;;  %v3977_v46 = vcombine.low %v139_v34, %v147_v35  ;;  %v115_v50 = vld [vmem:[#allocation2 + $0x170] sm:$0xff] }
  0xdb   :  { %v3946_v56 = vcombine.high %v107_v49, %v115_v50  ;;  %v267_v35 = vld [vmem:[#allocation2 + $0x630] sm:$0xff] }
  0xdd   :  { %1801 = vmatpush2.bf16.msra.mxu0 %v4085_v52  ;;  %1842 = vmatpush2.bf16.msra.mxu1 %v4087_v54  ;;  %v116_v52 = vld [vmem:[#allocation2 + $0x178] sm:$0xff]  ;;  %v3961_v54 = vcombine.low %v123_v42, %v131_v43  ;;  %v251_v43 = vld [vmem:[#allocation2 + $0x5b0] sm:$0xff] }
  0xde   :  { %1802 = vmatprep.subr.bf16.mxu0 %v4070_v55  ;;  %1843 = vmatprep.subr.bf16.mxu1 %v4072_v60  ;;  %v3963_v55 = vcombine.low %v124_v44, %v132_v45  ;;  %v3948_v58 = vcombine.high %v108_v51, %v116_v52  ;;  %v99_v60 = vld [vmem:[#allocation2 + $0xf0] sm:$0xff] }
  0xdf   :  { %v3930_v1 = vcombine.high %v91_v59, %v99_v60 }
  0xe1   :  { %1803 = vmatpush2.bf16.msra.mxu0 %v4069_v62  ;;  %1844 = vmatpush2.bf16.msra.mxu1 %v4071_v63  ;;  %v100_v62 = vld [vmem:[#allocation2 + $0xf8] sm:$0xff]  ;;  %v3945_v63 = vcombine.low %v107_v49, %v115_v50  ;;  %v235_v50 = vld [vmem:[#allocation2 + $0x530] sm:$0xff] }
  0xe2   :  { %1804 = vmatprep.subr.bf16.mxu0 %v4054_v0  ;;  %1845 = vmatprep.subr.bf16.mxu1 %v4056_v4  ;;  %v3947_v0 = vcombine.low %v108_v51, %v116_v52  ;;  %v3932_v2 = vcombine.high %v92_v61, %v100_v62  ;;  %v83_v4 = vld [vmem:[#allocation2 + $0x70] sm:$0xff]  ;;  %v236_v52 = vld [vmem:[#allocation2 + $0x538] sm:$0xff] }
  0xe3   :  { %v3914_v9 = vcombine.high %v75_v3, %v83_v4  ;;  %v243_v51 = vld [vmem:[#allocation2 + $0x570] sm:$0xff] }
  0xe5   :  { %1805 = vmatpush2.bf16.msra.mxu0 %v4053_v6  ;;  %1846 = vmatpush2.bf16.msra.mxu1 %v4055_v7  ;;  %v84_v6 = vld [vmem:[#allocation2 + $0x78] sm:$0xff]  ;;  %v3929_v7 = vcombine.low %v91_v59, %v99_v60  ;;  %v219_v60 = vld [vmem:[#allocation2 + $0x4b0] sm:$0xff] }
  0xe6   :  { %1806 = vmatprep.subr.bf16.mxu0 %v4038_v8  ;;  %1847 = vmatprep.subr.bf16.mxu1 %v4040_v11  ;;  %v3931_v8 = vcombine.low %v92_v61, %v100_v62  ;;  %v3916_v10 = vcombine.high %v76_v5, %v84_v6  ;;  %v315_v11 = vld [vmem:[#allocation2 + $0x7b0] sm:$0xff]  ;;  %v220_v62 = vld [vmem:[#allocation2 + $0x4b8] sm:$0xff] }
  0xe7   :  { %v4154_v18 = vcombine.high %v315_v11, %v323_v13  ;;  %v227_v61 = vld [vmem:[#allocation2 + $0x4f0] sm:$0xff] }
  0xe9   :  { %1807 = vmatpush2.bf16.msra.mxu0 %v4037_v15  ;;  %1848 = vmatpush2.bf16.msra.mxu1 %v4039_v16  ;;  %v324_v15 = vld [vmem:[#allocation2 + $0x7f8] sm:$0xff]  ;;  %v3913_v16 = vcombine.low %v75_v3, %v83_v4  ;;  %v203_v4 = vld [vmem:[#allocation2 + $0x430] sm:$0xff] }
  0xea   :  { %1858 = vmatprep.subr.bf16.mxu0 %v4026_v17  ;;  %1899 = vmatprep.subr.bf16.mxu1 %v4028_v21  ;;  %v3915_v17 = vcombine.low %v76_v5, %v84_v6  ;;  %v4156_v19 = vcombine.high %v316_v14, %v324_v15  ;;  %v307_v21 = vld [vmem:[#allocation2 + $0x770] sm:$0xff]  ;;  %v1944_v6 = vlaneseq }
  0xeb   :  { %v211_v5 = vld [vmem:[#allocation2 + $0x470] sm:$0xff] }
  0xec   :  { %1809 = vmatmul.mubr.bf16.vlgmr.msra.gmra.mxu0 %v4920_v12  ;;  %1850 = vmatmul.mubr.bf16.vlgmr.msra.gmra.mxu1 %v4920_v12 }
  0xed   :  { %1859 = vmatpush1.bf16.msra.mxu0 %v4025_v53  ;;  %1900 = vmatpush1.bf16.msra.mxu1 %v4027_v23  ;;  %v308_v53 = vld [vmem:[#allocation2 + $0x778] sm:$0xff]  ;;  %v4153_v23 = vcombine.low %v315_v11, %v323_v13  ;;  %v4042_v11 = vcombine.high %v203_v4, %v211_v5 }
  0xee   :  { %1860 = vmatprep.subr.bf16.mxu0 %v4010_v24  ;;  %1901 = vmatprep.subr.bf16.mxu1 %v4012_v25  ;;  %v4155_v24 = vcombine.low %v316_v14, %v324_v15  ;;  %v4138_v25 = vcombine.high %v299_v20, %v307_v21  ;;  %v4140_v26 = vcombine.high %v300_v22, %v308_v53  ;;  %v4934_v14 = vshrl.u32 %v1944_v6, 7  ;;  %v4481_v6 = vld [vmem:[#allocation4 + $0x1f0] ss:$8 sps:$4 sm:$0xff]  }
  0xef   :  { %1890 = vmatprep.mubr.bf16.mxu0 %v4914_v57  ;;  %1931 = vmatprep.mubr.bf16.mxu1 %v4914_v57  ;;  %v3964_v57 = vcombine.high %v124_v44, %v132_v45  ;;  %v259_v44 = vld [vmem:[#allocation2 + $0x5f0] sm:$0xff]  ;;  %v252_v45 = vld [vmem:[#allocation2 + $0x5b8] sm:$0xff]  ;;  %v4041_v15 = vcombine.low %v203_v4, %v211_v5 }
  0xf0   :  { %v4483_v4 = vld [vmem:[#allocation4 + $0x1f4] ss:$8 sps:$4 sm:$0xff]   ;;  %v4478_v5 = vld [vmem:[#allocation4 + $0xf0] ss:$8 sps:$4 sm:$0xff]  }
  0xf1   :  { %1861 = vmatpush1.bf16.msra.mxu0 %v4009_v30  ;;  %1902 = vmatpush1.bf16.msra.mxu1 %v4011_v31  ;;  %v292_v30 = vld [vmem:[#allocation2 + $0x6f8] sm:$0xff]  ;;  %v4137_v31 = vcombine.low %v299_v20, %v307_v21  ;;  %v4942_v20 = vld [vmem:[%s5034_s2] sm:$0xff]  ;;  %v1958_v21 = vsub.s32 3, %v4934_v14 }
  0xf2   :  { %1862 = vmatprep.subr.bf16.mxu0 %v3994_v32  ;;  %1903 = vmatprep.subr.bf16.mxu1 %v3996_v33  ;;  %v4139_v32 = vcombine.low %v300_v22, %v308_v53  ;;  %v4122_v33 = vcombine.high %v283_v27, %v291_v28  ;;  %v4124_v34 = vcombine.high %v284_v29, %v292_v30  ;;  %v4430_v22 = vld [vmem:[#allocation4 + $0x70] ss:$8 sps:$4 sm:$0xff]  }
  0xf3   :  { %v4433_v53 = vld [vmem:[#allocation4 + $0x170] ss:$8 sps:$4 sm:$0xff]  }
  0xf5   :  { %1863 = vmatpush1.bf16.msra.mxu0 %v3993_v38  ;;  %1904 = vmatpush1.bf16.msra.mxu1 %v3995_v39  ;;  %v276_v38 = vld [vmem:[#allocation2 + $0x678] sm:$0xff]  ;;  %v4121_v39 = vcombine.low %v283_v27, %v291_v28  ;;  %v1959_v27 = vrot.slane %v4942_v20, %v1958_v21  ;;  %v4436_v28 = vld [vmem:[#allocation4 + $0x60] ss:$8 sps:$4 sm:$0xff]  }
  0xf6   :  { %1864 = vmatprep.subr.bf16.mxu0 %v3978_v40  ;;  %1905 = vmatprep.subr.bf16.mxu1 %v3980_v41  ;;  %v4123_v40 = vcombine.low %v284_v29, %v292_v30  ;;  %v4106_v41 = vcombine.high %v267_v35, %v275_v36  ;;  %v4108_v42 = vcombine.high %v268_v37, %v276_v38 }
  0xf9   :  { %1865 = vmatpush1.bf16.msra.mxu0 %v3977_v46  ;;  %1906 = vmatpush1.bf16.msra.mxu1 %v3979_v47  ;;  %v260_v46 = vld [vmem:[#allocation2 + $0x5f8] sm:$0xff]  ;;  %v4105_v47 = vcombine.low %v267_v35, %v275_v36 }
  0xfa   :  { %1866 = vmatprep.subr.bf16.mxu0 %v3962_v48  ;;  %1907 = vmatprep.subr.bf16.mxu1 %v3964_v57  ;;  %v4107_v48 = vcombine.low %v268_v37, %v276_v38  ;;  %v4090_v57 = vcombine.high %v251_v43, %v259_v44  ;;  %v4092_v49 = vcombine.high %v252_v45, %v260_v46 }
  0xfd   :  { %1867 = vmatpush1.bf16.msra.mxu0 %v3961_v54  ;;  %1908 = vmatpush1.bf16.msra.mxu1 %v3963_v55  ;;  %v244_v54 = vld [vmem:[#allocation2 + $0x578] sm:$0xff]  ;;  %v4089_v55 = vcombine.low %v251_v43, %v259_v44 }
  0xfe   :  { %1868 = vmatprep.subr.bf16.mxu0 %v3946_v56  ;;  %1909 = vmatprep.subr.bf16.mxu1 %v3948_v58  ;;  %v4091_v56 = vcombine.low %v252_v45, %v260_v46  ;;  %v4074_v58 = vcombine.high %v235_v50, %v243_v51  ;;  %v4076_v59 = vcombine.high %v236_v52, %v244_v54  ;;  %v4453_v45 = vld [vmem:[#allocation4 + $0x144] ss:$8 sps:$4 sm:$0xff]  }
 0x101   :  { %1869 = vmatpush1.bf16.msra.mxu0 %v3945_v63  ;;  %1910 = vmatpush1.bf16.msra.mxu1 %v3947_v0  ;;  %v228_v63 = vld [vmem:[#allocation2 + $0x4f8] sm:$0xff]  ;;  %v4073_v0 = vcombine.low %v235_v50, %v243_v51 }
 0x102   :  { %1870 = vmatprep.subr.bf16.mxu0 %v3930_v1  ;;  %1911 = vmatprep.subr.bf16.mxu1 %v3932_v2  ;;  %v4075_v1 = vcombine.low %v236_v52, %v244_v54  ;;  %v4058_v2 = vcombine.high %v219_v60, %v227_v61  ;;  %v4060_v3 = vcombine.high %v220_v62, %v228_v63  ;;  %v4459_v50 = vld [vmem:[#allocation4 + $0x134] ss:$8 sps:$4 sm:$0xff]   ;;  %v4454_v51 = vld [vmem:[#allocation4 + $0x30] ss:$8 sps:$4 sm:$0xff]   ;;  %v4462_v54 = vld [vmem:[#allocation4 + $0x24] ss:$8 sps:$4 sm:$0xff]  }
 0x103   :  { %v4457_v52 = vld [vmem:[#allocation4 + $0x130] ss:$8 sps:$4 sm:$0xff]  }
 0x105   :  { %1871 = vmatpush1.bf16.msra.mxu0 %v3929_v7  ;;  %1912 = vmatpush1.bf16.msra.mxu1 %v3931_v8  ;;  %v204_v7 = vld [vmem:[#allocation2 + $0x438] sm:$0xff] }
 0x106   :  { %1872 = vmatprep.subr.bf16.mxu0 %v3914_v9  ;;  %1913 = vmatprep.subr.bf16.mxu1 %v3916_v10  ;;  %v212_v8 = vld [vmem:[#allocation2 + $0x478] sm:$0xff]  ;;  %v4057_v9 = vcombine.low %v219_v60, %v227_v61  ;;  %v4059_v10 = vcombine.low %v220_v62, %v228_v63  ;;  %v4474_v63 = vld [vmem:[#allocation4 + $0x4] ss:$8 sps:$4 sm:$0xff]  }
 0x107   :  { %v4044_v13 = vcombine.high %v204_v7, %v212_v8  ;;  %v4471_v60 = vld [vmem:[#allocation4 + $0x114] ss:$8 sps:$4 sm:$0xff]   ;;  %v4466_v61 = vld [vmem:[#allocation4 + $0x10] ss:$8 sps:$4 sm:$0xff]  }
 0x108   :  { %v4469_v62 = vld [vmem:[#allocation4 + $0x110] ss:$8 sps:$4 sm:$0xff]  }
 0x109   :  { %1873 = vmatpush1.bf16.msra.mxu0 %v3913_v16  ;;  %1914 = vmatpush1.bf16.msra.mxu1 %v3915_v17  ;;  %v4043_v16 = vcombine.low %v204_v7, %v212_v8  ;;  %v4432_v17 = vld [vmem:[#allocation4 + $0x74] ss:$8 sps:$4 sm:$0xff]   ;;  %v4486_v7 = vld [vmem:[#allocation4 + $0xe4] ss:$8 sps:$4 sm:$0xff]  }
 0x10a   :  { %1874 = vmatprep.subr.bf16.mxu0 %v4154_v18  ;;  %1915 = vmatprep.subr.bf16.mxu1 %v4156_v19  ;;  %v4435_v18 = vld [vmem:[#allocation4 + $0x174] ss:$8 sps:$4 sm:$0xff]   ;;  %v4937_v19 = vsub.s32 1, %v4934_v14  ;;  %v4489_v8 = vld [vmem:[#allocation4 + $0x1e4] ss:$8 sps:$4 sm:$0xff]  }
 0x10d   :  { %1875 = vmatpush2.bf16.msra.mxu0 %v4153_v23  ;;  %1916 = vmatpush2.bf16.msra.mxu1 %v4155_v24  ;;  %v4438_v23 = vld [vmem:[#allocation4 + $0x64] ss:$8 sps:$4 sm:$0xff]   ;;  %v1951_v24 = vrot.slane %v4942_v20, %v4937_v19 }
 0x10e   :  { %1876 = vmatprep.subr.bf16.mxu0 %v4138_v25  ;;  %1917 = vmatprep.subr.bf16.mxu1 %v4140_v26  ;;  %v4441_v25 = vld [vmem:[#allocation4 + $0x164] ss:$8 sps:$4 sm:$0xff]  }
 0x111   :  { %1877 = vmatpush2.bf16.msra.mxu0 %v4137_v31  ;;  %1918 = vmatpush2.bf16.msra.mxu1 %v4139_v32  ;;  %v4439_v31 = vld [vmem:[#allocation4 + $0x160] ss:$8 sps:$4 sm:$0xff]   ;;  %v4444_v32 = vld [vmem:[#allocation4 + $0x54] ss:$8 sps:$4 sm:$0xff]  }
 0x112   :  { %1878 = vmatprep.subr.bf16.mxu0 %v4122_v33  ;;  %1919 = vmatprep.subr.bf16.mxu1 %v4124_v34  ;;  %v4447_v34 = vld [vmem:[#allocation4 + $0x154] ss:$8 sps:$4 sm:$0xff]  }
 0x115   :  { %1879 = vmatpush2.bf16.msra.mxu0 %v4121_v39  ;;  %1920 = vmatpush2.bf16.msra.mxu1 %v4123_v40  ;;  %v4442_v39 = vld [vmem:[#allocation4 + $0x50] ss:$8 sps:$4 sm:$0xff]  }
 0x116   :  { %1880 = vmatprep.subr.bf16.mxu0 %v4106_v41  ;;  %1921 = vmatprep.subr.bf16.mxu1 %v4108_v42  ;;  %v4445_v41 = vld [vmem:[#allocation4 + $0x150] ss:$8 sps:$4 sm:$0xff]   ;;  %v4450_v42 = vld [vmem:[#allocation4 + $0x44] ss:$8 sps:$4 sm:$0xff]  }
 0x119   :  { %1881 = vmatpush2.bf16.msra.mxu0 %v4105_v47  ;;  %1922 = vmatpush2.bf16.msra.mxu1 %v4107_v48  ;;  %v4448_v48 = vld [vmem:[#allocation4 + $0x40] ss:$8 sps:$4 sm:$0xff]  }
 0x11a   :  { %1882 = vmatprep.subr.bf16.mxu0 %v4090_v57  ;;  %1923 = vmatprep.subr.bf16.mxu1 %v4092_v49  ;;  %v4451_v57 = vld [vmem:[#allocation4 + $0x140] ss:$8 sps:$4 sm:$0xff]   ;;  %v4456_v49 = vld [vmem:[#allocation4 + $0x34] ss:$8 sps:$4 sm:$0xff]  }
 0x11d   :  { %1883 = vmatpush2.bf16.msra.mxu0 %v4089_v55  ;;  %1924 = vmatpush2.bf16.msra.mxu1 %v4091_v56  ;;  %v4465_v55 = vld [vmem:[#allocation4 + $0x124] ss:$8 sps:$4 sm:$0xff]   ;;  %v4460_v56 = vld [vmem:[#allocation4 + $0x20] ss:$8 sps:$4 sm:$0xff]  }
 0x11e   :  { %1884 = vmatprep.subr.bf16.mxu0 %v4074_v58  ;;  %1925 = vmatprep.subr.bf16.mxu1 %v4076_v59  ;;  %v4463_v58 = vld [vmem:[#allocation4 + $0x120] ss:$8 sps:$4 sm:$0xff]   ;;  %v4468_v59 = vld [vmem:[#allocation4 + $0x14] ss:$8 sps:$4 sm:$0xff]  }
 0x121   :  { %1885 = vmatpush2.bf16.msra.mxu0 %v4073_v0  ;;  %1926 = vmatpush2.bf16.msra.mxu1 %v4075_v1  ;;  %v4477_v0 = vld [vmem:[#allocation4 + $0x104] ss:$8 sps:$4 sm:$0xff]   ;;  %v4472_v1 = vld [vmem:[#allocation4] ss:$8 sps:$4 sm:$0xff]  }
 0x122   :  { %1886 = vmatprep.subr.bf16.mxu0 %v4058_v2  ;;  %1927 = vmatprep.subr.bf16.mxu1 %v4060_v3  ;;  %v4475_v2 = vld [vmem:[#allocation4 + $0x100] ss:$8 sps:$4 sm:$0xff]   ;;  %v4480_v3 = vld [vmem:[#allocation4 + $0xf4] ss:$8 sps:$4 sm:$0xff]  }
 0x125   :  { %1887 = vmatpush2.bf16.msra.mxu0 %v4057_v9  ;;  %1928 = vmatpush2.bf16.msra.mxu1 %v4059_v10  ;;  %v4484_v9 = vld [vmem:[#allocation4 + $0xe0] ss:$8 sps:$4 sm:$0xff]  }
 0x126   :  { %1888 = vmatprep.subr.bf16.mxu0 %v4042_v11  ;;  %1929 = vmatprep.subr.bf16.mxu1 %v4044_v13  ;;  %v4487_v10 = vld [vmem:[#allocation4 + $0x1e0] ss:$8 sps:$4 sm:$0xff]   ;;  %v4492_v11 = vld [vmem:[#allocation4 + $0xd4] ss:$8 sps:$4 sm:$0xff]  }
 0x127   :  { %v4495_v13 = vld [vmem:[#allocation4 + $0x1d4] ss:$8 sps:$4 sm:$0xff]  }
 0x129   :  { %1889 = vmatpush2.bf16.msra.mxu0 %v4041_v15  ;;  %1930 = vmatpush2.bf16.msra.mxu1 %v4043_v16  ;;  %v4490_v15 = vld [vmem:[#allocation4 + $0xd0] ss:$8 sps:$4 sm:$0xff]  }
 0x12a   :  { %3400 = vmatprep.subr.bf16.mxu0 %v4432_v17  ;;  %3441 = vmatprep.subr.bf16.mxu1 %v4435_v18  ;;  %v4493_v16 = vld [vmem:[#allocation4 + $0x1d0] ss:$8 sps:$4 sm:$0xff]   ;;  %v4498_v17 = vld [vmem:[#allocation4 + $0xc4] ss:$8 sps:$4 sm:$0xff]  }
 0x12b   :  { %v4501_v18 = vld [vmem:[#allocation4 + $0x1c4] ss:$8 sps:$4 sm:$0xff]  }
 0x12c   :  { %v4947_v26 = vpop.f32.mrf.mxu0  ;;  %1891 = vmatmul.mubr.bf16.vlgmr.msra.gmra.mxu0 %v4920_v12  ;;  %1932 = vmatmul.mubr.bf16.vlgmr.msra.gmra.mxu1 %v4920_v12  ;;  %v4954_v29 = vpop.f32.mrf.mxu1 }
 0x12d   :  { %3401 = vmatpush1.bf16.msra.mxu0 %v4430_v22  ;;  %3442 = vmatpush1.bf16.msra.mxu1 %v4433_v53  ;;  %v4496_v22 = vld [vmem:[#allocation4 + $0xc0] ss:$8 sps:$4 sm:$0xff]  }
 0x12e   :  { %v1648_v30 = vpop.f32.mrf.mxu0  ;;  %3402 = vmatprep.subr.bf16.mxu0 %v4438_v23  ;;  %3443 = vmatprep.subr.bf16.mxu1 %v4441_v25  ;;  %v1689_v35 = vpop.f32.mrf.mxu1  ;;  %v4499_v53 = vld [vmem:[#allocation4 + $0x1c0] ss:$8 sps:$4 sm:$0xff]   ;;  %v4504_v23 = vld [vmem:[#allocation4 + $0xb4] ss:$8 sps:$4 sm:$0xff]   ;;  %v4502_v25 = vld [vmem:[#allocation4 + $0xb0] ss:$8 sps:$4 sm:$0xff]  }
 0x12f   :  { %v2015_v33 = vadd.f32 %v1951_v24, %v1648_v30  ;;  %v2017_v37 = vadd.f32 %v1959_v27, %v1689_v35  ;;  %v4507_v24 = vld [vmem:[#allocation4 + $0x1b4] ss:$8 sps:$4 sm:$0xff]   ;;  %v1954_v27 = vsub.s32 2, %v4934_v14  ;;  %v4505_v30 = vld [vmem:[#allocation4 + $0x1b0] ss:$8 sps:$4 sm:$0xff]  }
 0x130   :  { %v1650_v36 = vpop.f32.mrf.mxu0  ;;  %v1691_v40 = vpop.f32.mrf.mxu1 }
 0x131   :  { %v2029_v38 = vmax.f32 %v2015_v33, 0.0  ;;  %3403 = vmatpush1.bf16.msra.mxu0 %v4436_v28  ;;  %3444 = vmatpush1.bf16.msra.mxu1 %v4439_v31  ;;  %v2031_v43 = vmax.f32 %v2017_v37, 0.0  ;;  %v4958_v28 = vsub.s32 0, %v4934_v14  ;;  %v4510_v31 = vld [vmem:[#allocation4 + $0xa4] ss:$8 sps:$4 sm:$0xff]  }
 0x132   :  { %v1651_v12 = vpop.f32.mrf.mxu0  ;;  %3404 = vmatprep.subr.bf16.mxu0 %v4444_v32  ;;  %3445 = vmatprep.subr.bf16.mxu1 %v4447_v34  ;;  %v1692_v46 = vpop.f32.mrf.mxu1  ;;  %v4513_v32 = vld [vmem:[#allocation4 + $0x1a4] ss:$8 sps:$4 sm:$0xff]   ;;  %v4508_v33 = vld [vmem:[#allocation4 + $0xa0] ss:$8 sps:$4 sm:$0xff]   ;;  %v1955_v34 = vrot.slane %v4942_v20, %v1954_v27  ;;  %v4516_v37 = vld [vmem:[#allocation4 + $0x94] ss:$8 sps:$4 sm:$0xff]  }
 0x133   :  { %v2043_v44 = vpack.c.bf16 %v2029_v38, %v2029_v38  ;;  %v2045_v47 = vpack.c.bf16 %v2031_v43, %v2031_v43  ;;  %v1947_v35 = vrot.slane %v4942_v20, %v4958_v28  ;;  %v4511_v36 = vld [vmem:[#allocation4 + $0x1a0] ss:$8 sps:$4 sm:$0xff]   ;;  %v4519_v38 = vld [vmem:[#allocation4 + $0x194] ss:$8 sps:$4 sm:$0xff]   ;;  %v4514_v40 = vld [vmem:[#allocation4 + $0x90] ss:$8 sps:$4 sm:$0xff]  }
 0x134   :  { %v4525_v43 = vld [vmem:[#allocation4 + $0x184] ss:$8 sps:$4 sm:$0xff]  }
 0x135   :  { %3405 = vmatpush1.bf16.msra.mxu0 %v4442_v39  ;;  %3432 = vmatprep.mubr.bf16.mxu0 %v2043_v44  ;;  %v2016_v39 = vadd.f32 %v1955_v34, %v4954_v29  ;;  %v2014_v12 = vadd.f32 %v1947_v35, %v4947_v26  ;;  %v1966_v29 = vsub.s32 5, %v4934_v14  ;;  %v1974_v26 = vsub.s32 7, %v4934_v14  ;;  %v4559_v34 = vld [vmem:[#allocation4 + $0x320] ss:$8 sps:$4 sm:$0xff]   ;;  %v4564_v35 = vld [vmem:[#allocation4 + $0x214] ss:$8 sps:$4 sm:$0xff]  }
 0x136   :  { %3446 = vmatpush1.bf16.msra.mxu1 %v4445_v41  ;;  %3406 = vmatprep.subr.bf16.mxu0 %v4450_v42  ;;  %v4517_v41 = vld [vmem:[#allocation4 + $0x190] ss:$8 sps:$4 sm:$0xff]   ;;  %v4522_v42 = vld [vmem:[#allocation4 + $0x84] ss:$8 sps:$4 sm:$0xff]  }
 0x137   :  { %3447 = vmatprep.subr.bf16.mxu1 %v4453_v45  ;;  %3473 = vmatprep.mubr.bf16.mxu1 %v2045_v47  ;;  %v2030_v44 = vmax.f32 %v2016_v39, 0.0  ;;  %v4520_v45 = vld [vmem:[#allocation4 + $0x80] ss:$8 sps:$4 sm:$0xff]   ;;  %v2028_v46 = vmax.f32 %v2014_v12, 0.0  ;;  %v4570_v39 = vld [vmem:[#allocation4 + $0x204] ss:$8 sps:$4 sm:$0xff]  }
 0x138   :  { %v4523_v47 = vld [vmem:[#allocation4 + $0x180] ss:$8 sps:$4 sm:$0xff]  }
 0x139   :  { %3407 = vmatpush1.bf16.msra.mxu0 %v4448_v48  ;;  %v4528_v48 = vld [vmem:[#allocation4 + $0x274] ss:$8 sps:$4 sm:$0xff]   ;;  %v4568_v12 = vld [vmem:[#allocation4 + $0x200] ss:$8 sps:$4 sm:$0xff]  }
 0x13a   :  { %3448 = vmatpush1.bf16.msra.mxu1 %v4451_v57  ;;  %3408 = vmatprep.subr.bf16.mxu0 %v4456_v49  ;;  %v4531_v57 = vld [vmem:[#allocation4 + $0x374] ss:$8 sps:$4 sm:$0xff]   ;;  %v2044_v49 = vpack.c.bf16 %v2030_v44, %v2030_v44  ;;  %v4574_v44 = vld [vmem:[#allocation4 + $0x2f0] ss:$8 sps:$4 sm:$0xff]  }
 0x13b   :  { %3449 = vmatprep.subr.bf16.mxu1 %v4459_v50  ;;  %v4526_v50 = vld [vmem:[#allocation4 + $0x270] ss:$8 sps:$4 sm:$0xff]  }
 0x13d   :  { %3409 = vmatpush1.bf16.msra.mxu0 %v4454_v51  ;;  %v2042_v51 = vpack.c.bf16 %v2028_v46, %v2028_v46  ;;  %v4582_v46 = vld [vmem:[#allocation4 + $0x2e4] ss:$8 sps:$4 sm:$0xff]  }
 0x13e   :  { %3450 = vmatpush1.bf16.msra.mxu1 %v4457_v52  ;;  %3410 = vmatprep.subr.bf16.mxu0 %v4462_v54  ;;  %v4529_v52 = vld [vmem:[#allocation4 + $0x370] ss:$8 sps:$4 sm:$0xff]   ;;  %v4534_v54 = vld [vmem:[#allocation4 + $0x264] ss:$8 sps:$4 sm:$0xff]  }
 0x13f   :  { %3451 = vmatprep.subr.bf16.mxu1 %v4465_v55  ;;  %v1967_v55 = vrot.slane %v4942_v20, %v1966_v29 }
 0x141   :  { %3411 = vmatpush1.bf16.msra.mxu0 %v4460_v56  ;;  %v4537_v56 = vld [vmem:[#allocation4 + $0x364] ss:$8 sps:$4 sm:$0xff]  }
 0x142   :  { %3452 = vmatpush1.bf16.msra.mxu1 %v4463_v58  ;;  %3412 = vmatprep.subr.bf16.mxu0 %v4468_v59  ;;  %v1975_v59 = vrot.slane %v4942_v20, %v1974_v26  ;;  %v4588_v26 = vld [vmem:[#allocation4 + $0x2d4] ss:$8 sps:$4 sm:$0xff]  }
 0x143   :  { %3453 = vmatprep.subr.bf16.mxu1 %v4471_v60  ;;  %v4532_v60 = vld [vmem:[#allocation4 + $0x260] ss:$8 sps:$4 sm:$0xff]  }
 0x145   :  { %3413 = vmatpush1.bf16.msra.mxu0 %v4466_v61 }
 0x146   :  { %3454 = vmatpush1.bf16.msra.mxu1 %v4469_v62  ;;  %3414 = vmatprep.subr.bf16.mxu0 %v4474_v63  ;;  %v4535_v63 = vld [vmem:[#allocation4 + $0x360] ss:$8 sps:$4 sm:$0xff]  }
 0x147   :  { %3455 = vmatprep.subr.bf16.mxu1 %v4477_v0  ;;  %v4540_v0 = vld [vmem:[#allocation4 + $0x254] ss:$8 sps:$4 sm:$0xff]  }
 0x149   :  { %3415 = vmatpush1.bf16.msra.mxu0 %v4472_v1 }
 0x14a   :  { %3456 = vmatpush1.bf16.msra.mxu1 %v4475_v2  ;;  %3416 = vmatprep.subr.bf16.mxu0 %v4480_v3  ;;  %v4543_v2 = vld [vmem:[#allocation4 + $0x354] ss:$8 sps:$4 sm:$0xff]  }
 0x14b   :  { %3457 = vmatprep.subr.bf16.mxu1 %v4483_v4 }
 0x14d   :  { %3417 = vmatpush2.bf16.msra.mxu0 %v4478_v5 }
 0x14e   :  { %3458 = vmatpush2.bf16.msra.mxu1 %v4481_v6  ;;  %3418 = vmatprep.subr.bf16.mxu0 %v4486_v7  ;;  %v4538_v7 = vld [vmem:[#allocation4 + $0x250] ss:$8 sps:$4 sm:$0xff]  }
 0x14f   :  { %3459 = vmatprep.subr.bf16.mxu1 %v4489_v8 }
 0x151   :  { %3419 = vmatpush2.bf16.msra.mxu0 %v4484_v9 }
 0x152   :  { %3460 = vmatpush2.bf16.msra.mxu1 %v4487_v10  ;;  %3420 = vmatprep.subr.bf16.mxu0 %v4492_v11  ;;  %v4541_v10 = vld [vmem:[#allocation4 + $0x350] ss:$8 sps:$4 sm:$0xff]   ;;  %v4546_v11 = vld [vmem:[#allocation4 + $0x244] ss:$8 sps:$4 sm:$0xff]  }
 0x153   :  { %3461 = vmatprep.subr.bf16.mxu1 %v4495_v13 }
 0x155   :  { %3421 = vmatpush2.bf16.msra.mxu0 %v4490_v15 }
 0x156   :  { %3462 = vmatpush2.bf16.msra.mxu1 %v4493_v16  ;;  %3422 = vmatprep.subr.bf16.mxu0 %v4498_v17  ;;  %v4549_v16 = vld [vmem:[#allocation4 + $0x344] ss:$8 sps:$4 sm:$0xff]  }
 0x157   :  { %3463 = vmatprep.subr.bf16.mxu1 %v4501_v18 }
 0x159   :  { %3423 = vmatpush2.bf16.msra.mxu0 %v4496_v22  ;;  %v4544_v22 = vld [vmem:[#allocation4 + $0x240] ss:$8 sps:$4 sm:$0xff]  }
 0x15a   :  { %3464 = vmatpush2.bf16.msra.mxu1 %v4499_v53  ;;  %3424 = vmatprep.subr.bf16.mxu0 %v4504_v23  ;;  %v4547_v53 = vld [vmem:[#allocation4 + $0x340] ss:$8 sps:$4 sm:$0xff]   ;;  %v4552_v23 = vld [vmem:[#allocation4 + $0x234] ss:$8 sps:$4 sm:$0xff]  }
 0x15b   :  { %3465 = vmatprep.subr.bf16.mxu1 %v4507_v24  ;;  %v4555_v24 = vld [vmem:[#allocation4 + $0x334] ss:$8 sps:$4 sm:$0xff]  }
 0x15d   :  { %3425 = vmatpush2.bf16.msra.mxu0 %v4502_v25  ;;  %v4550_v25 = vld [vmem:[#allocation4 + $0x230] ss:$8 sps:$4 sm:$0xff]  }
 0x15e   :  { %3466 = vmatpush2.bf16.msra.mxu1 %v4505_v30  ;;  %3426 = vmatprep.subr.bf16.mxu0 %v4510_v31  ;;  %v4553_v30 = vld [vmem:[#allocation4 + $0x330] ss:$8 sps:$4 sm:$0xff]   ;;  %v4558_v31 = vld [vmem:[#allocation4 + $0x224] ss:$8 sps:$4 sm:$0xff]  }
 0x15f   :  { %3467 = vmatprep.subr.bf16.mxu1 %v4513_v32  ;;  %v4561_v32 = vld [vmem:[#allocation4 + $0x324] ss:$8 sps:$4 sm:$0xff]  }
 0x161   :  { %3427 = vmatpush2.bf16.msra.mxu0 %v4508_v33  ;;  %v4556_v33 = vld [vmem:[#allocation4 + $0x220] ss:$8 sps:$4 sm:$0xff]  }
 0x162   :  { %3468 = vmatpush2.bf16.msra.mxu1 %v4511_v36  ;;  %3428 = vmatprep.subr.bf16.mxu0 %v4516_v37  ;;  %v4567_v36 = vld [vmem:[#allocation4 + $0x314] ss:$8 sps:$4 sm:$0xff]   ;;  %v4562_v37 = vld [vmem:[#allocation4 + $0x210] ss:$8 sps:$4 sm:$0xff]  }
 0x163   :  { %3469 = vmatprep.subr.bf16.mxu1 %v4519_v38  ;;  %v4565_v38 = vld [vmem:[#allocation4 + $0x310] ss:$8 sps:$4 sm:$0xff]  }
 0x165   :  { %3429 = vmatpush2.bf16.msra.mxu0 %v4514_v40  ;;  %v4573_v40 = vld [vmem:[#allocation4 + $0x304] ss:$8 sps:$4 sm:$0xff]  }
 0x166   :  { %3470 = vmatpush2.bf16.msra.mxu1 %v4517_v41  ;;  %3430 = vmatprep.subr.bf16.mxu0 %v4522_v42  ;;  %v4571_v41 = vld [vmem:[#allocation4 + $0x300] ss:$8 sps:$4 sm:$0xff]   ;;  %v4576_v42 = vld [vmem:[#allocation4 + $0x2f4] ss:$8 sps:$4 sm:$0xff]  }
 0x167   :  { %3471 = vmatprep.subr.bf16.mxu1 %v4525_v43  ;;  %v4579_v43 = vld [vmem:[#allocation4 + $0x3f4] ss:$8 sps:$4 sm:$0xff]  }
 0x169   :  { %3431 = vmatpush2.bf16.msra.mxu0 %v4520_v45  ;;  %v4577_v45 = vld [vmem:[#allocation4 + $0x3f0] ss:$8 sps:$4 sm:$0xff]  }
 0x16a   :  { %3472 = vmatpush2.bf16.msra.mxu1 %v4523_v47  ;;  %3482 = vmatprep.subr.bf16.mxu0 %v4528_v48  ;;  %v4585_v47 = vld [vmem:[#allocation4 + $0x3e4] ss:$8 sps:$4 sm:$0xff]   ;;  %v4580_v48 = vld [vmem:[#allocation4 + $0x2e0] ss:$8 sps:$4 sm:$0xff]  }
 0x16b   :  { %3523 = vmatprep.subr.bf16.mxu1 %v4531_v57  ;;  %v4583_v57 = vld [vmem:[#allocation4 + $0x3e0] ss:$8 sps:$4 sm:$0xff]  }
 0x16c   :  { %v4972_v58 = vpop.f32.mrf.mxu0  ;;  %3433 = vmatmul.mubr.bf16.vlgmr.msra.gmra.mxu0 %v2042_v51  ;;  %v4975_v61 = vpop.f32.mrf.mxu1  ;;  %v4589_v51 = vld [vmem:[#allocation4 + $0x3d0] ss:$8 sps:$4 sm:$0xff]  }
 0x16d   :  { %3474 = vmatmul.mubr.bf16.vlgmr.msra.gmra.mxu1 %v2044_v49  ;;  %3483 = vmatpush1.bf16.msra.mxu0 %v4526_v50  ;;  %v4591_v49 = vld [vmem:[#allocation4 + $0x3d4] ss:$8 sps:$4 sm:$0xff]   ;;  %v4586_v50 = vld [vmem:[#allocation4 + $0x2d0] ss:$8 sps:$4 sm:$0xff]  }
 0x16e   :  { %3524 = vmatpush1.bf16.msra.mxu1 %v4529_v52  ;;  %v1730_v62 = vpop.f32.mrf.mxu0  ;;  %3484 = vmatprep.subr.bf16.mxu0 %v4534_v54  ;;  %v1771_v3 = vpop.f32.mrf.mxu1  ;;  %v4594_v52 = vld [vmem:[#allocation4 + $0x2c4] ss:$8 sps:$4 sm:$0xff]  }
 0x16f   :  { %v2019_v1 = vadd.f32 %v1967_v55, %v1730_v62  ;;  %3525 = vmatprep.subr.bf16.mxu1 %v4537_v56  ;;  %v2021_v5 = vadd.f32 %v1975_v59, %v1771_v3  ;;  %v4597_v54 = vld [vmem:[#allocation4 + $0x3c4] ss:$8 sps:$4 sm:$0xff]   ;;  %v4592_v55 = vld [vmem:[#allocation4 + $0x2c0] ss:$8 sps:$4 sm:$0xff]   ;;  %v4600_v59 = vld [vmem:[#allocation4 + $0x2b4] ss:$8 sps:$4 sm:$0xff]  }
 0x170   :  { %v1732_v4 = vpop.f32.mrf.mxu0  ;;  %v1773_v8 = vpop.f32.mrf.mxu1  ;;  %v4595_v56 = vld [vmem:[#allocation4 + $0x3c0] ss:$8 sps:$4 sm:$0xff]   ;;  %v4598_v62 = vld [vmem:[#allocation4 + $0x2b0] ss:$8 sps:$4 sm:$0xff]   ;;  %v4609_v3 = vld [vmem:[#allocation4 + $0x3a4] ss:$8 sps:$4 sm:$0xff]  }
 0x171   :  { %v2033_v6 = vmax.f32 %v2019_v1, 0.0  ;;  %3485 = vmatpush1.bf16.msra.mxu0 %v4532_v60  ;;  %v2035_v13 = vmax.f32 %v2021_v5, 0.0  ;;  %v4603_v60 = vld [vmem:[#allocation4 + $0x3b4] ss:$8 sps:$4 sm:$0xff]   ;;  %v4601_v1 = vld [vmem:[#allocation4 + $0x3b0] ss:$8 sps:$4 sm:$0xff]  }
 0x172   :  { %3526 = vmatpush1.bf16.msra.mxu1 %v4535_v63  ;;  %v1733_v9 = vpop.f32.mrf.mxu0  ;;  %3486 = vmatprep.subr.bf16.mxu0 %v4540_v0  ;;  %v1774_v17 = vpop.f32.mrf.mxu1  ;;  %v1970_v63 = vsub.s32 6, %v4934_v14  ;;  %v1962_v0 = vsub.s32 4, %v4934_v14  ;;  %v4604_v4 = vld [vmem:[#allocation4 + $0x2a0] ss:$8 sps:$4 sm:$0xff]   ;;  %v4612_v8 = vld [vmem:[#allocation4 + $0x294] ss:$8 sps:$4 sm:$0xff]  }
 0x173   :  { %v2047_v15 = vpack.c.bf16 %v2033_v6, %v2033_v6  ;;  %3527 = vmatprep.subr.bf16.mxu1 %v4543_v2  ;;  %v2049_v18 = vpack.c.bf16 %v2035_v13, %v2035_v13  ;;  %v4606_v2 = vld [vmem:[#allocation4 + $0x2a4] ss:$8 sps:$4 sm:$0xff]   ;;  %v4615_v9 = vld [vmem:[#allocation4 + $0x394] ss:$8 sps:$4 sm:$0xff]  }
 0x174   :  { %v1971_v5 = vrot.slane %v4942_v20, %v1970_v63  ;;  %v1963_v6 = vrot.slane %v4942_v20, %v1962_v0  ;;  %v4621_v17 = vld [vmem:[#allocation4 + $0x384] ss:$8 sps:$4 sm:$0xff]   ;;  %v4616_v20 = vld [vmem:[#allocation4 + $0x280] ss:$8 sps:$4 sm:$0xff]   ;;  %v4649_v63 = vld [vmem:[#allocation4 + $0x530] ss:$8 sps:$4 sm:$0xff]  }
 0x175   :  { %3487 = vmatpush1.bf16.msra.mxu0 %v4538_v7  ;;  %3514 = vmatprep.mubr.bf16.mxu0 %v2047_v15  ;;  %v4607_v7 = vld [vmem:[#allocation4 + $0x3a0] ss:$8 sps:$4 sm:$0xff]   ;;  %v4613_v15 = vld [vmem:[#allocation4 + $0x390] ss:$8 sps:$4 sm:$0xff]  }
 0x176   :  { %3528 = vmatpush1.bf16.msra.mxu1 %v4541_v10  ;;  %3488 = vmatprep.subr.bf16.mxu0 %v4546_v11  ;;  %v2020_v10 = vadd.f32 %v1971_v5, %v4975_v61  ;;  %v4610_v11 = vld [vmem:[#allocation4 + $0x290] ss:$8 sps:$4 sm:$0xff]   ;;  %v2018_v13 = vadd.f32 %v1963_v6, %v4972_v58  ;;  %v4988_v58 = vld [vmem:[%s5034_s2 + $0x8] sm:$0x3f]  ;;  %v4660_v5 = vld [vmem:[#allocation4 + $0x414] ss:$8 sps:$4 sm:$0xff]  }
 0x177   :  { %3529 = vmatprep.subr.bf16.mxu1 %v4549_v16  ;;  %3555 = vmatprep.mubr.bf16.mxu1 %v2049_v18  ;;  %v4618_v16 = vld [vmem:[#allocation4 + $0x284] ss:$8 sps:$4 sm:$0xff]   ;;  %v4663_v6 = vld [vmem:[#allocation4 + $0x514] ss:$8 sps:$4 sm:$0xff]  }
 0x178   :  { %v2034_v18 = vmax.f32 %v2020_v10, 0.0  ;;  %v4669_v10 = vld [vmem:[#allocation4 + $0x504] ss:$8 sps:$4 sm:$0xff]  }
 0x179   :  { %3489 = vmatpush1.bf16.msra.mxu0 %v4544_v22  ;;  %v2032_v22 = vmax.f32 %v2018_v13, 0.0  ;;  %v4667_v13 = vld [vmem:[#allocation4 + $0x500] ss:$8 sps:$4 sm:$0xff]  }
 0x17a   :  { %3530 = vmatpush1.bf16.msra.mxu1 %v4547_v53  ;;  %3490 = vmatprep.subr.bf16.mxu0 %v4552_v23  ;;  %v4619_v53 = vld [vmem:[#allocation4 + $0x380] ss:$8 sps:$4 sm:$0xff]   ;;  %v4624_v23 = vld [vmem:[#allocation4 + $0x474] ss:$8 sps:$4 sm:$0xff]   ;;  %v2048_v61 = vpack.c.bf16 %v2034_v18, %v2034_v18  ;;  %v4673_v18 = vld [vmem:[#allocation4 + $0x5f0] ss:$8 sps:$4 sm:$0xff]  }
 0x17b   :  { %3531 = vmatprep.subr.bf16.mxu1 %v4555_v24  ;;  %v4627_v24 = vld [vmem:[#allocation4 + $0x574] ss:$8 sps:$4 sm:$0xff]  }
 0x17d   :  { %3491 = vmatpush1.bf16.msra.mxu0 %v4550_v25  ;;  %v4622_v25 = vld [vmem:[#allocation4 + $0x470] ss:$8 sps:$4 sm:$0xff]  }
 0x17e   :  { %3532 = vmatpush1.bf16.msra.mxu1 %v4553_v30  ;;  %3492 = vmatprep.subr.bf16.mxu0 %v4558_v31  ;;  %v2046_v30 = vpack.c.bf16 %v2032_v22, %v2032_v22  ;;  %v4625_v31 = vld [vmem:[#allocation4 + $0x570] ss:$8 sps:$4 sm:$0xff]   ;;  %v4681_v22 = vld [vmem:[#allocation4 + $0x5e4] ss:$8 sps:$4 sm:$0xff]  }
 0x17f   :  { %3533 = vmatprep.subr.bf16.mxu1 %v4561_v32  ;;  %v4630_v32 = vld [vmem:[#allocation4 + $0x464] ss:$8 sps:$4 sm:$0xff]  }
 0x181   :  { %3493 = vmatpush1.bf16.msra.mxu0 %v4556_v33  ;;  %v1983_v33 = vrot.slane %v4988_v58, %v4937_v19 }
 0x182   :  { %3534 = vmatpush1.bf16.msra.mxu1 %v4559_v34  ;;  %3494 = vmatprep.subr.bf16.mxu0 %v4564_v35  ;;  %v4633_v34 = vld [vmem:[#allocation4 + $0x564] ss:$8 sps:$4 sm:$0xff]  }
 0x183   :  { %3535 = vmatprep.subr.bf16.mxu1 %v4567_v36  ;;  %v1991_v36 = vrot.slane %v4988_v58, %v1958_v21 }
 0x185   :  { %3495 = vmatpush1.bf16.msra.mxu0 %v4562_v37  ;;  %v4628_v37 = vld [vmem:[#allocation4 + $0x460] ss:$8 sps:$4 sm:$0xff]  }
 0x186   :  { %3536 = vmatpush1.bf16.msra.mxu1 %v4565_v38  ;;  %3496 = vmatprep.subr.bf16.mxu0 %v4570_v39 }
 0x187   :  { %3537 = vmatprep.subr.bf16.mxu1 %v4573_v40  ;;  %v4631_v40 = vld [vmem:[#allocation4 + $0x560] ss:$8 sps:$4 sm:$0xff]  }
 0x189   :  { %3497 = vmatpush1.bf16.msra.mxu0 %v4568_v12  ;;  %v4636_v12 = vld [vmem:[#allocation4 + $0x454] ss:$8 sps:$4 sm:$0xff]  }
 0x18a   :  { %3538 = vmatpush1.bf16.msra.mxu1 %v4571_v41  ;;  %3498 = vmatprep.subr.bf16.mxu0 %v4576_v42  ;;  %v4639_v42 = vld [vmem:[#allocation4 + $0x554] ss:$8 sps:$4 sm:$0xff]  }
 0x18b   :  { %3539 = vmatprep.subr.bf16.mxu1 %v4579_v43 }
 0x18d   :  { %3499 = vmatpush2.bf16.msra.mxu0 %v4574_v44 }
 0x18e   :  { %3540 = vmatpush2.bf16.msra.mxu1 %v4577_v45  ;;  %3500 = vmatprep.subr.bf16.mxu0 %v4582_v46 }
 0x18f   :  { %3541 = vmatprep.subr.bf16.mxu1 %v4585_v47  ;;  %v4634_v47 = vld [vmem:[#allocation4 + $0x450] ss:$8 sps:$4 sm:$0xff]  }
 0x191   :  { %3501 = vmatpush2.bf16.msra.mxu0 %v4580_v48 }
 0x192   :  { %3542 = vmatpush2.bf16.msra.mxu1 %v4583_v57  ;;  %3502 = vmatprep.subr.bf16.mxu0 %v4588_v26  ;;  %v4637_v57 = vld [vmem:[#allocation4 + $0x550] ss:$8 sps:$4 sm:$0xff]   ;;  %v4642_v26 = vld [vmem:[#allocation4 + $0x444] ss:$8 sps:$4 sm:$0xff]  }
 0x193   :  { %3543 = vmatprep.subr.bf16.mxu1 %v4591_v49 }
 0x195   :  { %3503 = vmatpush2.bf16.msra.mxu0 %v4586_v50 }
 0x196   :  { %3544 = vmatpush2.bf16.msra.mxu1 %v4589_v51  ;;  %3504 = vmatprep.subr.bf16.mxu0 %v4594_v52  ;;  %v4645_v51 = vld [vmem:[#allocation4 + $0x544] ss:$8 sps:$4 sm:$0xff]  }
 0x197   :  { %3545 = vmatprep.subr.bf16.mxu1 %v4597_v54 }
 0x199   :  { %3505 = vmatpush2.bf16.msra.mxu0 %v4592_v55  ;;  %v4640_v55 = vld [vmem:[#allocation4 + $0x440] ss:$8 sps:$4 sm:$0xff]  }
 0x19a   :  { %3546 = vmatpush2.bf16.msra.mxu1 %v4595_v56  ;;  %3506 = vmatprep.subr.bf16.mxu0 %v4600_v59  ;;  %v4643_v56 = vld [vmem:[#allocation4 + $0x540] ss:$8 sps:$4 sm:$0xff]   ;;  %v4648_v59 = vld [vmem:[#allocation4 + $0x434] ss:$8 sps:$4 sm:$0xff]  }
 0x19b   :  { %3547 = vmatprep.subr.bf16.mxu1 %v4603_v60  ;;  %v4651_v60 = vld [vmem:[#allocation4 + $0x534] ss:$8 sps:$4 sm:$0xff]  }
 0x19d   :  { %3507 = vmatpush2.bf16.msra.mxu0 %v4598_v62  ;;  %v4646_v62 = vld [vmem:[#allocation4 + $0x430] ss:$8 sps:$4 sm:$0xff]  }
 0x19e   :  { %3548 = vmatpush2.bf16.msra.mxu1 %v4601_v1  ;;  %3508 = vmatprep.subr.bf16.mxu0 %v4606_v2  ;;  %v4654_v1 = vld [vmem:[#allocation4 + $0x424] ss:$8 sps:$4 sm:$0xff]  }
 0x19f   :  { %3549 = vmatprep.subr.bf16.mxu1 %v4609_v3  ;;  %v4657_v2 = vld [vmem:[#allocation4 + $0x524] ss:$8 sps:$4 sm:$0xff]   ;;  %v4652_v3 = vld [vmem:[#allocation4 + $0x420] ss:$8 sps:$4 sm:$0xff]  }
 0x1a1   :  { %3509 = vmatpush2.bf16.msra.mxu0 %v4604_v4  ;;  %v4655_v4 = vld [vmem:[#allocation4 + $0x520] ss:$8 sps:$4 sm:$0xff]  }
 0x1a2   :  { %3550 = vmatpush2.bf16.msra.mxu1 %v4607_v7  ;;  %3510 = vmatprep.subr.bf16.mxu0 %v4612_v8  ;;  %v4658_v7 = vld [vmem:[#allocation4 + $0x410] ss:$8 sps:$4 sm:$0xff]  }
 0x1a3   :  { %3551 = vmatprep.subr.bf16.mxu1 %v4615_v9  ;;  %v4661_v8 = vld [vmem:[#allocation4 + $0x510] ss:$8 sps:$4 sm:$0xff]   ;;  %v4666_v9 = vld [vmem:[#allocation4 + $0x404] ss:$8 sps:$4 sm:$0xff]  }
 0x1a5   :  { %3511 = vmatpush2.bf16.msra.mxu0 %v4610_v11  ;;  %v4664_v11 = vld [vmem:[#allocation4 + $0x400] ss:$8 sps:$4 sm:$0xff]  }
 0x1a6   :  { %3552 = vmatpush2.bf16.msra.mxu1 %v4613_v15  ;;  %3512 = vmatprep.subr.bf16.mxu0 %v4618_v16  ;;  %v4672_v15 = vld [vmem:[#allocation4 + $0x4f4] ss:$8 sps:$4 sm:$0xff]  }
 0x1a7   :  { %3553 = vmatprep.subr.bf16.mxu1 %v4621_v17  ;;  %v4675_v16 = vld [vmem:[#allocation4 + $0x5f4] ss:$8 sps:$4 sm:$0xff]   ;;  %v4670_v17 = vld [vmem:[#allocation4 + $0x4f0] ss:$8 sps:$4 sm:$0xff]  }
 0x1a9   :  { %3513 = vmatpush2.bf16.msra.mxu0 %v4616_v20  ;;  %v4678_v20 = vld [vmem:[#allocation4 + $0x4e4] ss:$8 sps:$4 sm:$0xff]  }
 0x1aa   :  { %3554 = vmatpush2.bf16.msra.mxu1 %v4619_v53  ;;  %3564 = vmatprep.subr.bf16.mxu0 %v4624_v23  ;;  %v4676_v53 = vld [vmem:[#allocation4 + $0x4e0] ss:$8 sps:$4 sm:$0xff]  }
 0x1ab   :  { %3605 = vmatprep.subr.bf16.mxu1 %v4627_v24  ;;  %v4679_v23 = vld [vmem:[#allocation4 + $0x5e0] ss:$8 sps:$4 sm:$0xff]   ;;  %v4684_v24 = vld [vmem:[#allocation4 + $0x4d4] ss:$8 sps:$4 sm:$0xff]  }
 0x1ac   :  { %v4992_v35 = vpop.f32.mrf.mxu0  ;;  %3515 = vmatmul.mubr.bf16.vlgmr.msra.gmra.mxu0 %v2046_v30  ;;  %v4997_v38 = vpop.f32.mrf.mxu1  ;;  %v4685_v30 = vld [vmem:[#allocation4 + $0x5d0] ss:$8 sps:$4 sm:$0xff]  }
 0x1ad   :  { %3556 = vmatmul.mubr.bf16.vlgmr.msra.gmra.mxu1 %v2048_v61  ;;  %3565 = vmatpush1.bf16.msra.mxu0 %v4622_v25  ;;  %v4687_v61 = vld [vmem:[#allocation4 + $0x5d4] ss:$8 sps:$4 sm:$0xff]   ;;  %v4682_v25 = vld [vmem:[#allocation4 + $0x4d0] ss:$8 sps:$4 sm:$0xff]  }
 0x1ae   :  { %3606 = vmatpush1.bf16.msra.mxu1 %v4625_v31  ;;  %v1812_v39 = vpop.f32.mrf.mxu0  ;;  %3566 = vmatprep.subr.bf16.mxu0 %v4630_v32  ;;  %v1853_v43 = vpop.f32.mrf.mxu1  ;;  %v4690_v31 = vld [vmem:[#allocation4 + $0x4c4] ss:$8 sps:$4 sm:$0xff]  }
 0x1af   :  { %v2023_v41 = vadd.f32 %v1983_v33, %v1812_v39  ;;  %3607 = vmatprep.subr.bf16.mxu1 %v4633_v34  ;;  %v2025_v45 = vadd.f32 %v1991_v36, %v1853_v43  ;;  %v4693_v32 = vld [vmem:[#allocation4 + $0x5c4] ss:$8 sps:$4 sm:$0xff]   ;;  %v4688_v33 = vld [vmem:[#allocation4 + $0x4c0] ss:$8 sps:$4 sm:$0xff]   ;;  %v4696_v36 = vld [vmem:[#allocation4 + $0x4b4] ss:$8 sps:$4 sm:$0xff]   ;;  %v1987_v43 = vrot.slane %v4988_v58, %v1954_v27 }
 0x1b0   :  { %v1814_v44 = vpop.f32.mrf.mxu0  ;;  %v1855_v21 = vpop.f32.mrf.mxu1  ;;  %v4691_v34 = vld [vmem:[#allocation4 + $0x5c0] ss:$8 sps:$4 sm:$0xff]   ;;  %v4694_v39 = vld [vmem:[#allocation4 + $0x4b0] ss:$8 sps:$4 sm:$0xff]   ;;  %v4717_v27 = vld [vmem:[#allocation4 + $0x584] ss:$8 sps:$4 sm:$0xff]  }
 0x1b1   :  { %v2037_v46 = vmax.f32 %v2023_v41, 0.0  ;;  %3567 = vmatpush1.bf16.msra.mxu0 %v4628_v37  ;;  %v2039_v49 = vmax.f32 %v2025_v45, 0.0  ;;  %v4699_v37 = vld [vmem:[#allocation4 + $0x5b4] ss:$8 sps:$4 sm:$0xff]   ;;  %v4705_v41 = vld [vmem:[#allocation4 + $0x5a4] ss:$8 sps:$4 sm:$0xff]   ;;  %v1979_v44 = vrot.slane %v4988_v58, %v4958_v28  ;;  %v2024_v21 = vadd.f32 %v1987_v43, %v4997_v38 }
 0x1b2   :  { %3608 = vmatpush1.bf16.msra.mxu1 %v4631_v40  ;;  %v1815_v48 = vpop.f32.mrf.mxu0  ;;  %3568 = vmatprep.subr.bf16.mxu0 %v4636_v12  ;;  %v1856_v52 = vpop.f32.mrf.mxu1  ;;  %v4697_v40 = vld [vmem:[#allocation4 + $0x5b0] ss:$8 sps:$4 sm:$0xff]   ;;  %v4702_v12 = vld [vmem:[#allocation4 + $0x4a4] ss:$8 sps:$4 sm:$0xff]   ;;  %v4703_v45 = vld [vmem:[#allocation4 + $0x5a0] ss:$8 sps:$4 sm:$0xff]  }
 0x1b3   :  { %v2051_v50 = vpack.c.bf16 %v2037_v46, %v2037_v46  ;;  %3609 = vmatprep.subr.bf16.mxu1 %v4639_v42  ;;  %v2053_v54 = vpack.c.bf16 %v2039_v49, %v2039_v49  ;;  %v4700_v42 = vld [vmem:[#allocation4 + $0x4a0] ss:$8 sps:$4 sm:$0xff]   ;;  %v4708_v46 = vld [vmem:[#allocation4 + $0x494] ss:$8 sps:$4 sm:$0xff]   ;;  %v4706_v48 = vld [vmem:[#allocation4 + $0x490] ss:$8 sps:$4 sm:$0xff]  }
 0x1b4   :  { %v4714_v49 = vld [vmem:[#allocation4 + $0x484] ss:$8 sps:$4 sm:$0xff]   ;;  %v4718_v38 = vld [vmem:[#allocation4 + $0x670] ss:$8 sps:$4 sm:$0xff]  }
 0x1b5   :  { %3569 = vmatpush1.bf16.msra.mxu0 %v4634_v47  ;;  %3596 = vmatprep.mubr.bf16.mxu0 %v2051_v50  ;;  %v4711_v47 = vld [vmem:[#allocation4 + $0x594] ss:$8 sps:$4 sm:$0xff]   ;;  %v2038_v50 = vmax.f32 %v2024_v21, 0.0  ;;  %v4760_v43 = vld [vmem:[#allocation4 + $0x690] ss:$8 sps:$4 sm:$0xff]  }
 0x1b6   :  { %3610 = vmatpush1.bf16.msra.mxu1 %v4637_v57  ;;  %3570 = vmatprep.subr.bf16.mxu0 %v4642_v26  ;;  %v2022_v57 = vadd.f32 %v1979_v44, %v4992_v35  ;;  %v4709_v26 = vld [vmem:[#allocation4 + $0x590] ss:$8 sps:$4 sm:$0xff]   ;;  %v4723_v35 = vld [vmem:[#allocation4 + $0x664] ss:$8 sps:$4 sm:$0xff]  }
 0x1b7   :  { %3611 = vmatprep.subr.bf16.mxu1 %v4645_v51  ;;  %3637 = vmatprep.mubr.bf16.mxu1 %v2053_v54  ;;  %v4712_v51 = vld [vmem:[#allocation4 + $0x480] ss:$8 sps:$4 sm:$0xff]  }
 0x1b8   :  { %v2036_v52 = vmax.f32 %v2022_v57, 0.0  ;;  %v4715_v54 = vld [vmem:[#allocation4 + $0x580] ss:$8 sps:$4 sm:$0xff]  }
 0x1b9   :  { %3571 = vmatpush1.bf16.msra.mxu0 %v4640_v55  ;;  %v4720_v55 = vld [vmem:[#allocation4 + $0x674] ss:$8 sps:$4 sm:$0xff]  }
 0x1ba   :  { %3612 = vmatpush1.bf16.msra.mxu1 %v4643_v56  ;;  %3572 = vmatprep.subr.bf16.mxu0 %v4648_v59  ;;  %v2052_v56 = vpack.c.bf16 %v2038_v50, %v2038_v50  ;;  %v2050_v59 = vpack.c.bf16 %v2036_v52, %v2036_v52  ;;  %v4766_v52 = vld [vmem:[#allocation6 + $0x78] sm:$0xff]  }
 0x1bb   :  { %3613 = vmatprep.subr.bf16.mxu1 %v4651_v60  ;;  %v1999_v60 = vrot.slane %v4988_v58, %v1966_v29 }
 0x1bd   :  { %3573 = vmatpush1.bf16.msra.mxu0 %v4646_v62 }
 0x1be   :  { %3614 = vmatpush1.bf16.msra.mxu1 %v4649_v63  ;;  %3574 = vmatprep.subr.bf16.mxu0 %v4654_v1  ;;  %v4721_v63 = vld [vmem:[#allocation4 + $0x660] ss:$8 sps:$4 sm:$0xff]  }
 0x1bf   :  { %3615 = vmatprep.subr.bf16.mxu1 %v4657_v2 }
 0x1c1   :  { %3575 = vmatpush1.bf16.msra.mxu0 %v4652_v3  ;;  %v4726_v3 = vld [vmem:[#allocation4 + $0x654] ss:$8 sps:$4 sm:$0xff]  }
 0x1c2   :  { %3616 = vmatpush1.bf16.msra.mxu1 %v4655_v4  ;;  %3576 = vmatprep.subr.bf16.mxu0 %v4660_v5 }
 0x1c3   :  { %3617 = vmatprep.subr.bf16.mxu1 %v4663_v6 }
 0x1c5   :  { %3577 = vmatpush1.bf16.msra.mxu0 %v4658_v7 }
 0x1c6   :  { %3618 = vmatpush1.bf16.msra.mxu1 %v4661_v8  ;;  %3578 = vmatprep.subr.bf16.mxu0 %v4666_v9  ;;  %v4724_v8 = vld [vmem:[#allocation4 + $0x650] ss:$8 sps:$4 sm:$0xff]  }
 0x1c7   :  { %3619 = vmatprep.subr.bf16.mxu1 %v4669_v10  ;;  %v4729_v10 = vld [vmem:[#allocation4 + $0x644] ss:$8 sps:$4 sm:$0xff]  }
 0x1c9   :  { %3579 = vmatpush1.bf16.msra.mxu0 %v4664_v11 }
 0x1ca   :  { %3620 = vmatpush1.bf16.msra.mxu1 %v4667_v13  ;;  %3580 = vmatprep.subr.bf16.mxu0 %v4672_v15  ;;  %v4727_v15 = vld [vmem:[#allocation4 + $0x640] ss:$8 sps:$4 sm:$0xff]  }
 0x1cb   :  { %3621 = vmatprep.subr.bf16.mxu1 %v4675_v16  ;;  %v4732_v16 = vld [vmem:[#allocation4 + $0x634] ss:$8 sps:$4 sm:$0xff]  }
 0x1cd   :  { %3581 = vmatpush2.bf16.msra.mxu0 %v4670_v17  ;;  %v4730_v17 = vld [vmem:[#allocation4 + $0x630] ss:$8 sps:$4 sm:$0xff]  }
 0x1ce   :  { %3622 = vmatpush2.bf16.msra.mxu1 %v4673_v18  ;;  %3582 = vmatprep.subr.bf16.mxu0 %v4678_v20  ;;  %v4735_v18 = vld [vmem:[#allocation4 + $0x624] ss:$8 sps:$4 sm:$0xff]   ;;  %v4733_v20 = vld [vmem:[#allocation4 + $0x620] ss:$8 sps:$4 sm:$0xff]  }
 0x1cf   :  { %3623 = vmatprep.subr.bf16.mxu1 %v4681_v22  ;;  %v4738_v22 = vld [vmem:[#allocation4 + $0x614] ss:$8 sps:$4 sm:$0xff]  }
 0x1d1   :  { %3583 = vmatpush2.bf16.msra.mxu0 %v4676_v53  ;;  %v4736_v53 = vld [vmem:[#allocation4 + $0x610] ss:$8 sps:$4 sm:$0xff]  }
 0x1d2   :  { %3624 = vmatpush2.bf16.msra.mxu1 %v4679_v23  ;;  %3584 = vmatprep.subr.bf16.mxu0 %v4684_v24  ;;  %v4741_v23 = vld [vmem:[#allocation4 + $0x604] ss:$8 sps:$4 sm:$0xff]   ;;  %v4739_v24 = vld [vmem:[#allocation4 + $0x600] ss:$8 sps:$4 sm:$0xff]  }
 0x1d3   :  { %3625 = vmatprep.subr.bf16.mxu1 %v4687_v61  ;;  %v4744_v61 = vld [vmem:[#allocation4 + $0x6f4] ss:$8 sps:$4 sm:$0xff]  }
 0x1d5   :  { %3585 = vmatpush2.bf16.msra.mxu0 %v4682_v25  ;;  %v4742_v25 = vld [vmem:[#allocation4 + $0x6f0] ss:$8 sps:$4 sm:$0xff]  }
 0x1d6   :  { %3626 = vmatpush2.bf16.msra.mxu1 %v4685_v30  ;;  %3586 = vmatprep.subr.bf16.mxu0 %v4690_v31  ;;  %v4747_v30 = vld [vmem:[#allocation4 + $0x6e4] ss:$8 sps:$4 sm:$0xff]   ;;  %v4745_v31 = vld [vmem:[#allocation4 + $0x6e0] ss:$8 sps:$4 sm:$0xff]  }
 0x1d7   :  { %3627 = vmatprep.subr.bf16.mxu1 %v4693_v32  ;;  %v4750_v32 = vld [vmem:[#allocation4 + $0x6d4] ss:$8 sps:$4 sm:$0xff]  }
 0x1d9   :  { %3587 = vmatpush2.bf16.msra.mxu0 %v4688_v33  ;;  %v4748_v33 = vld [vmem:[#allocation4 + $0x6d0] ss:$8 sps:$4 sm:$0xff]  }
 0x1da   :  { %3628 = vmatpush2.bf16.msra.mxu1 %v4691_v34  ;;  %3588 = vmatprep.subr.bf16.mxu0 %v4696_v36  ;;  %v4753_v34 = vld [vmem:[#allocation4 + $0x6c4] ss:$8 sps:$4 sm:$0xff]   ;;  %v4751_v36 = vld [vmem:[#allocation4 + $0x6c0] ss:$8 sps:$4 sm:$0xff]  }
 0x1db   :  { %3629 = vmatprep.subr.bf16.mxu1 %v4699_v37  ;;  %v4756_v37 = vld [vmem:[#allocation4 + $0x6b4] ss:$8 sps:$4 sm:$0xff]  }
 0x1dd   :  { %3589 = vmatpush2.bf16.msra.mxu0 %v4694_v39  ;;  %v4754_v39 = vld [vmem:[#allocation4 + $0x6b0] ss:$8 sps:$4 sm:$0xff]  }
 0x1de   :  { %3630 = vmatpush2.bf16.msra.mxu1 %v4697_v40  ;;  %3590 = vmatprep.subr.bf16.mxu0 %v4702_v12  ;;  %v4759_v40 = vld [vmem:[#allocation4 + $0x6a4] ss:$8 sps:$4 sm:$0xff]   ;;  %v4757_v12 = vld [vmem:[#allocation4 + $0x6a0] ss:$8 sps:$4 sm:$0xff]  }
 0x1df   :  { %3631 = vmatprep.subr.bf16.mxu1 %v4705_v41  ;;  %v1995_v41 = vrot.slane %v4988_v58, %v1962_v0 }
 0x1e1   :  { %3591 = vmatpush2.bf16.msra.mxu0 %v4700_v42  ;;  %v4762_v42 = vld [vmem:[#allocation4 + $0x694] ss:$8 sps:$4 sm:$0xff]  }
 0x1e2   :  { %3632 = vmatpush2.bf16.msra.mxu1 %v4703_v45  ;;  %3592 = vmatprep.subr.bf16.mxu0 %v4708_v46  ;;  %v4765_v45 = vld [vmem:[#allocation4 + $0x684] ss:$8 sps:$4 sm:$0xff]   ;;  %v4763_v46 = vld [vmem:[#allocation4 + $0x680] ss:$8 sps:$4 sm:$0xff]  }
 0x1e3   :  { %3633 = vmatprep.subr.bf16.mxu1 %v4711_v47 }
 0x1e5   :  { %3593 = vmatpush2.bf16.msra.mxu0 %v4706_v48 }
 0x1e6   :  { %3634 = vmatpush2.bf16.msra.mxu1 %v4709_v26  ;;  %3594 = vmatprep.subr.bf16.mxu0 %v4714_v49 }
 0x1e7   :  { %3635 = vmatprep.subr.bf16.mxu1 %v4717_v27 }
 0x1e9   :  { %3595 = vmatpush2.bf16.msra.mxu0 %v4712_v51 }
 0x1ea   :  { %3636 = vmatpush2.bf16.msra.mxu1 %v4715_v54  ;;  %3646 = vmatprep.subr.bf16.mxu0 %v4720_v55  ;;  %v4767_v54 = vld [vmem:[#allocation6 + $0x38] sm:$0xff]   ;;  %v4768_v55 = vld [vmem:[#allocation6 + $0x70] sm:$0xff]  }
 0x1eb   :  { %4398 = vmatprep.subr.bf16.mxu1 %v4766_v52 }
 0x1ec   :  { %v5009_v62 = vpop.f32.mrf.mxu0  ;;  %3597 = vmatmul.mubr.bf16.vlgmr.msra.gmra.mxu0 %v2050_v59  ;;  %v5011_v1 = vpop.f32.mrf.mxu1  ;;  %v4771_v59 = vld [vmem:[#allocation6 + $0x28] sm:$0xff]  }
 0x1ed   :  { %3638 = vmatmul.mubr.bf16.vlgmr.msra.gmra.mxu1 %v2052_v56  ;;  %3647 = vmatpush1.bf16.msra.mxu0 %v4718_v38  ;;  %v2026_v44 = vadd.f32 %v1995_v41, %v5009_v62  ;;  %v4769_v56 = vld [vmem:[#allocation6 + $0x30] sm:$0xff]   ;;  %v4770_v38 = vld [vmem:[#allocation6 + $0x68] sm:$0xff]   ;;  %v4774_v62 = vld [vmem:[#allocation6 + $0x58] sm:$0xff]  }
 0x1ee   :  { %v1894_v2 = vpop.f32.mrf.mxu0  ;;  %3648 = vmatprep.subr.bf16.mxu0 %v4723_v35  ;;  %v5013_v5 = vpop.f32.mrf.mxu1  ;;  %4399 = vmatpush3.bf16.msra.mxu1 %v4767_v54  ;;  %v4772_v35 = vld [vmem:[#allocation6 + $0x60] sm:$0xff]  }
 0x1ef   :  { %v2027_v4 = vadd.f32 %v1999_v60, %v1894_v2  ;;  %v2040_v47 = vmax.f32 %v2026_v44, 0.0  ;;  %4400 = vmatprep.subr.bf16.mxu1 %v4768_v55  ;;  %v4773_v60 = vld [vmem:[#allocation6 + $0x20] sm:$0xff]  }
 0x1f0   :  { %v1896_v6 = vpop.f32.mrf.mxu0  ;;  %v1937_v9 = vpop.f32.mrf.mxu1 }
 0x1f1   :  { %v2041_v7 = vmax.f32 %v2027_v4, 0.0  ;;  %3649 = vmatpush1.bf16.msra.mxu0 %v4721_v63  ;;  %v2054_v21 = vpack.c.bf16 %v2040_v47, %v2040_v47  ;;  %v4775_v63 = vld [vmem:[#allocation6 + $0x18] sm:$0xff]   ;;  %v4776_v6 = vld [vmem:[#allocation6 + $0x50] sm:$0xff]  }
 0x1f2   :  { %v1897_v29 = vpop.f32.mrf.mxu0  ;;  %3650 = vmatprep.subr.bf16.mxu0 %v4726_v3  ;;  %v1938_v13 = vpop.f32.mrf.mxu1  ;;  %4401 = vmatpush3.bf16.msra.mxu1 %v4769_v56 }
 0x1f3   :  { %v2055_v11 = vpack.c.bf16 %v2041_v7, %v2041_v7  ;;  %4402 = vmatprep.subr.bf16.mxu1 %v4770_v38 }
 0x1f5   :  { %3651 = vmatpush1.bf16.msra.mxu0 %v4724_v8  ;;  %3678 = vmatprep.mubr.bf16.mxu0 %v2055_v11  ;;  %v4777_v8 = vld [vmem:[#allocation6 + $0x10] sm:$0xff]  }
 0x1f6   :  { %3652 = vmatprep.subr.bf16.mxu0 %v4729_v10  ;;  %4403 = vmatpush3.bf16.msra.mxu1 %v4771_v59 }
 0x1f7   :  { %4404 = vmatprep.subr.bf16.mxu1 %v4772_v35 }
 0x1f9   :  { %3653 = vmatpush1.bf16.msra.mxu0 %v4727_v15 }
 0x1fa   :  { %3654 = vmatprep.subr.bf16.mxu0 %v4732_v16  ;;  %4405 = vmatpush3.bf16.msra.mxu1 %v4773_v60  ;;  %v4778_v16 = vld [vmem:[#allocation6 + $0x48] sm:$0xff]  }
 0x1fb   :  { %4406 = vmatprep.subr.bf16.mxu1 %v4774_v62 }
 0x1fd   :  { %3655 = vmatpush1.bf16.msra.mxu0 %v4730_v17 }
 0x1fe   :  { %3656 = vmatprep.subr.bf16.mxu0 %v4735_v18  ;;  %4407 = vmatpush3.bf16.msra.mxu1 %v4775_v63  ;;  %v4779_v18 = vld [vmem:[#allocation6 + $0x8] sm:$0xff]  }
 0x1ff   :  { %4408 = vmatprep.subr.bf16.mxu1 %v4776_v6 }
 0x201   :  { %3657 = vmatpush1.bf16.msra.mxu0 %v4733_v20 }
 0x202   :  { %3658 = vmatprep.subr.bf16.mxu0 %v4738_v22  ;;  %4409 = vmatpush3.bf16.msra.mxu1 %v4777_v8  ;;  %v4780_v22 = vld [vmem:[#allocation6 + $0x40] sm:$0xff]  }
 0x203   :  { %4410 = vmatprep.subr.bf16.mxu1 %v4778_v16 }
 0x205   :  { %3659 = vmatpush1.bf16.msra.mxu0 %v4736_v53  ;;  %v4781_v53 = vld [vmem:[#allocation6] sm:$0xff]  }
 0x206   :  { %3660 = vmatprep.subr.bf16.mxu0 %v4741_v23  ;;  %4411 = vmatpush3.bf16.msra.mxu1 %v4779_v18 }
 0x207   :  { %4412 = vmatprep.subr.bf16.mxu1 %v4780_v22 }
 0x209   :  { %3661 = vmatpush1.bf16.msra.mxu0 %v4739_v24 }
 0x20a   :  { %3662 = vmatprep.subr.bf16.mxu0 %v4744_v61  ;;  %4413 = vmatpush3.bf16.msra.mxu1 %v4781_v53 }
 0x20d   :  { %3663 = vmatpush2.bf16.msra.mxu0 %v4742_v25 }
 0x20e   :  { %3664 = vmatprep.subr.bf16.mxu0 %v4747_v30 }
 0x211   :  { %3665 = vmatpush2.bf16.msra.mxu0 %v4745_v31 }
 0x212   :  { %3666 = vmatprep.subr.bf16.mxu0 %v4750_v32 }
 0x215   :  { %3667 = vmatpush2.bf16.msra.mxu0 %v4748_v33 }
 0x216   :  { %3668 = vmatprep.subr.bf16.mxu0 %v4753_v34 }
 0x219   :  { %3669 = vmatpush2.bf16.msra.mxu0 %v4751_v36 }
 0x21a   :  { %3670 = vmatprep.subr.bf16.mxu0 %v4756_v37 }
 0x21d   :  { %3671 = vmatpush2.bf16.msra.mxu0 %v4754_v39  ;;  %v3689_v39 = vld [vmem:[%s5036_s4] sm:$0x3] }
 0x21e   :  { %3672 = vmatprep.subr.bf16.mxu0 %v4759_v40 }
 0x221   :  { %3673 = vmatpush2.bf16.msra.mxu0 %v4757_v12 }
 0x222   :  { %3674 = vmatprep.subr.bf16.mxu0 %v4762_v42  ;;  %v3694_v42 = vrot.slane %v3689_v39, %v4958_v28 }
 0x225   :  { %3675 = vmatpush2.bf16.msra.mxu0 %v4760_v43 }
 0x226   :  { %3676 = vmatprep.subr.bf16.mxu0 %v4765_v45 }
 0x229   :  { %3677 = vmatpush2.bf16.msra.mxu0 %v4763_v46  ;;  %v3698_v46 = vrot.slane %v3689_v39, %v4937_v19 }
 0x22c   :  { %v3434_v48 = vpop.f32.mrf.mxu0  ;;  %3679 = vmatmul.mubr.bf16.vlgmr.msra.gmra.mxu0 %v2054_v21 }
 0x22d   :  { %v3475_v57 = vpop.f32.mrf.mxu1 }
 0x22e   :  { %v3476_v14 = vadd.f32 %v3475_v57, %v3434_v48  ;;  %v3436_v26 = vpop.f32.mrf.mxu0 }
 0x22f   :  { %v3477_v0 = vpop.f32.mrf.mxu1 }
 0x230   :  { %v3478_v58 = vadd.f32 %v3477_v0, %v3436_v26  ;;  %v3438_v49 = vpop.f32.mrf.mxu0 }
 0x231   :  { %v3479_v27 = vpop.f32.mrf.mxu1 }
 0x232   :  { %v3439_v50 = vpop.f32.mrf.mxu0 }
 0x233   :  { %v3480_v51 = vpop.f32.mrf.mxu1 }
 0x26c   :  { %v3516_v2 = vpop.f32.mrf.mxu0 }
 0x26d   :  { %v3517_v3 = vadd.f32 %v3516_v2, %v3476_v14  ;;  %v3557_v4 = vpop.f32.mrf.mxu1 }
 0x26e   :  { %v3518_v7 = vpop.f32.mrf.mxu0 }
 0x26f   :  { %v3558_v9 = vadd.f32 %v3557_v4, %v3517_v3  ;;  %v3519_v29 = vadd.f32 %v3518_v7, %v3478_v58  ;;  %v3559_v10 = vpop.f32.mrf.mxu1 }
 0x270   :  { %v3520_v11 = vpop.f32.mrf.mxu0 }
 0x271   :  { %v3560_v13 = vadd.f32 %v3559_v10, %v3519_v29  ;;  %v3561_v15 = vpop.f32.mrf.mxu1 }
 0x272   :  { %v3521_v17 = vpop.f32.mrf.mxu0 }
 0x273   :  { %v3562_v20 = vpop.f32.mrf.mxu1 }
 0x2ac   :  { %v3598_v23 = vpop.f32.mrf.mxu0 }
 0x2ad   :  { %v3599_v24 = vadd.f32 %v3598_v23, %v3558_v9  ;;  %v3639_v61 = vpop.f32.mrf.mxu1 }
 0x2ae   :  { %v3600_v25 = vpop.f32.mrf.mxu0 }
 0x2af   :  { %v3640_v30 = vadd.f32 %v3639_v61, %v3599_v24  ;;  %v3641_v31 = vpop.f32.mrf.mxu1  ;;  %v3601_v37 = vadd.f32 %v3600_v25, %v3560_v13 }
 0x2b0   :  { %v3602_v32 = vpop.f32.mrf.mxu0 }
 0x2b1   :  { %v3643_v33 = vpop.f32.mrf.mxu1  ;;  %v3642_v12 = vadd.f32 %v3641_v31, %v3601_v37 }
 0x2b2   :  { %v3603_v34 = vpop.f32.mrf.mxu0 }
 0x2b3   :  { %v3644_v36 = vpop.f32.mrf.mxu1 }
 0x2ec   :  { %v3680_v40 = vpop.f32.mrf.mxu0 }
 0x2ed   :  { %v3681_v41 = vadd.f32 %v3680_v40, %v3640_v30 }
 0x2ee   :  { %v3682_v43 = vpop.f32.mrf.mxu0 }
 0x2ef   :  { %v3687_v44 = vadd.f32 %v3681_v41, %v5011_v1  ;;  %v3683_v45 = vadd.f32 %v3682_v43, %v3642_v12  ;;  %v4381_v1 = vld [vmem:[%s5038_s6] ss:$0 sm:$0xff] }
 0x2f0   :  { %v3684_v47 = vpop.f32.mrf.mxu0 }
 0x2f1   :  { %v3701_v21 = vadd.f32 %v3694_v42, %v3687_v44  ;;  %v3688_v48 = vadd.f32 %v3683_v45, %v5013_v5 }
 0x2f2   :  { %v3685_v57 = vpop.f32.mrf.mxu0 }
 0x2f3   :  { %v3702_v14 = vadd.f32 %v3698_v46, %v3688_v48  ;;  %v3703_v26 = vmax.f32 %v3701_v21, 0.0 }
 0x2f5   :  { %v3704_v0 = vmax.f32 %v3702_v14, 0.0  ;;  %v3705_v49 = vpack.c.bf16 %v3703_v26, %v3703_v26 }
 0x2f7   :  { %v3706_v58 = vpack.c.bf16 %v3704_v0, %v3704_v0 }
 0x2f9   :  { %3874 = vmatprep.mubr.bf16.mxu1 %v3706_v58 }
 0x2fa   :  { %3875 = vmatmul.mubr.bf16.vlgmr.msra.gmra.mxu1 %v3705_v49 }
 0x3ba   :  { %v4414_v27 = vpop.f32.mrf.mxu1 }
 0x3bc   :  { %v4415_v28 = vpop.f32.mrf.mxu1 }
 0x3bd   :  { %v4416_v50 = vadd.f32 %v4415_v28, %v4414_v27 }
 0x3be   :  { %v4417_v19 = vpop.f32.mrf.mxu1 }
 0x3bf   :  { %v3877_v51 = vadd.f32 %v4416_v50, %v4381_v1 }
 0x3c0   :  { %v4418_v52 = vpop.f32.mrf.mxu1 }
 0x3c1   :  { %3882 = vmax.xlane.f32.xlu0 %v3877_v51 }
 0x44a   :  { %v3883_v5 = vpop.xlane.xlu0 %3882 }
 0x44b   :  { %v3884_v54 = vsub.f32 %v3877_v51, %v3883_v5 }
 0x44d   :  { %v3885_v55 = vmul.f32 1.442695, %v3884_v54 }
 0x44f   :  { %4782 = vpow2.f32 %v3885_v55 }
 0x45c   :  { %v4783_v56 = vpop.eup %4782 }
 0x45d   :  { %3887 = vadd.xlane.f32.xlu0 %v4783_v56 }
 0x4e6   :  { %v3888_v38 = vpop.xlane.xlu0 %3887 }
 0x4e7   :  { %4784 = vrcp.f32 %v3888_v38 }
 0x4f4   :  { %v4785_v59 = vpop.eup %4784 }
 0x4f5   :  { %v3890_v35 = vmul.f32 %v4785_v59, %v4783_v56 }
 0x4f7   :  { %v3891_v60 = vpack.c.bf16 %v3890_v35, %v3890_v35 }
 0x4f9   :  { %3892 = vst [vmem:[%s5039_s7] sm:$0xf] %v3891_v60 }
 0x4fa   :  { %3897 = vsyncpa [#allocation3], 1 }
 0x4fb   :  { %3898 = vsyncpa [#allocation5], 1 }

// kernel: _forward_impl.1
= control target key start
LH: loop header
LB: loop body
LE: loop exit
PB: predicated region body
PF: predicated region fallthrough
CT: control target
= control target key end

     0   :  { %12 = vsyncpa [#allocation3], 0  ;;  %s5032_s0 = inlined_call_operand.vmem [shape: bf16[8,256], index: 0, kind: input, shape index: {}]   ;;  %s5033_s1 = inlined_call_operand.hbm [shape: bf16[256,2048], index: 1, kind: input, shape index: {}]   ;;  %s5034_s2 = inlined_call_operand.vmem [shape: f32[1,1792], index: 2, kind: input, shape index: {}]   ;;  %s5035_s3 = inlined_call_operand.hbm [shape: bf16[1792,256], index: 3, kind: input, shape index: {}]   ;;  %s5036_s4 = inlined_call_operand.vmem [shape: f32[1,256], index: 4, kind: input, shape index: {}]   ;;  %s5037_s5 = inlined_call_operand.hbm [shape: bf16[256,128], index: 5, kind: input, shape index: {}]   ;;  %s5038_s6 = inlined_call_operand.vmem [shape: f32[1,128], index: 6, kind: input, shape index: {}]   ;;  %s5039_s7 = inlined_call_operand.vmem [shape: bf16[8,128], index: 7, kind: output, shape index: {}]  }
   0x1   :  { %13 = vsyncpa [#allocation5], 0  ;;  %s4850_s24 = smov [#allocation4]  }
   0x2   :  { %s35_s25 = sshll.u32 %s4850_s24, 4  ;;  %s36_s25 = int_to_ptr.vmem [resolvable:$true] %s35_s25 }
   0x3   :  { %s4794_s26 = scalar_lea.vmem %s36_s25, 28672  ;;  %p4799_p1 = scmp.lt.s32.totalorder %s36_s25, %s36_s25 }
   0x4   :  { %p4795_p0 = scmp.ne.s32.totalorder %s36_s25, %s4794_s26  ;;  %p4800_p2 = scmp.lt.s32.totalorder %s4794_s26, %s4794_s26 }
   0x6   :  { %p4801_p3 = por %p4800_p2, %p4799_p1 }
   0x8   :  { %p4802_p4 = pnand %p4801_p3, %p4795_p0 }
   0xa   :  { %4805 = shalt.err (!%p4802_p4)
}
   0xb   :  { %s4851_s27 = smov 128   ;;  %s4852_s28 = smov 8  }
   0xc   :  { %41 = dma.hbm_to_vmem [thread:$0]  %s5035_s3, 28672, %s36_s25, [#allocation5], %s4851_s27, %s4851_s27, %s4852_s28  }
   0xd   :  { %s4853_s8 = smov [#allocation2]  }
   0xe   :  { %s21_s9 = sshll.u32 %s4853_s8, 4  ;;  %s22_s9 = int_to_ptr.vmem [resolvable:$true] %s21_s9 }
   0xf   :  { %s4814_s10 = scalar_lea.vmem %s22_s9, 32768  ;;  %p4819_p6 = scmp.lt.s32.totalorder %s22_s9, %s22_s9 }
  0x10   :  { %p4815_p5 = scmp.ne.s32.totalorder %s22_s9, %s4814_s10  ;;  %p4820_p7 = scmp.lt.s32.totalorder %s4814_s10, %s4814_s10 }
  0x12   :  { %p4821_p8 = por %p4820_p7, %p4819_p6 }
  0x14   :  { %p4822_p9 = pnand %p4821_p8, %p4815_p5 }
  0x16   :  { %4825 = shalt.err (!%p4822_p9)
}
  0x17   :  { %s4854_s11 = smov 1024   ;;  %s4855_s12 = smov 64  }
  0x18   :  { %27 = dma.hbm_to_vmem [thread:$0]  %s5033_s1, 32768, %s22_s9, [#allocation3], %s4854_s11, %s4854_s11, %s4855_s12  }
  0x19   :  { %s4856_s15 = smov [#allocation6]  }
  0x1a   :  { %s49_s16 = sshll.u32 %s4856_s15, 4  ;;  %s50_s16 = int_to_ptr.vmem [resolvable:$true] %s49_s16 }
  0x1b   :  { %s4834_s3 = scalar_lea.vmem %s50_s16, 2048  ;;  %p4839_p11 = scmp.lt.s32.totalorder %s50_s16, %s50_s16 }
  0x1c   :  { %p4835_p10 = scmp.ne.s32.totalorder %s50_s16, %s4834_s3  ;;  %p4840_p12 = scmp.lt.s32.totalorder %s4834_s3, %s4834_s3 }
  0x1e   :  { %p4841_p13 = por %p4840_p12, %p4839_p11 }
  0x20   :  { %p4842_p0 = pnand %p4841_p13, %p4835_p10 }
  0x22   :  { %4845 = shalt.err (!%p4842_p0)
}
  0x23   :  { %s4857_s17 = smov 4  }
  0x24   :  { %55 = dma.hbm_to_vmem [thread:$0]  %s5037_s5, 2048, %s50_s16, [#allocation5], %s4855_s12, %s4855_s12, %s4857_s17  }
  0x25   :  { %4846 = dma.done.wait [#allocation3], 32768  }
  0x26   :  { %4847 = vsyncadd [#allocation3], 4294934528 }
  0x27   :  { %4848 = dma.done.wait [#allocation5], 30720  }
  0x28   :  { %4849 = vsyncadd [#allocation5], 4294936576  ;;  %v181_v0 = vld [vmem:[#allocation2 + $0x380] sm:$0xff]  ;;  %v182_v2 = vld [vmem:[#allocation2 + $0x388] sm:$0xff] }
  0x29   :  { %v189_v1 = vld [vmem:[#allocation2 + $0x3c0] sm:$0xff]  ;;  %v190_v4 = vld [vmem:[#allocation2 + $0x3c8] sm:$0xff] }
  0x2a   :  { %v4014_v3 = vcombine.high %v181_v0, %v189_v1  ;;  %v4013_v5 = vcombine.low %v181_v0, %v189_v1  ;;  %v165_v6 = vld [vmem:[#allocation2 + $0x300] sm:$0xff]  ;;  %v4016_v8 = vcombine.high %v182_v2, %v190_v4  ;;  %v4015_v9 = vcombine.low %v182_v2, %v190_v4  ;;  %v166_v11 = vld [vmem:[#allocation2 + $0x308] sm:$0xff] }
  0x2b   :  { %v173_v7 = vld [vmem:[#allocation2 + $0x340] sm:$0xff]  ;;  %v174_v12 = vld [vmem:[#allocation2 + $0x348] sm:$0xff] }
  0x2c   :  { %v3998_v10 = vcombine.high %v165_v6, %v173_v7  ;;  %v149_v13 = vld [vmem:[#allocation2 + $0x280] sm:$0xff]  ;;  %1612 = vmatprep.subr.bf16.mxu0 %v4014_v3  ;;  %v4000_v14 = vcombine.high %v166_v11, %v174_v12  ;;  %v150_v16 = vld [vmem:[#allocation2 + $0x288] sm:$0xff]  ;;  %1653 = vmatprep.subr.bf16.mxu1 %v4016_v8  ;;  %v3997_v18 = vcombine.low %v165_v6, %v173_v7 }
  0x2d   :  { %v157_v15 = vld [vmem:[#allocation2 + $0x2c0] sm:$0xff]  ;;  %v158_v17 = vld [vmem:[#allocation2 + $0x2c8] sm:$0xff]  ;;  %1613 = vmatpush1.bf16.msra.mxu0 %v4013_v5  ;;  %1654 = vmatpush1.bf16.msra.mxu1 %v4015_v9  ;;  %v3999_v19 = vcombine.low %v166_v11, %v174_v12 }
  0x2e   :  { %1614 = vmatprep.subr.bf16.mxu0 %v3998_v10  ;;  %v3982_v20 = vcombine.high %v149_v13, %v157_v15  ;;  %1655 = vmatprep.subr.bf16.mxu1 %v4000_v14  ;;  %v3984_v21 = vcombine.high %v150_v16, %v158_v17  ;;  %v133_v22 = vld [vmem:[#allocation2 + $0x200] sm:$0xff]  ;;  %v134_v24 = vld [vmem:[#allocation2 + $0x208] sm:$0xff]  ;;  %v3981_v26 = vcombine.low %v149_v13, %v157_v15 }
  0x2f   :  { %v141_v23 = vld [vmem:[#allocation2 + $0x240] sm:$0xff]  ;;  %v142_v25 = vld [vmem:[#allocation2 + $0x248] sm:$0xff]  ;;  %v3983_v27 = vcombine.low %v150_v16, %v158_v17 }
  0x30   :  { %v3966_v28 = vcombine.high %v133_v22, %v141_v23  ;;  %v3968_v29 = vcombine.high %v134_v24, %v142_v25  ;;  %v117_v30 = vld [vmem:[#allocation2 + $0x180] sm:$0xff]  ;;  %v118_v32 = vld [vmem:[#allocation2 + $0x188] sm:$0xff]  ;;  %v3965_v34 = vcombine.low %v133_v22, %v141_v23  ;;  %v3967_v35 = vcombine.low %v134_v24, %v142_v25 }
  0x31   :  { %1615 = vmatpush1.bf16.msra.mxu0 %v3997_v18  ;;  %1656 = vmatpush1.bf16.msra.mxu1 %v3999_v19  ;;  %v125_v31 = vld [vmem:[#allocation2 + $0x1c0] sm:$0xff]  ;;  %v126_v33 = vld [vmem:[#allocation2 + $0x1c8] sm:$0xff] }
  0x32   :  { %1616 = vmatprep.subr.bf16.mxu0 %v3982_v20  ;;  %1657 = vmatprep.subr.bf16.mxu1 %v3984_v21  ;;  %v3950_v36 = vcombine.high %v117_v30, %v125_v31  ;;  %v3952_v37 = vcombine.high %v118_v32, %v126_v33  ;;  %v101_v38 = vld [vmem:[#allocation2 + $0x100] sm:$0xff]  ;;  %v102_v40 = vld [vmem:[#allocation2 + $0x108] sm:$0xff]  ;;  %v3949_v42 = vcombine.low %v117_v30, %v125_v31 }
  0x33   :  { %v109_v39 = vld [vmem:[#allocation2 + $0x140] sm:$0xff]  ;;  %v110_v41 = vld [vmem:[#allocation2 + $0x148] sm:$0xff]  ;;  %v3951_v43 = vcombine.low %v118_v32, %v126_v33 }
  0x34   :  { %v3934_v44 = vcombine.high %v101_v38, %v109_v39  ;;  %v3936_v45 = vcombine.high %v102_v40, %v110_v41  ;;  %v85_v46 = vld [vmem:[#allocation2 + $0x80] sm:$0xff]  ;;  %v86_v48 = vld [vmem:[#allocation2 + $0x88] sm:$0xff]  ;;  %v3933_v50 = vcombine.low %v101_v38, %v109_v39  ;;  %v3935_v51 = vcombine.low %v102_v40, %v110_v41 }
  0x35   :  { %1617 = vmatpush1.bf16.msra.mxu0 %v3981_v26  ;;  %1658 = vmatpush1.bf16.msra.mxu1 %v3983_v27  ;;  %v93_v47 = vld [vmem:[#allocation2 + $0xc0] sm:$0xff]  ;;  %v94_v49 = vld [vmem:[#allocation2 + $0xc8] sm:$0xff] }
  0x36   :  { %1618 = vmatprep.subr.bf16.mxu0 %v3966_v28  ;;  %1659 = vmatprep.subr.bf16.mxu1 %v3968_v29  ;;  %v3918_v52 = vcombine.high %v85_v46, %v93_v47  ;;  %v4910_v53 = vld [vmem:[%s5032_s0] sm:$0xff]  ;;  %v3920_v54 = vcombine.high %v86_v48, %v94_v49  ;;  %v70_v58 = vld [vmem:[#allocation2 + $0x8] sm:$0xff]  ;;  %v3917_v60 = vcombine.low %v85_v46, %v93_v47 }
  0x37   :  { %v69_v55 = vld [vmem:[#allocation2] sm:$0xff]  ;;  %v4914_v57 = vcombine.high %v4910_v53, %v4910_v53  ;;  %v78_v59 = vld [vmem:[#allocation2 + $0x48] sm:$0xff]  ;;  %v3919_v61 = vcombine.low %v86_v48, %v94_v49 }
  0x38   :  { %v77_v56 = vld [vmem:[#allocation2 + $0x40] sm:$0xff]  ;;  %v3904_v63 = vcombine.high %v70_v58, %v78_v59  ;;  %v310_v2 = vld [vmem:[#allocation2 + $0x788] sm:$0xff]  ;;  %v3903_v5 = vcombine.low %v70_v58, %v78_v59 }
  0x39   :  { %1619 = vmatpush1.bf16.msra.mxu0 %v3965_v34  ;;  %1660 = vmatpush1.bf16.msra.mxu1 %v3967_v35  ;;  %v3902_v62 = vcombine.high %v69_v55, %v77_v56  ;;  %v309_v0 = vld [vmem:[#allocation2 + $0x780] sm:$0xff]  ;;  %v318_v3 = vld [vmem:[#allocation2 + $0x7c8] sm:$0xff]  ;;  %v3901_v4 = vcombine.low %v69_v55, %v77_v56 }
  0x3a   :  { %1620 = vmatprep.subr.bf16.mxu0 %v3950_v36  ;;  %1661 = vmatprep.subr.bf16.mxu1 %v3952_v37  ;;  %v317_v1 = vld [vmem:[#allocation2 + $0x7c0] sm:$0xff]  ;;  %v4144_v7 = vcombine.high %v310_v2, %v318_v3  ;;  %v294_v10 = vld [vmem:[#allocation2 + $0x708] sm:$0xff]  ;;  %v4143_v13 = vcombine.low %v310_v2, %v318_v3  ;;  %v183_v2 = vld [vmem:[#allocation2 + $0x390] sm:$0xff] }
  0x3b   :  { %1644 = vmatprep.mubr.bf16.mxu0 %v4914_v57  ;;  %1685 = vmatprep.mubr.bf16.mxu1 %v4914_v57  ;;  %v4142_v6 = vcombine.high %v309_v0, %v317_v1  ;;  %v293_v8 = vld [vmem:[#allocation2 + $0x700] sm:$0xff]  ;;  %v302_v11 = vld [vmem:[#allocation2 + $0x748] sm:$0xff]  ;;  %v4141_v12 = vcombine.low %v309_v0, %v317_v1  ;;  %v191_v3 = vld [vmem:[#allocation2 + $0x3d0] sm:$0xff] }
  0x3c   :  { %v301_v9 = vld [vmem:[#allocation2 + $0x740] sm:$0xff]  ;;  %v4128_v15 = vcombine.high %v294_v10, %v302_v11  ;;  %v278_v18 = vld [vmem:[#allocation2 + $0x688] sm:$0xff]  ;;  %v4127_v21 = vcombine.low %v294_v10, %v302_v11  ;;  %v167_v10 = vld [vmem:[#allocation2 + $0x310] sm:$0xff] }
  0x3d   :  { %1621 = vmatpush1.bf16.msra.mxu0 %v3949_v42  ;;  %1662 = vmatpush1.bf16.msra.mxu1 %v3951_v43  ;;  %v4126_v14 = vcombine.high %v293_v8, %v301_v9  ;;  %v277_v16 = vld [vmem:[#allocation2 + $0x680] sm:$0xff]  ;;  %v286_v19 = vld [vmem:[#allocation2 + $0x6c8] sm:$0xff]  ;;  %v4125_v20 = vcombine.low %v293_v8, %v301_v9  ;;  %v4018_v8 = vcombine.high %v183_v2, %v191_v3  ;;  %v175_v11 = vld [vmem:[#allocation2 + $0x350] sm:$0xff] }
  0x3e   :  { %1622 = vmatprep.subr.bf16.mxu0 %v3934_v44  ;;  %1663 = vmatprep.subr.bf16.mxu1 %v3936_v45  ;;  %v285_v17 = vld [vmem:[#allocation2 + $0x6c0] sm:$0xff]  ;;  %v4112_v23 = vcombine.high %v278_v18, %v286_v19  ;;  %v262_v26 = vld [vmem:[#allocation2 + $0x608] sm:$0xff]  ;;  %v4111_v29 = vcombine.low %v278_v18, %v286_v19  ;;  %v151_v18 = vld [vmem:[#allocation2 + $0x290] sm:$0xff] }
  0x3f   :  { %v4110_v22 = vcombine.high %v277_v16, %v285_v17  ;;  %v261_v24 = vld [vmem:[#allocation2 + $0x600] sm:$0xff]  ;;  %v270_v27 = vld [vmem:[#allocation2 + $0x648] sm:$0xff]  ;;  %v4109_v28 = vcombine.low %v277_v16, %v285_v17  ;;  %v4002_v17 = vcombine.high %v167_v10, %v175_v11  ;;  %v159_v19 = vld [vmem:[#allocation2 + $0x2d0] sm:$0xff] }
  0x40   :  { %v269_v25 = vld [vmem:[#allocation2 + $0x640] sm:$0xff]  ;;  %v4096_v31 = vcombine.high %v262_v26, %v270_v27  ;;  %v246_v34 = vld [vmem:[#allocation2 + $0x588] sm:$0xff]  ;;  %v4095_v37 = vcombine.low %v262_v26, %v270_v27  ;;  %v143_v26 = vld [vmem:[#allocation2 + $0x250] sm:$0xff] }
  0x41   :  { %1623 = vmatpush1.bf16.msra.mxu0 %v3933_v50  ;;  %1664 = vmatpush1.bf16.msra.mxu1 %v3935_v51  ;;  %v4094_v30 = vcombine.high %v261_v24, %v269_v25  ;;  %v245_v32 = vld [vmem:[#allocation2 + $0x580] sm:$0xff]  ;;  %v254_v35 = vld [vmem:[#allocation2 + $0x5c8] sm:$0xff]  ;;  %v4093_v36 = vcombine.low %v261_v24, %v269_v25  ;;  %v3986_v24 = vcombine.high %v151_v18, %v159_v19  ;;  %v135_v25 = vld [vmem:[#allocation2 + $0x210] sm:$0xff] }
  0x42   :  { %1624 = vmatprep.subr.bf16.mxu0 %v3918_v52  ;;  %1665 = vmatprep.subr.bf16.mxu1 %v3920_v54  ;;  %v253_v33 = vld [vmem:[#allocation2 + $0x5c0] sm:$0xff]  ;;  %v4080_v39 = vcombine.high %v246_v34, %v254_v35  ;;  %v230_v42 = vld [vmem:[#allocation2 + $0x508] sm:$0xff]  ;;  %v4079_v45 = vcombine.low %v246_v34, %v254_v35  ;;  %v136_v27 = vld [vmem:[#allocation2 + $0x218] sm:$0xff] }
  0x43   :  { %v4078_v38 = vcombine.high %v245_v32, %v253_v33  ;;  %v229_v40 = vld [vmem:[#allocation2 + $0x500] sm:$0xff]  ;;  %v238_v43 = vld [vmem:[#allocation2 + $0x548] sm:$0xff]  ;;  %v4077_v44 = vcombine.low %v245_v32, %v253_v33  ;;  %v3970_v32 = vcombine.high %v135_v25, %v143_v26  ;;  %v119_v33 = vld [vmem:[#allocation2 + $0x190] sm:$0xff] }
  0x44   :  { %v237_v41 = vld [vmem:[#allocation2 + $0x540] sm:$0xff]  ;;  %v4064_v47 = vcombine.high %v230_v42, %v238_v43  ;;  %v214_v50 = vld [vmem:[#allocation2 + $0x488] sm:$0xff]  ;;  %v4063_v54 = vcombine.low %v230_v42, %v238_v43  ;;  %v127_v34 = vld [vmem:[#allocation2 + $0x1d0] sm:$0xff] }
  0x45   :  { %1625 = vmatpush1.bf16.msra.mxu0 %v3917_v60  ;;  %1666 = vmatpush1.bf16.msra.mxu1 %v3919_v61  ;;  %v4062_v46 = vcombine.high %v229_v40, %v237_v41  ;;  %v213_v48 = vld [vmem:[#allocation2 + $0x480] sm:$0xff]  ;;  %v222_v51 = vld [vmem:[#allocation2 + $0x4c8] sm:$0xff]  ;;  %v4061_v52 = vcombine.low %v229_v40, %v237_v41  ;;  %v120_v35 = vld [vmem:[#allocation2 + $0x198] sm:$0xff]  ;;  %v3954_v40 = vcombine.high %v119_v33, %v127_v34 }
  0x46   :  { %1626 = vmatprep.subr.bf16.mxu0 %v3902_v62  ;;  %1667 = vmatprep.subr.bf16.mxu1 %v3904_v63  ;;  %v221_v49 = vld [vmem:[#allocation2 + $0x4c0] sm:$0xff]  ;;  %v4048_v56 = vcombine.high %v214_v50, %v222_v51  ;;  %v198_v60 = vld [vmem:[#allocation2 + $0x408] sm:$0xff]  ;;  %v4047_v63 = vcombine.low %v214_v50, %v222_v51  ;;  %v103_v41 = vld [vmem:[#allocation2 + $0x110] sm:$0xff] }
  0x47   :  { %v4046_v55 = vcombine.high %v213_v48, %v221_v49  ;;  %v197_v58 = vld [vmem:[#allocation2 + $0x400] sm:$0xff]  ;;  %v206_v61 = vld [vmem:[#allocation2 + $0x448] sm:$0xff]  ;;  %v4045_v62 = vcombine.low %v213_v48, %v221_v49  ;;  %v111_v42 = vld [vmem:[#allocation2 + $0x150] sm:$0xff] }
  0x48   :  { %v205_v59 = vld [vmem:[#allocation2 + $0x440] sm:$0xff]  ;;  %v4032_v1 = vcombine.high %v198_v60, %v206_v61  ;;  %v104_v43 = vld [vmem:[#allocation2 + $0x118] sm:$0xff]  ;;  %v3938_v48 = vcombine.high %v103_v41, %v111_v42  ;;  %v87_v49 = vld [vmem:[#allocation2 + $0x90] sm:$0xff] }
  0x49   :  { %1627 = vmatpush1.bf16.msra.mxu0 %v3901_v4  ;;  %1668 = vmatpush1.bf16.msra.mxu1 %v3903_v5  ;;  %v4030_v0 = vcombine.high %v197_v58, %v205_v59  ;;  %v184_v4 = vld [vmem:[#allocation2 + $0x398] sm:$0xff]  ;;  %v95_v50 = vld [vmem:[#allocation2 + $0xd0] sm:$0xff] }
  0x4a   :  { %1628 = vmatprep.subr.bf16.mxu0 %v4142_v6  ;;  %1669 = vmatprep.subr.bf16.mxu1 %v4144_v7  ;;  %v192_v5 = vld [vmem:[#allocation2 + $0x3d8] sm:$0xff]  ;;  %v4029_v6 = vcombine.low %v197_v58, %v205_v59  ;;  %v4031_v7 = vcombine.low %v198_v60, %v206_v61  ;;  %v3922_v58 = vcombine.high %v87_v49, %v95_v50  ;;  %v71_v59 = vld [vmem:[#allocation2 + $0x10] sm:$0xff] }
  0x4b   :  { %v4020_v9 = vcombine.high %v184_v4, %v192_v5  ;;  %v4019_v16 = vcombine.low %v184_v4, %v192_v5  ;;  %v88_v51 = vld [vmem:[#allocation2 + $0x98] sm:$0xff]  ;;  %v79_v60 = vld [vmem:[#allocation2 + $0x50] sm:$0xff] }
  0x4c   :  { %v72_v61 = vld [vmem:[#allocation2 + $0x18] sm:$0xff]  ;;  %v319_v4 = vld [vmem:[#allocation2 + $0x7d0] sm:$0xff] }
  0x4d   :  { %1629 = vmatpush2.bf16.msra.mxu0 %v4141_v12  ;;  %1670 = vmatpush2.bf16.msra.mxu1 %v4143_v13  ;;  %v4920_v12 = vcombine.low %v4910_v53, %v4910_v53  ;;  %v168_v13 = vld [vmem:[#allocation2 + $0x318] sm:$0xff]  ;;  %v4001_v53 = vcombine.low %v167_v10, %v175_v11  ;;  %v295_v11 = vld [vmem:[#allocation2 + $0x710] sm:$0xff] }
  0x4e   :  { %1630 = vmatprep.subr.bf16.mxu0 %v4126_v14  ;;  %1671 = vmatprep.subr.bf16.mxu1 %v4128_v15  ;;  %v176_v14 = vld [vmem:[#allocation2 + $0x358] sm:$0xff]  ;;  %v4017_v15 = vcombine.low %v183_v2, %v191_v3  ;;  %v3906_v2 = vcombine.high %v71_v59, %v79_v60  ;;  %v311_v3 = vld [vmem:[#allocation2 + $0x790] sm:$0xff] }
  0x4f   :  { %v312_v5 = vld [vmem:[#allocation2 + $0x798] sm:$0xff]  ;;  %v4146_v10 = vcombine.high %v311_v3, %v319_v4 }
  0x51   :  { %1631 = vmatpush2.bf16.msra.mxu0 %v4125_v20  ;;  %1672 = vmatpush2.bf16.msra.mxu1 %v4127_v21  ;;  %v152_v20 = vld [vmem:[#allocation2 + $0x298] sm:$0xff]  ;;  %v4004_v21 = vcombine.high %v168_v13, %v176_v14 }
  0x52   :  { %1632 = vmatprep.subr.bf16.mxu0 %v4110_v22  ;;  %1673 = vmatprep.subr.bf16.mxu1 %v4112_v23  ;;  %v160_v22 = vld [vmem:[#allocation2 + $0x2d8] sm:$0xff]  ;;  %v4003_v23 = vcombine.low %v168_v13, %v176_v14  ;;  %v303_v13 = vld [vmem:[#allocation2 + $0x750] sm:$0xff] }
  0x53   :  { %v296_v14 = vld [vmem:[#allocation2 + $0x718] sm:$0xff] }
  0x55   :  { %1633 = vmatpush2.bf16.msra.mxu0 %v4109_v28  ;;  %1674 = vmatpush2.bf16.msra.mxu1 %v4111_v29  ;;  %v3988_v28 = vcombine.high %v152_v20, %v160_v22  ;;  %v144_v29 = vld [vmem:[#allocation2 + $0x258] sm:$0xff] }
  0x56   :  { %1634 = vmatprep.subr.bf16.mxu0 %v4094_v30  ;;  %1675 = vmatprep.subr.bf16.mxu1 %v4096_v31  ;;  %v3985_v30 = vcombine.low %v151_v18, %v159_v19  ;;  %v3987_v31 = vcombine.low %v152_v20, %v160_v22  ;;  %v4130_v19 = vcombine.high %v295_v11, %v303_v13  ;;  %v279_v20 = vld [vmem:[#allocation2 + $0x690] sm:$0xff]  ;;  %v280_v22 = vld [vmem:[#allocation2 + $0x698] sm:$0xff] }
  0x59   :  { %1635 = vmatpush2.bf16.msra.mxu0 %v4093_v36  ;;  %1676 = vmatpush2.bf16.msra.mxu1 %v4095_v37  ;;  %v3972_v36 = vcombine.high %v136_v27, %v144_v29  ;;  %v128_v37 = vld [vmem:[#allocation2 + $0x1d8] sm:$0xff] }
  0x5a   :  { %1636 = vmatprep.subr.bf16.mxu0 %v4078_v38  ;;  %1677 = vmatprep.subr.bf16.mxu1 %v4080_v39  ;;  %v3969_v38 = vcombine.low %v135_v25, %v143_v26  ;;  %v3971_v39 = vcombine.low %v136_v27, %v144_v29  ;;  %v263_v27 = vld [vmem:[#allocation2 + $0x610] sm:$0xff]  ;;  %v264_v29 = vld [vmem:[#allocation2 + $0x618] sm:$0xff] }
  0x5d   :  { %1637 = vmatpush2.bf16.msra.mxu0 %v4077_v44  ;;  %1678 = vmatpush2.bf16.msra.mxu1 %v4079_v45  ;;  %v3956_v44 = vcombine.high %v120_v35, %v128_v37  ;;  %v112_v45 = vld [vmem:[#allocation2 + $0x158] sm:$0xff] }
  0x5e   :  { %1638 = vmatprep.subr.bf16.mxu0 %v4062_v46  ;;  %1679 = vmatprep.subr.bf16.mxu1 %v4064_v47  ;;  %v3953_v46 = vcombine.low %v119_v33, %v127_v34  ;;  %v3955_v47 = vcombine.low %v120_v35, %v128_v37  ;;  %v247_v35 = vld [vmem:[#allocation2 + $0x590] sm:$0xff]  ;;  %v248_v37 = vld [vmem:[#allocation2 + $0x598] sm:$0xff] }
  0x61   :  { %1639 = vmatpush2.bf16.msra.mxu0 %v4061_v52  ;;  %1680 = vmatpush2.bf16.msra.mxu1 %v4063_v54  ;;  %v3940_v52 = vcombine.high %v104_v43, %v112_v45  ;;  %v96_v54 = vld [vmem:[#allocation2 + $0xd8] sm:$0xff] }
  0x62   :  { %1640 = vmatprep.subr.bf16.mxu0 %v4046_v55  ;;  %1681 = vmatprep.subr.bf16.mxu1 %v4048_v56  ;;  %v3937_v55 = vcombine.low %v103_v41, %v111_v42  ;;  %v3939_v56 = vcombine.low %v104_v43, %v112_v45  ;;  %v231_v43 = vld [vmem:[#allocation2 + $0x510] sm:$0xff]  ;;  %v232_v45 = vld [vmem:[#allocation2 + $0x518] sm:$0xff] }
  0x65   :  { %1641 = vmatpush2.bf16.msra.mxu0 %v4045_v62  ;;  %1682 = vmatpush2.bf16.msra.mxu1 %v4047_v63  ;;  %v3924_v62 = vcombine.high %v88_v51, %v96_v54  ;;  %v80_v63 = vld [vmem:[#allocation2 + $0x58] sm:$0xff] }
  0x66   :  { %1642 = vmatprep.subr.bf16.mxu0 %v4030_v0  ;;  %1683 = vmatprep.subr.bf16.mxu1 %v4032_v1  ;;  %v3921_v0 = vcombine.low %v87_v49, %v95_v50  ;;  %v3923_v1 = vcombine.low %v88_v51, %v96_v54  ;;  %v215_v51 = vld [vmem:[#allocation2 + $0x490] sm:$0xff]  ;;  %v216_v54 = vld [vmem:[#allocation2 + $0x498] sm:$0xff] }
  0x69   :  { %1643 = vmatpush2.bf16.msra.mxu0 %v4029_v6  ;;  %1684 = vmatpush2.bf16.msra.mxu1 %v4031_v7  ;;  %v3908_v6 = vcombine.high %v72_v61, %v80_v63  ;;  %v320_v7 = vld [vmem:[#allocation2 + $0x7d8] sm:$0xff] }
  0x6a   :  { %1694 = vmatprep.subr.bf16.mxu0 %v4018_v8  ;;  %1735 = vmatprep.subr.bf16.mxu1 %v4020_v9  ;;  %v3905_v8 = vcombine.low %v71_v59, %v79_v60  ;;  %v3907_v9 = vcombine.low %v72_v61, %v80_v63  ;;  %v4147_v18 = vcombine.low %v312_v5, %v320_v7  ;;  %v199_v61 = vld [vmem:[#allocation2 + $0x410] sm:$0xff]  ;;  %v200_v63 = vld [vmem:[#allocation2 + $0x418] sm:$0xff] }
  0x6c   :  { %1645 = vmatmul.mubr.bf16.vlgmr.msra.gmra.mxu0 %v4920_v12  ;;  %1686 = vmatmul.mubr.bf16.vlgmr.msra.gmra.mxu1 %v4920_v12 }
  0x6d   :  { %1695 = vmatpush1.bf16.msra.mxu0 %v4017_v15  ;;  %1736 = vmatpush1.bf16.msra.mxu1 %v4019_v16  ;;  %v4148_v15 = vcombine.high %v312_v5, %v320_v7  ;;  %v304_v16 = vld [vmem:[#allocation2 + $0x758] sm:$0xff]  ;;  %v185_v5 = vld [vmem:[#allocation2 + $0x3a0] sm:$0xff]  ;;  %v186_v7 = vld [vmem:[#allocation2 + $0x3a8] sm:$0xff] }
  0x6e   :  { %1696 = vmatprep.subr.bf16.mxu0 %v4002_v17  ;;  %1737 = vmatprep.subr.bf16.mxu1 %v4004_v21  ;;  %v4145_v17 = vcombine.low %v311_v3, %v319_v4  ;;  %v287_v21 = vld [vmem:[#allocation2 + $0x6d0] sm:$0xff]  ;;  %v4131_v25 = vcombine.low %v296_v14, %v304_v16 }
  0x6f   :  { %1726 = vmatprep.mubr.bf16.mxu0 %v4914_v57  ;;  %1767 = vmatprep.mubr.bf16.mxu1 %v4914_v57  ;;  %v4114_v26 = vcombine.high %v279_v20, %v287_v21 }
  0x71   :  { %1697 = vmatpush1.bf16.msra.mxu0 %v4001_v53  ;;  %1738 = vmatpush1.bf16.msra.mxu1 %v4003_v23  ;;  %v4132_v53 = vcombine.high %v296_v14, %v304_v16  ;;  %v288_v23 = vld [vmem:[#allocation2 + $0x6d8] sm:$0xff]  ;;  %v169_v14 = vld [vmem:[#allocation2 + $0x320] sm:$0xff]  ;;  %v170_v16 = vld [vmem:[#allocation2 + $0x328] sm:$0xff] }
  0x72   :  { %1698 = vmatprep.subr.bf16.mxu0 %v3986_v24  ;;  %1739 = vmatprep.subr.bf16.mxu1 %v3988_v28  ;;  %v4129_v24 = vcombine.low %v295_v11, %v303_v13  ;;  %v271_v28 = vld [vmem:[#allocation2 + $0x650] sm:$0xff]  ;;  %v4115_v33 = vcombine.low %v280_v22, %v288_v23 }
  0x73   :  { %v4098_v34 = vcombine.high %v263_v27, %v271_v28 }
  0x75   :  { %1699 = vmatpush1.bf16.msra.mxu0 %v3985_v30  ;;  %1740 = vmatpush1.bf16.msra.mxu1 %v3987_v31  ;;  %v4116_v30 = vcombine.high %v280_v22, %v288_v23  ;;  %v272_v31 = vld [vmem:[#allocation2 + $0x658] sm:$0xff]  ;;  %v161_v23 = vld [vmem:[#allocation2 + $0x2e0] sm:$0xff] }
  0x76   :  { %1700 = vmatprep.subr.bf16.mxu0 %v3970_v32  ;;  %1741 = vmatprep.subr.bf16.mxu1 %v3972_v36  ;;  %v4113_v32 = vcombine.low %v279_v20, %v287_v21  ;;  %v255_v36 = vld [vmem:[#allocation2 + $0x5d0] sm:$0xff]  ;;  %v4099_v41 = vcombine.low %v264_v29, %v272_v31 }
  0x77   :  { %v4082_v42 = vcombine.high %v247_v35, %v255_v36 }
  0x79   :  { %1701 = vmatpush1.bf16.msra.mxu0 %v3969_v38  ;;  %1742 = vmatpush1.bf16.msra.mxu1 %v3971_v39  ;;  %v4100_v38 = vcombine.high %v264_v29, %v272_v31  ;;  %v256_v39 = vld [vmem:[#allocation2 + $0x5d8] sm:$0xff]  ;;  %v145_v31 = vld [vmem:[#allocation2 + $0x260] sm:$0xff] }
  0x7a   :  { %1702 = vmatprep.subr.bf16.mxu0 %v3954_v40  ;;  %1743 = vmatprep.subr.bf16.mxu1 %v3956_v44  ;;  %v4097_v40 = vcombine.low %v263_v27, %v271_v28  ;;  %v239_v44 = vld [vmem:[#allocation2 + $0x550] sm:$0xff]  ;;  %v4083_v49 = vcombine.low %v248_v37, %v256_v39 }
  0x7b   :  { %v4066_v50 = vcombine.high %v231_v43, %v239_v44 }
  0x7d   :  { %1703 = vmatpush1.bf16.msra.mxu0 %v3953_v46  ;;  %1744 = vmatpush1.bf16.msra.mxu1 %v3955_v47  ;;  %v4084_v46 = vcombine.high %v248_v37, %v256_v39  ;;  %v240_v47 = vld [vmem:[#allocation2 + $0x558] sm:$0xff]  ;;  %v129_v39 = vld [vmem:[#allocation2 + $0x1e0] sm:$0xff] }
  0x7e   :  { %1704 = vmatprep.subr.bf16.mxu0 %v3938_v48  ;;  %1745 = vmatprep.subr.bf16.mxu1 %v3940_v52  ;;  %v4081_v48 = vcombine.low %v247_v35, %v255_v36  ;;  %v223_v52 = vld [vmem:[#allocation2 + $0x4d0] sm:$0xff]  ;;  %v4067_v59 = vcombine.low %v232_v45, %v240_v47 }
  0x7f   :  { %v4050_v60 = vcombine.high %v215_v51, %v223_v52 }
  0x81   :  { %1705 = vmatpush1.bf16.msra.mxu0 %v3937_v55  ;;  %1746 = vmatpush1.bf16.msra.mxu1 %v3939_v56  ;;  %v4068_v55 = vcombine.high %v232_v45, %v240_v47  ;;  %v224_v56 = vld [vmem:[#allocation2 + $0x4d8] sm:$0xff]  ;;  %v105_v45 = vld [vmem:[#allocation2 + $0x120] sm:$0xff]  ;;  %v106_v47 = vld [vmem:[#allocation2 + $0x128] sm:$0xff] }
  0x82   :  { %1706 = vmatprep.subr.bf16.mxu0 %v3922_v58  ;;  %1747 = vmatprep.subr.bf16.mxu1 %v3924_v62  ;;  %v4065_v58 = vcombine.low %v231_v43, %v239_v44  ;;  %v207_v62 = vld [vmem:[#allocation2 + $0x450] sm:$0xff]  ;;  %v4051_v3 = vcombine.low %v216_v54, %v224_v56 }
  0x83   :  { %v4034_v4 = vcombine.high %v199_v61, %v207_v62 }
  0x85   :  { %1707 = vmatpush1.bf16.msra.mxu0 %v3921_v0  ;;  %1748 = vmatpush1.bf16.msra.mxu1 %v3923_v1  ;;  %v4052_v0 = vcombine.high %v216_v54, %v224_v56  ;;  %v208_v1 = vld [vmem:[#allocation2 + $0x458] sm:$0xff]  ;;  %v89_v54 = vld [vmem:[#allocation2 + $0xa0] sm:$0xff]  ;;  %v90_v56 = vld [vmem:[#allocation2 + $0xa8] sm:$0xff] }
  0x86   :  { %1708 = vmatprep.subr.bf16.mxu0 %v3906_v2  ;;  %1749 = vmatprep.subr.bf16.mxu1 %v3908_v6  ;;  %v4049_v2 = vcombine.low %v215_v51, %v223_v52  ;;  %v193_v6 = vld [vmem:[#allocation2 + $0x3e0] sm:$0xff]  ;;  %v4035_v11 = vcombine.low %v200_v63, %v208_v1 }
  0x87   :  { %v4022_v13 = vcombine.high %v185_v5, %v193_v6 }
  0x89   :  { %1709 = vmatpush1.bf16.msra.mxu0 %v3905_v8  ;;  %1750 = vmatpush1.bf16.msra.mxu1 %v3907_v9  ;;  %v4036_v8 = vcombine.high %v200_v63, %v208_v1  ;;  %v194_v9 = vld [vmem:[#allocation2 + $0x3e8] sm:$0xff]  ;;  %v73_v63 = vld [vmem:[#allocation2 + $0x20] sm:$0xff] }
  0x8a   :  { %1710 = vmatprep.subr.bf16.mxu0 %v4146_v10  ;;  %1751 = vmatprep.subr.bf16.mxu1 %v4148_v15  ;;  %v4033_v10 = vcombine.low %v199_v61, %v207_v62  ;;  %v177_v15 = vld [vmem:[#allocation2 + $0x360] sm:$0xff]  ;;  %v4023_v20 = vcombine.low %v186_v7, %v194_v9  ;;  %v74_v1 = vld [vmem:[#allocation2 + $0x28] sm:$0xff] }
  0x8b   :  { %v4006_v21 = vcombine.high %v169_v14, %v177_v15 }
  0x8d   :  { %1711 = vmatpush2.bf16.msra.mxu0 %v4145_v17  ;;  %1752 = vmatpush2.bf16.msra.mxu1 %v4147_v18  ;;  %v4024_v17 = vcombine.high %v186_v7, %v194_v9  ;;  %v178_v18 = vld [vmem:[#allocation2 + $0x368] sm:$0xff]  ;;  %v313_v7 = vld [vmem:[#allocation2 + $0x7a0] sm:$0xff] }
  0x8e   :  { %1712 = vmatprep.subr.bf16.mxu0 %v4130_v19  ;;  %1753 = vmatprep.subr.bf16.mxu1 %v4132_v53  ;;  %v4021_v19 = vcombine.low %v185_v5, %v193_v6  ;;  %v4008_v22 = vcombine.high %v170_v16, %v178_v18  ;;  %v153_v53 = vld [vmem:[#allocation2 + $0x2a0] sm:$0xff]  ;;  %v4007_v27 = vcombine.low %v170_v16, %v178_v18  ;;  %v314_v9 = vld [vmem:[#allocation2 + $0x7a8] sm:$0xff] }
  0x8f   :  { %v3990_v28 = vcombine.high %v153_v53, %v161_v23  ;;  %v297_v16 = vld [vmem:[#allocation2 + $0x720] sm:$0xff]  ;;  %v298_v18 = vld [vmem:[#allocation2 + $0x728] sm:$0xff] }
  0x91   :  { %1713 = vmatpush2.bf16.msra.mxu0 %v4129_v24  ;;  %1754 = vmatpush2.bf16.msra.mxu1 %v4131_v25  ;;  %v154_v24 = vld [vmem:[#allocation2 + $0x2a8] sm:$0xff] }
  0x92   :  { %1714 = vmatprep.subr.bf16.mxu0 %v4114_v26  ;;  %1755 = vmatprep.subr.bf16.mxu1 %v4116_v30  ;;  %v162_v25 = vld [vmem:[#allocation2 + $0x2e8] sm:$0xff]  ;;  %v4005_v26 = vcombine.low %v169_v14, %v177_v15  ;;  %v137_v30 = vld [vmem:[#allocation2 + $0x220] sm:$0xff] }
  0x93   :  { %v3992_v29 = vcombine.high %v154_v24, %v162_v25  ;;  %v3991_v35 = vcombine.low %v154_v24, %v162_v25  ;;  %v3974_v36 = vcombine.high %v137_v30, %v145_v31  ;;  %v289_v24 = vld [vmem:[#allocation2 + $0x6e0] sm:$0xff]  ;;  %v282_v25 = vld [vmem:[#allocation2 + $0x6a8] sm:$0xff] }
  0x95   :  { %1715 = vmatpush2.bf16.msra.mxu0 %v4113_v32  ;;  %1756 = vmatpush2.bf16.msra.mxu1 %v4115_v33  ;;  %v138_v32 = vld [vmem:[#allocation2 + $0x228] sm:$0xff] }
  0x96   :  { %1716 = vmatprep.subr.bf16.mxu0 %v4098_v34  ;;  %1757 = vmatprep.subr.bf16.mxu1 %v4100_v38  ;;  %v146_v33 = vld [vmem:[#allocation2 + $0x268] sm:$0xff]  ;;  %v3989_v34 = vcombine.low %v153_v53, %v161_v23  ;;  %v121_v38 = vld [vmem:[#allocation2 + $0x1a0] sm:$0xff] }
  0x97   :  { %v3976_v37 = vcombine.high %v138_v32, %v146_v33  ;;  %v3975_v43 = vcombine.low %v138_v32, %v146_v33  ;;  %v3958_v44 = vcombine.high %v121_v38, %v129_v39  ;;  %v281_v23 = vld [vmem:[#allocation2 + $0x6a0] sm:$0xff]  ;;  %v266_v33 = vld [vmem:[#allocation2 + $0x628] sm:$0xff] }
  0x98   :  { %v273_v32 = vld [vmem:[#allocation2 + $0x660] sm:$0xff] }
  0x99   :  { %1717 = vmatpush2.bf16.msra.mxu0 %v4097_v40  ;;  %1758 = vmatpush2.bf16.msra.mxu1 %v4099_v41  ;;  %v122_v40 = vld [vmem:[#allocation2 + $0x1a8] sm:$0xff] }
  0x9a   :  { %1718 = vmatprep.subr.bf16.mxu0 %v4082_v42  ;;  %1759 = vmatprep.subr.bf16.mxu1 %v4084_v46  ;;  %v130_v41 = vld [vmem:[#allocation2 + $0x1e8] sm:$0xff]  ;;  %v3973_v42 = vcombine.low %v137_v30, %v145_v31  ;;  %v113_v46 = vld [vmem:[#allocation2 + $0x160] sm:$0xff]  ;;  %v4118_v30 = vcombine.high %v281_v23, %v289_v24 }
  0x9b   :  { %v3959_v51 = vcombine.low %v122_v40, %v130_v41  ;;  %v3942_v52 = vcombine.high %v105_v45, %v113_v46  ;;  %v265_v31 = vld [vmem:[#allocation2 + $0x620] sm:$0xff] }
  0x9d   :  { %1719 = vmatpush2.bf16.msra.mxu0 %v4081_v48  ;;  %1760 = vmatpush2.bf16.msra.mxu1 %v4083_v49  ;;  %v3960_v48 = vcombine.high %v122_v40, %v130_v41  ;;  %v114_v49 = vld [vmem:[#allocation2 + $0x168] sm:$0xff]  ;;  %v257_v40 = vld [vmem:[#allocation2 + $0x5e0] sm:$0xff] }
  0x9e   :  { %1720 = vmatprep.subr.bf16.mxu0 %v4066_v50  ;;  %1761 = vmatprep.subr.bf16.mxu1 %v4068_v55  ;;  %v3957_v50 = vcombine.low %v121_v38, %v129_v39  ;;  %v97_v55 = vld [vmem:[#allocation2 + $0xe0] sm:$0xff]  ;;  %v3943_v61 = vcombine.low %v106_v47, %v114_v49  ;;  %v4102_v38 = vcombine.high %v265_v31, %v273_v32  ;;  %v250_v41 = vld [vmem:[#allocation2 + $0x5a8] sm:$0xff] }
  0x9f   :  { %v3926_v62 = vcombine.high %v89_v54, %v97_v55  ;;  %v249_v39 = vld [vmem:[#allocation2 + $0x5a0] sm:$0xff] }
  0xa1   :  { %1721 = vmatpush2.bf16.msra.mxu0 %v4065_v58  ;;  %1762 = vmatpush2.bf16.msra.mxu1 %v4067_v59  ;;  %v3944_v58 = vcombine.high %v106_v47, %v114_v49  ;;  %v98_v59 = vld [vmem:[#allocation2 + $0xe8] sm:$0xff]  ;;  %v233_v47 = vld [vmem:[#allocation2 + $0x520] sm:$0xff] }
  0xa2   :  { %1722 = vmatprep.subr.bf16.mxu0 %v4050_v60  ;;  %1763 = vmatprep.subr.bf16.mxu1 %v4052_v0  ;;  %v3941_v60 = vcombine.low %v105_v45, %v113_v46  ;;  %v81_v0 = vld [vmem:[#allocation2 + $0x60] sm:$0xff]  ;;  %v3927_v5 = vcombine.low %v90_v56, %v98_v59  ;;  %v4086_v46 = vcombine.high %v249_v39, %v257_v40  ;;  %v234_v49 = vld [vmem:[#allocation2 + $0x528] sm:$0xff] }
  0xa3   :  { %v3910_v6 = vcombine.high %v73_v63, %v81_v0 }
  0xa5   :  { %1723 = vmatpush2.bf16.msra.mxu0 %v4049_v2  ;;  %1764 = vmatpush2.bf16.msra.mxu1 %v4051_v3  ;;  %v3928_v2 = vcombine.high %v90_v56, %v98_v59  ;;  %v82_v3 = vld [vmem:[#allocation2 + $0x68] sm:$0xff]  ;;  %v217_v56 = vld [vmem:[#allocation2 + $0x4a0] sm:$0xff] }
  0xa6   :  { %1724 = vmatprep.subr.bf16.mxu0 %v4034_v4  ;;  %1765 = vmatprep.subr.bf16.mxu1 %v4036_v8  ;;  %v3925_v4 = vcombine.low %v89_v54, %v97_v55  ;;  %v321_v8 = vld [vmem:[#allocation2 + $0x7e0] sm:$0xff]  ;;  %v3911_v14 = vcombine.low %v74_v1, %v82_v3  ;;  %v218_v59 = vld [vmem:[#allocation2 + $0x4a8] sm:$0xff] }
  0xa7   :  { %v4150_v15 = vcombine.high %v313_v7, %v321_v8 }
  0xa9   :  { %1725 = vmatpush2.bf16.msra.mxu0 %v4033_v10  ;;  %1766 = vmatpush2.bf16.msra.mxu1 %v4035_v11  ;;  %v3912_v10 = vcombine.high %v74_v1, %v82_v3  ;;  %v322_v11 = vld [vmem:[#allocation2 + $0x7e8] sm:$0xff]  ;;  %v201_v1 = vld [vmem:[#allocation2 + $0x420] sm:$0xff] }
  0xaa   :  { %1776 = vmatprep.subr.bf16.mxu0 %v4022_v13  ;;  %1817 = vmatprep.subr.bf16.mxu1 %v4024_v17  ;;  %v3909_v13 = vcombine.low %v73_v63, %v81_v0  ;;  %v305_v17 = vld [vmem:[#allocation2 + $0x760] sm:$0xff]  ;;  %v202_v3 = vld [vmem:[#allocation2 + $0x428] sm:$0xff] }
  0xab   :  { %v4134_v53 = vcombine.high %v297_v16, %v305_v17 }
  0xac   :  { %1727 = vmatmul.mubr.bf16.vlgmr.msra.gmra.mxu0 %v4920_v12  ;;  %1768 = vmatmul.mubr.bf16.vlgmr.msra.gmra.mxu1 %v4920_v12 }
  0xad   :  { %1777 = vmatpush1.bf16.msra.mxu0 %v4021_v19  ;;  %1818 = vmatpush1.bf16.msra.mxu1 %v4023_v20  ;;  %v4152_v19 = vcombine.high %v314_v9, %v322_v11  ;;  %v306_v20 = vld [vmem:[#allocation2 + $0x768] sm:$0xff] }
  0xae   :  { %1778 = vmatprep.subr.bf16.mxu0 %v4006_v21  ;;  %1819 = vmatprep.subr.bf16.mxu1 %v4008_v22  ;;  %v4149_v21 = vcombine.low %v313_v7, %v321_v8  ;;  %v4151_v22 = vcombine.low %v314_v9, %v322_v11  ;;  %v187_v9 = vld [vmem:[#allocation2 + $0x3b0] sm:$0xff] }
  0xaf   :  { %1808 = vmatprep.mubr.bf16.mxu0 %v4914_v57  ;;  %1849 = vmatprep.mubr.bf16.mxu1 %v4914_v57 }
  0xb1   :  { %1779 = vmatpush1.bf16.msra.mxu0 %v4005_v26  ;;  %1820 = vmatpush1.bf16.msra.mxu1 %v4007_v27  ;;  %v4136_v26 = vcombine.high %v298_v18, %v306_v20  ;;  %v290_v27 = vld [vmem:[#allocation2 + $0x6e8] sm:$0xff] }
  0xb2   :  { %1780 = vmatprep.subr.bf16.mxu0 %v3990_v28  ;;  %1821 = vmatprep.subr.bf16.mxu1 %v3992_v29  ;;  %v4133_v28 = vcombine.low %v297_v16, %v305_v17  ;;  %v4135_v29 = vcombine.low %v298_v18, %v306_v20  ;;  %v171_v18 = vld [vmem:[#allocation2 + $0x330] sm:$0xff]  ;;  %v172_v20 = vld [vmem:[#allocation2 + $0x338] sm:$0xff] }
  0xb5   :  { %1781 = vmatpush1.bf16.msra.mxu0 %v3989_v34  ;;  %1822 = vmatpush1.bf16.msra.mxu1 %v3991_v35  ;;  %v4120_v34 = vcombine.high %v282_v25, %v290_v27  ;;  %v274_v35 = vld [vmem:[#allocation2 + $0x668] sm:$0xff] }
  0xb6   :  { %1782 = vmatprep.subr.bf16.mxu0 %v3974_v36  ;;  %1823 = vmatprep.subr.bf16.mxu1 %v3976_v37  ;;  %v4117_v36 = vcombine.low %v281_v23, %v289_v24  ;;  %v4119_v37 = vcombine.low %v282_v25, %v290_v27  ;;  %v4103_v45 = vcombine.low %v266_v33, %v274_v35  ;;  %v163_v27 = vld [vmem:[#allocation2 + $0x2f0] sm:$0xff] }
  0xb9   :  { %1783 = vmatpush1.bf16.msra.mxu0 %v3973_v42  ;;  %1824 = vmatpush1.bf16.msra.mxu1 %v3975_v43  ;;  %v4104_v42 = vcombine.high %v266_v33, %v274_v35  ;;  %v258_v43 = vld [vmem:[#allocation2 + $0x5e8] sm:$0xff]  ;;  %v147_v35 = vld [vmem:[#allocation2 + $0x270] sm:$0xff] }
  0xba   :  { %1784 = vmatprep.subr.bf16.mxu0 %v3958_v44  ;;  %1825 = vmatprep.subr.bf16.mxu1 %v3960_v48  ;;  %v4101_v44 = vcombine.low %v265_v31, %v273_v32  ;;  %v241_v48 = vld [vmem:[#allocation2 + $0x560] sm:$0xff]  ;;  %v4087_v54 = vcombine.low %v250_v41, %v258_v43 }
  0xbb   :  { %v4070_v55 = vcombine.high %v233_v47, %v241_v48 }
  0xbd   :  { %1785 = vmatpush1.bf16.msra.mxu0 %v3957_v50  ;;  %1826 = vmatpush1.bf16.msra.mxu1 %v3959_v51  ;;  %v4088_v50 = vcombine.high %v250_v41, %v258_v43  ;;  %v242_v51 = vld [vmem:[#allocation2 + $0x568] sm:$0xff]  ;;  %v131_v43 = vld [vmem:[#allocation2 + $0x1f0] sm:$0xff] }
  0xbe   :  { %1786 = vmatprep.subr.bf16.mxu0 %v3942_v52  ;;  %1827 = vmatprep.subr.bf16.mxu1 %v3944_v58  ;;  %v4085_v52 = vcombine.low %v249_v39, %v257_v40  ;;  %v225_v58 = vld [vmem:[#allocation2 + $0x4e0] sm:$0xff]  ;;  %v4071_v63 = vcombine.low %v234_v49, %v242_v51 }
  0xbf   :  { %v4054_v0 = vcombine.high %v217_v56, %v225_v58 }
  0xc1   :  { %1787 = vmatpush1.bf16.msra.mxu0 %v3941_v60  ;;  %1828 = vmatpush1.bf16.msra.mxu1 %v3943_v61  ;;  %v4072_v60 = vcombine.high %v234_v49, %v242_v51  ;;  %v226_v61 = vld [vmem:[#allocation2 + $0x4e8] sm:$0xff]  ;;  %v107_v49 = vld [vmem:[#allocation2 + $0x130] sm:$0xff]  ;;  %v108_v51 = vld [vmem:[#allocation2 + $0x138] sm:$0xff] }
  0xc2   :  { %1788 = vmatprep.subr.bf16.mxu0 %v3926_v62  ;;  %1829 = vmatprep.subr.bf16.mxu1 %v3928_v2  ;;  %v4069_v62 = vcombine.low %v233_v47, %v241_v48  ;;  %v209_v2 = vld [vmem:[#allocation2 + $0x460] sm:$0xff]  ;;  %v4055_v7 = vcombine.low %v218_v59, %v226_v61 }
  0xc3   :  { %v4038_v8 = vcombine.high %v201_v1, %v209_v2 }
  0xc5   :  { %1789 = vmatpush1.bf16.msra.mxu0 %v3925_v4  ;;  %1830 = vmatpush1.bf16.msra.mxu1 %v3927_v5  ;;  %v4056_v4 = vcombine.high %v218_v59, %v226_v61  ;;  %v210_v5 = vld [vmem:[#allocation2 + $0x468] sm:$0xff]  ;;  %v91_v59 = vld [vmem:[#allocation2 + $0xb0] sm:$0xff]  ;;  %v92_v61 = vld [vmem:[#allocation2 + $0xb8] sm:$0xff] }
  0xc6   :  { %1790 = vmatprep.subr.bf16.mxu0 %v3910_v6  ;;  %1831 = vmatprep.subr.bf16.mxu1 %v3912_v10  ;;  %v4053_v6 = vcombine.low %v217_v56, %v225_v58  ;;  %v195_v10 = vld [vmem:[#allocation2 + $0x3f0] sm:$0xff]  ;;  %v4040_v11 = vcombine.high %v202_v3, %v210_v5  ;;  %v4039_v16 = vcombine.low %v202_v3, %v210_v5  ;;  %v76_v5 = vld [vmem:[#allocation2 + $0x38] sm:$0xff] }
  0xc7   :  { %v4026_v17 = vcombine.high %v187_v9, %v195_v10  ;;  %v75_v3 = vld [vmem:[#allocation2 + $0x30] sm:$0xff] }
  0xc9   :  { %1791 = vmatpush1.bf16.msra.mxu0 %v3909_v13  ;;  %1832 = vmatpush1.bf16.msra.mxu1 %v3911_v14  ;;  %v188_v13 = vld [vmem:[#allocation2 + $0x3b8] sm:$0xff] }
  0xca   :  { %1792 = vmatprep.subr.bf16.mxu0 %v4150_v15  ;;  %1833 = vmatprep.subr.bf16.mxu1 %v4152_v19  ;;  %v196_v14 = vld [vmem:[#allocation2 + $0x3f8] sm:$0xff]  ;;  %v4037_v15 = vcombine.low %v201_v1, %v209_v2  ;;  %v179_v19 = vld [vmem:[#allocation2 + $0x370] sm:$0xff] }
  0xcb   :  { %v4027_v23 = vcombine.low %v188_v13, %v196_v14  ;;  %v4010_v24 = vcombine.high %v171_v18, %v179_v19 }
  0xcd   :  { %1793 = vmatpush2.bf16.msra.mxu0 %v4149_v21  ;;  %1834 = vmatpush2.bf16.msra.mxu1 %v4151_v22  ;;  %v4028_v21 = vcombine.high %v188_v13, %v196_v14  ;;  %v180_v22 = vld [vmem:[#allocation2 + $0x378] sm:$0xff]  ;;  %v323_v13 = vld [vmem:[#allocation2 + $0x7f0] sm:$0xff] }
  0xce   :  { %1794 = vmatprep.subr.bf16.mxu0 %v4134_v53  ;;  %1835 = vmatprep.subr.bf16.mxu1 %v4136_v26  ;;  %v4025_v53 = vcombine.low %v187_v9, %v195_v10  ;;  %v4012_v25 = vcombine.high %v172_v20, %v180_v22  ;;  %v155_v26 = vld [vmem:[#allocation2 + $0x2b0] sm:$0xff]  ;;  %v4011_v31 = vcombine.low %v172_v20, %v180_v22  ;;  %v316_v14 = vld [vmem:[#allocation2 + $0x7b8] sm:$0xff] }
  0xcf   :  { %v3994_v32 = vcombine.high %v155_v26, %v163_v27  ;;  %v299_v20 = vld [vmem:[#allocation2 + $0x730] sm:$0xff]  ;;  %v300_v22 = vld [vmem:[#allocation2 + $0x738] sm:$0xff] }
  0xd1   :  { %1795 = vmatpush2.bf16.msra.mxu0 %v4133_v28  ;;  %1836 = vmatpush2.bf16.msra.mxu1 %v4135_v29  ;;  %v156_v28 = vld [vmem:[#allocation2 + $0x2b8] sm:$0xff] }
  0xd2   :  { %1796 = vmatprep.subr.bf16.mxu0 %v4118_v30  ;;  %1837 = vmatprep.subr.bf16.mxu1 %v4120_v34  ;;  %v164_v29 = vld [vmem:[#allocation2 + $0x2f8] sm:$0xff]  ;;  %v4009_v30 = vcombine.low %v171_v18, %v179_v19  ;;  %v139_v34 = vld [vmem:[#allocation2 + $0x230] sm:$0xff] }
  0xd3   :  { %v3996_v33 = vcombine.high %v156_v28, %v164_v29  ;;  %v3995_v39 = vcombine.low %v156_v28, %v164_v29  ;;  %v3978_v40 = vcombine.high %v139_v34, %v147_v35  ;;  %v291_v28 = vld [vmem:[#allocation2 + $0x6f0] sm:$0xff]  ;;  %v284_v29 = vld [vmem:[#allocation2 + $0x6b8] sm:$0xff] }
  0xd5   :  { %1797 = vmatpush2.bf16.msra.mxu0 %v4117_v36  ;;  %1838 = vmatpush2.bf16.msra.mxu1 %v4119_v37  ;;  %v140_v36 = vld [vmem:[#allocation2 + $0x238] sm:$0xff] }
  0xd6   :  { %1798 = vmatprep.subr.bf16.mxu0 %v4102_v38  ;;  %1839 = vmatprep.subr.bf16.mxu1 %v4104_v42  ;;  %v148_v37 = vld [vmem:[#allocation2 + $0x278] sm:$0xff]  ;;  %v3993_v38 = vcombine.low %v155_v26, %v163_v27  ;;  %v123_v42 = vld [vmem:[#allocation2 + $0x1b0] sm:$0xff] }
  0xd7   :  { %v3980_v41 = vcombine.high %v140_v36, %v148_v37  ;;  %v3979_v47 = vcombine.low %v140_v36, %v148_v37  ;;  %v3962_v48 = vcombine.high %v123_v42, %v131_v43  ;;  %v283_v27 = vld [vmem:[#allocation2 + $0x6b0] sm:$0xff]  ;;  %v268_v37 = vld [vmem:[#allocation2 + $0x638] sm:$0xff] }
  0xd8   :  { %v275_v36 = vld [vmem:[#allocation2 + $0x670] sm:$0xff] }
  0xd9   :  { %1799 = vmatpush2.bf16.msra.mxu0 %v4101_v44  ;;  %1840 = vmatpush2.bf16.msra.mxu1 %v4103_v45  ;;  %v124_v44 = vld [vmem:[#allocation2 + $0x1b8] sm:$0xff] }
  0xda   :  { %1800 = vmatprep.subr.bf16.mxu0 %v4086_v46  ;;  %1841 = vmatprep.subr.bf16.mxu1 %v4088_v50  ;;  %v132_v45 = vld [vmem:[#allocation2 + $0x1f8] sm:$0xff]  ;;  %v3977_v46 = vcombine.low %v139_v34, %v147_v35  ;;  %v115_v50 = vld [vmem:[#allocation2 + $0x170] sm:$0xff] }
  0xdb   :  { %v3946_v56 = vcombine.high %v107_v49, %v115_v50  ;;  %v267_v35 = vld [vmem:[#allocation2 + $0x630] sm:$0xff] }
  0xdd   :  { %1801 = vmatpush2.bf16.msra.mxu0 %v4085_v52  ;;  %1842 = vmatpush2.bf16.msra.mxu1 %v4087_v54  ;;  %v116_v52 = vld [vmem:[#allocation2 + $0x178] sm:$0xff]  ;;  %v3961_v54 = vcombine.low %v123_v42, %v131_v43  ;;  %v251_v43 = vld [vmem:[#allocation2 + $0x5b0] sm:$0xff] }
  0xde   :  { %1802 = vmatprep.subr.bf16.mxu0 %v4070_v55  ;;  %1843 = vmatprep.subr.bf16.mxu1 %v4072_v60  ;;  %v3963_v55 = vcombine.low %v124_v44, %v132_v45  ;;  %v3948_v58 = vcombine.high %v108_v51, %v116_v52  ;;  %v99_v60 = vld [vmem:[#allocation2 + $0xf0] sm:$0xff] }
  0xdf   :  { %v3930_v1 = vcombine.high %v91_v59, %v99_v60 }
  0xe1   :  { %1803 = vmatpush2.bf16.msra.mxu0 %v4069_v62  ;;  %1844 = vmatpush2.bf16.msra.mxu1 %v4071_v63  ;;  %v100_v62 = vld [vmem:[#allocation2 + $0xf8] sm:$0xff]  ;;  %v3945_v63 = vcombine.low %v107_v49, %v115_v50  ;;  %v235_v50 = vld [vmem:[#allocation2 + $0x530] sm:$0xff] }
  0xe2   :  { %1804 = vmatprep.subr.bf16.mxu0 %v4054_v0  ;;  %1845 = vmatprep.subr.bf16.mxu1 %v4056_v4  ;;  %v3947_v0 = vcombine.low %v108_v51, %v116_v52  ;;  %v3932_v2 = vcombine.high %v92_v61, %v100_v62  ;;  %v83_v4 = vld [vmem:[#allocation2 + $0x70] sm:$0xff]  ;;  %v236_v52 = vld [vmem:[#allocation2 + $0x538] sm:$0xff] }
  0xe3   :  { %v3914_v9 = vcombine.high %v75_v3, %v83_v4  ;;  %v243_v51 = vld [vmem:[#allocation2 + $0x570] sm:$0xff] }
  0xe5   :  { %1805 = vmatpush2.bf16.msra.mxu0 %v4053_v6  ;;  %1846 = vmatpush2.bf16.msra.mxu1 %v4055_v7  ;;  %v84_v6 = vld [vmem:[#allocation2 + $0x78] sm:$0xff]  ;;  %v3929_v7 = vcombine.low %v91_v59, %v99_v60  ;;  %v219_v60 = vld [vmem:[#allocation2 + $0x4b0] sm:$0xff] }
  0xe6   :  { %1806 = vmatprep.subr.bf16.mxu0 %v4038_v8  ;;  %1847 = vmatprep.subr.bf16.mxu1 %v4040_v11  ;;  %v3931_v8 = vcombine.low %v92_v61, %v100_v62  ;;  %v3916_v10 = vcombine.high %v76_v5, %v84_v6  ;;  %v315_v11 = vld [vmem:[#allocation2 + $0x7b0] sm:$0xff]  ;;  %v220_v62 = vld [vmem:[#allocation2 + $0x4b8] sm:$0xff] }
  0xe7   :  { %v4154_v18 = vcombine.high %v315_v11, %v323_v13  ;;  %v227_v61 = vld [vmem:[#allocation2 + $0x4f0] sm:$0xff] }
  0xe9   :  { %1807 = vmatpush2.bf16.msra.mxu0 %v4037_v15  ;;  %1848 = vmatpush2.bf16.msra.mxu1 %v4039_v16  ;;  %v324_v15 = vld [vmem:[#allocation2 + $0x7f8] sm:$0xff]  ;;  %v3913_v16 = vcombine.low %v75_v3, %v83_v4  ;;  %v203_v4 = vld [vmem:[#allocation2 + $0x430] sm:$0xff] }
  0xea   :  { %1858 = vmatprep.subr.bf16.mxu0 %v4026_v17  ;;  %1899 = vmatprep.subr.bf16.mxu1 %v4028_v21  ;;  %v3915_v17 = vcombine.low %v76_v5, %v84_v6  ;;  %v4156_v19 = vcombine.high %v316_v14, %v324_v15  ;;  %v307_v21 = vld [vmem:[#allocation2 + $0x770] sm:$0xff]  ;;  %v1944_v6 = vlaneseq }
  0xeb   :  { %v211_v5 = vld [vmem:[#allocation2 + $0x470] sm:$0xff] }
  0xec   :  { %1809 = vmatmul.mubr.bf16.vlgmr.msra.gmra.mxu0 %v4920_v12  ;;  %1850 = vmatmul.mubr.bf16.vlgmr.msra.gmra.mxu1 %v4920_v12 }
  0xed   :  { %1859 = vmatpush1.bf16.msra.mxu0 %v4025_v53  ;;  %1900 = vmatpush1.bf16.msra.mxu1 %v4027_v23  ;;  %v308_v53 = vld [vmem:[#allocation2 + $0x778] sm:$0xff]  ;;  %v4153_v23 = vcombine.low %v315_v11, %v323_v13  ;;  %v4042_v11 = vcombine.high %v203_v4, %v211_v5 }
  0xee   :  { %1860 = vmatprep.subr.bf16.mxu0 %v4010_v24  ;;  %1901 = vmatprep.subr.bf16.mxu1 %v4012_v25  ;;  %v4155_v24 = vcombine.low %v316_v14, %v324_v15  ;;  %v4138_v25 = vcombine.high %v299_v20, %v307_v21  ;;  %v4140_v26 = vcombine.high %v300_v22, %v308_v53  ;;  %v4934_v14 = vshrl.u32 %v1944_v6, 7  ;;  %v4481_v6 = vld [vmem:[#allocation4 + $0x1f0] ss:$8 sps:$4 sm:$0xff]  }
  0xef   :  { %1890 = vmatprep.mubr.bf16.mxu0 %v4914_v57  ;;  %1931 = vmatprep.mubr.bf16.mxu1 %v4914_v57  ;;  %v3964_v57 = vcombine.high %v124_v44, %v132_v45  ;;  %v259_v44 = vld [vmem:[#allocation2 + $0x5f0] sm:$0xff]  ;;  %v252_v45 = vld [vmem:[#allocation2 + $0x5b8] sm:$0xff]  ;;  %v4041_v15 = vcombine.low %v203_v4, %v211_v5 }
  0xf0   :  { %v4483_v4 = vld [vmem:[#allocation4 + $0x1f4] ss:$8 sps:$4 sm:$0xff]   ;;  %v4478_v5 = vld [vmem:[#allocation4 + $0xf0] ss:$8 sps:$4 sm:$0xff]  }
  0xf1   :  { %1861 = vmatpush1.bf16.msra.mxu0 %v4009_v30  ;;  %1902 = vmatpush1.bf16.msra.mxu1 %v4011_v31  ;;  %v292_v30 = vld [vmem:[#allocation2 + $0x6f8] sm:$0xff]  ;;  %v4137_v31 = vcombine.low %v299_v20, %v307_v21  ;;  %v4942_v20 = vld [vmem:[%s5034_s2] sm:$0xff]  ;;  %v1958_v21 = vsub.s32 3, %v4934_v14 }
  0xf2   :  { %1862 = vmatprep.subr.bf16.mxu0 %v3994_v32  ;;  %1903 = vmatprep.subr.bf16.mxu1 %v3996_v33  ;;  %v4139_v32 = vcombine.low %v300_v22, %v308_v53  ;;  %v4122_v33 = vcombine.high %v283_v27, %v291_v28  ;;  %v4124_v34 = vcombine.high %v284_v29, %v292_v30  ;;  %v4430_v22 = vld [vmem:[#allocation4 + $0x70] ss:$8 sps:$4 sm:$0xff]  }
  0xf3   :  { %v4433_v53 = vld [vmem:[#allocation4 + $0x170] ss:$8 sps:$4 sm:$0xff]  }
  0xf5   :  { %1863 = vmatpush1.bf16.msra.mxu0 %v3993_v38  ;;  %1904 = vmatpush1.bf16.msra.mxu1 %v3995_v39  ;;  %v276_v38 = vld [vmem:[#allocation2 + $0x678] sm:$0xff]  ;;  %v4121_v39 = vcombine.low %v283_v27, %v291_v28  ;;  %v1959_v27 = vrot.slane %v4942_v20, %v1958_v21  ;;  %v4436_v28 = vld [vmem:[#allocation4 + $0x60] ss:$8 sps:$4 sm:$0xff]  }
  0xf6   :  { %1864 = vmatprep.subr.bf16.mxu0 %v3978_v40  ;;  %1905 = vmatprep.subr.bf16.mxu1 %v3980_v41  ;;  %v4123_v40 = vcombine.low %v284_v29, %v292_v30  ;;  %v4106_v41 = vcombine.high %v267_v35, %v275_v36  ;;  %v4108_v42 = vcombine.high %v268_v37, %v276_v38 }
  0xf9   :  { %1865 = vmatpush1.bf16.msra.mxu0 %v3977_v46  ;;  %1906 = vmatpush1.bf16.msra.mxu1 %v3979_v47  ;;  %v260_v46 = vld [vmem:[#allocation2 + $0x5f8] sm:$0xff]  ;;  %v4105_v47 = vcombine.low %v267_v35, %v275_v36 }
  0xfa   :  { %1866 = vmatprep.subr.bf16.mxu0 %v3962_v48  ;;  %1907 = vmatprep.subr.bf16.mxu1 %v3964_v57  ;;  %v4107_v48 = vcombine.low %v268_v37, %v276_v38  ;;  %v4090_v57 = vcombine.high %v251_v43, %v259_v44  ;;  %v4092_v49 = vcombine.high %v252_v45, %v260_v46 }
  0xfd   :  { %1867 = vmatpush1.bf16.msra.mxu0 %v3961_v54  ;;  %1908 = vmatpush1.bf16.msra.mxu1 %v3963_v55  ;;  %v244_v54 = vld [vmem:[#allocation2 + $0x578] sm:$0xff]  ;;  %v4089_v55 = vcombine.low %v251_v43, %v259_v44 }
  0xfe   :  { %1868 = vmatprep.subr.bf16.mxu0 %v3946_v56  ;;  %1909 = vmatprep.subr.bf16.mxu1 %v3948_v58  ;;  %v4091_v56 = vcombine.low %v252_v45, %v260_v46  ;;  %v4074_v58 = vcombine.high %v235_v50, %v243_v51  ;;  %v4076_v59 = vcombine.high %v236_v52, %v244_v54  ;;  %v4453_v45 = vld [vmem:[#allocation4 + $0x144] ss:$8 sps:$4 sm:$0xff]  }
 0x101   :  { %1869 = vmatpush1.bf16.msra.mxu0 %v3945_v63  ;;  %1910 = vmatpush1.bf16.msra.mxu1 %v3947_v0  ;;  %v228_v63 = vld [vmem:[#allocation2 + $0x4f8] sm:$0xff]  ;;  %v4073_v0 = vcombine.low %v235_v50, %v243_v51 }
 0x102   :  { %1870 = vmatprep.subr.bf16.mxu0 %v3930_v1  ;;  %1911 = vmatprep.subr.bf16.mxu1 %v3932_v2  ;;  %v4075_v1 = vcombine.low %v236_v52, %v244_v54  ;;  %v4058_v2 = vcombine.high %v219_v60, %v227_v61  ;;  %v4060_v3 = vcombine.high %v220_v62, %v228_v63  ;;  %v4459_v50 = vld [vmem:[#allocation4 + $0x134] ss:$8 sps:$4 sm:$0xff]   ;;  %v4454_v51 = vld [vmem:[#allocation4 + $0x30] ss:$8 sps:$4 sm:$0xff]   ;;  %v4462_v54 = vld [vmem:[#allocation4 + $0x24] ss:$8 sps:$4 sm:$0xff]  }
 0x103   :  { %v4457_v52 = vld [vmem:[#allocation4 + $0x130] ss:$8 sps:$4 sm:$0xff]  }
 0x105   :  { %1871 = vmatpush1.bf16.msra.mxu0 %v3929_v7  ;;  %1912 = vmatpush1.bf16.msra.mxu1 %v3931_v8  ;;  %v204_v7 = vld [vmem:[#allocation2 + $0x438] sm:$0xff] }
 0x106   :  { %1872 = vmatprep.subr.bf16.mxu0 %v3914_v9  ;;  %1913 = vmatprep.subr.bf16.mxu1 %v3916_v10  ;;  %v212_v8 = vld [vmem:[#allocation2 + $0x478] sm:$0xff]  ;;  %v4057_v9 = vcombine.low %v219_v60, %v227_v61  ;;  %v4059_v10 = vcombine.low %v220_v62, %v228_v63  ;;  %v4474_v63 = vld [vmem:[#allocation4 + $0x4] ss:$8 sps:$4 sm:$0xff]  }
 0x107   :  { %v4044_v13 = vcombine.high %v204_v7, %v212_v8  ;;  %v4471_v60 = vld [vmem:[#allocation4 + $0x114] ss:$8 sps:$4 sm:$0xff]   ;;  %v4466_v61 = vld [vmem:[#allocation4 + $0x10] ss:$8 sps:$4 sm:$0xff]  }
 0x108   :  { %v4469_v62 = vld [vmem:[#allocation4 + $0x110] ss:$8 sps:$4 sm:$0xff]  }
 0x109   :  { %1873 = vmatpush1.bf16.msra.mxu0 %v3913_v16  ;;  %1914 = vmatpush1.bf16.msra.mxu1 %v3915_v17  ;;  %v4043_v16 = vcombine.low %v204_v7, %v212_v8  ;;  %v4432_v17 = vld [vmem:[#allocation4 + $0x74] ss:$8 sps:$4 sm:$0xff]   ;;  %v4486_v7 = vld [vmem:[#allocation4 + $0xe4] ss:$8 sps:$4 sm:$0xff]  }
 0x10a   :  { %1874 = vmatprep.subr.bf16.mxu0 %v4154_v18  ;;  %1915 = vmatprep.subr.bf16.mxu1 %v4156_v19  ;;  %v4435_v18 = vld [vmem:[#allocation4 + $0x174] ss:$8 sps:$4 sm:$0xff]   ;;  %v4937_v19 = vsub.s32 1, %v4934_v14  ;;  %v4489_v8 = vld [vmem:[#allocation4 + $0x1e4] ss:$8 sps:$4 sm:$0xff]  }
 0x10d   :  { %1875 = vmatpush2.bf16.msra.mxu0 %v4153_v23  ;;  %1916 = vmatpush2.bf16.msra.mxu1 %v4155_v24  ;;  %v4438_v23 = vld [vmem:[#allocation4 + $0x64] ss:$8 sps:$4 sm:$0xff]   ;;  %v1951_v24 = vrot.slane %v4942_v20, %v4937_v19 }
 0x10e   :  { %1876 = vmatprep.subr.bf16.mxu0 %v4138_v25  ;;  %1917 = vmatprep.subr.bf16.mxu1 %v4140_v26  ;;  %v4441_v25 = vld [vmem:[#allocation4 + $0x164] ss:$8 sps:$4 sm:$0xff]  }
 0x111   :  { %1877 = vmatpush2.bf16.msra.mxu0 %v4137_v31  ;;  %1918 = vmatpush2.bf16.msra.mxu1 %v4139_v32  ;;  %v4439_v31 = vld [vmem:[#allocation4 + $0x160] ss:$8 sps:$4 sm:$0xff]   ;;  %v4444_v32 = vld [vmem:[#allocation4 + $0x54] ss:$8 sps:$4 sm:$0xff]  }
 0x112   :  { %1878 = vmatprep.subr.bf16.mxu0 %v4122_v33  ;;  %1919 = vmatprep.subr.bf16.mxu1 %v4124_v34  ;;  %v4447_v34 = vld [vmem:[#allocation4 + $0x154] ss:$8 sps:$4 sm:$0xff]  }
 0x115   :  { %1879 = vmatpush2.bf16.msra.mxu0 %v4121_v39  ;;  %1920 = vmatpush2.bf16.msra.mxu1 %v4123_v40  ;;  %v4442_v39 = vld [vmem:[#allocation4 + $0x50] ss:$8 sps:$4 sm:$0xff]  }
 0x116   :  { %1880 = vmatprep.subr.bf16.mxu0 %v4106_v41  ;;  %1921 = vmatprep.subr.bf16.mxu1 %v4108_v42  ;;  %v4445_v41 = vld [vmem:[#allocation4 + $0x150] ss:$8 sps:$4 sm:$0xff]   ;;  %v4450_v42 = vld [vmem:[#allocation4 + $0x44] ss:$8 sps:$4 sm:$0xff]  }
 0x119   :  { %1881 = vmatpush2.bf16.msra.mxu0 %v4105_v47  ;;  %1922 = vmatpush2.bf16.msra.mxu1 %v4107_v48  ;;  %v4448_v48 = vld [vmem:[#allocation4 + $0x40] ss:$8 sps:$4 sm:$0xff]  }
 0x11a   :  { %1882 = vmatprep.subr.bf16.mxu0 %v4090_v57  ;;  %1923 = vmatprep.subr.bf16.mxu1 %v4092_v49  ;;  %v4451_v57 = vld [vmem:[#allocation4 + $0x140] ss:$8 sps:$4 sm:$0xff]   ;;  %v4456_v49 = vld [vmem:[#allocation4 + $0x34] ss:$8 sps:$4 sm:$0xff]  }
 0x11d   :  { %1883 = vmatpush2.bf16.msra.mxu0 %v4089_v55  ;;  %1924 = vmatpush2.bf16.msra.mxu1 %v4091_v56  ;;  %v4465_v55 = vld [vmem:[#allocation4 + $0x124] ss:$8 sps:$4 sm:$0xff]   ;;  %v4460_v56 = vld [vmem:[#allocation4 + $0x20] ss:$8 sps:$4 sm:$0xff]  }
 0x11e   :  { %1884 = vmatprep.subr.bf16.mxu0 %v4074_v58  ;;  %1925 = vmatprep.subr.bf16.mxu1 %v4076_v59  ;;  %v4463_v58 = vld [vmem:[#allocation4 + $0x120] ss:$8 sps:$4 sm:$0xff]   ;;  %v4468_v59 = vld [vmem:[#allocation4 + $0x14] ss:$8 sps:$4 sm:$0xff]  }
 0x121   :  { %1885 = vmatpush2.bf16.msra.mxu0 %v4073_v0  ;;  %1926 = vmatpush2.bf16.msra.mxu1 %v4075_v1  ;;  %v4477_v0 = vld [vmem:[#allocation4 + $0x104] ss:$8 sps:$4 sm:$0xff]   ;;  %v4472_v1 = vld [vmem:[#allocation4] ss:$8 sps:$4 sm:$0xff]  }
 0x122   :  { %1886 = vmatprep.subr.bf16.mxu0 %v4058_v2  ;;  %1927 = vmatprep.subr.bf16.mxu1 %v4060_v3  ;;  %v4475_v2 = vld [vmem:[#allocation4 + $0x100] ss:$8 sps:$4 sm:$0xff]   ;;  %v4480_v3 = vld [vmem:[#allocation4 + $0xf4] ss:$8 sps:$4 sm:$0xff]  }
 0x125   :  { %1887 = vmatpush2.bf16.msra.mxu0 %v4057_v9  ;;  %1928 = vmatpush2.bf16.msra.mxu1 %v4059_v10  ;;  %v4484_v9 = vld [vmem:[#allocation4 + $0xe0] ss:$8 sps:$4 sm:$0xff]  }
 0x126   :  { %1888 = vmatprep.subr.bf16.mxu0 %v4042_v11  ;;  %1929 = vmatprep.subr.bf16.mxu1 %v4044_v13  ;;  %v4487_v10 = vld [vmem:[#allocation4 + $0x1e0] ss:$8 sps:$4 sm:$0xff]   ;;  %v4492_v11 = vld [vmem:[#allocation4 + $0xd4] ss:$8 sps:$4 sm:$0xff]  }
 0x127   :  { %v4495_v13 = vld [vmem:[#allocation4 + $0x1d4] ss:$8 sps:$4 sm:$0xff]  }
 0x129   :  { %1889 = vmatpush2.bf16.msra.mxu0 %v4041_v15  ;;  %1930 = vmatpush2.bf16.msra.mxu1 %v4043_v16  ;;  %v4490_v15 = vld [vmem:[#allocation4 + $0xd0] ss:$8 sps:$4 sm:$0xff]  }
 0x12a   :  { %3400 = vmatprep.subr.bf16.mxu0 %v4432_v17  ;;  %3441 = vmatprep.subr.bf16.mxu1 %v4435_v18  ;;  %v4493_v16 = vld [vmem:[#allocation4 + $0x1d0] ss:$8 sps:$4 sm:$0xff]   ;;  %v4498_v17 = vld [vmem:[#allocation4 + $0xc4] ss:$8 sps:$4 sm:$0xff]  }
 0x12b   :  { %v4501_v18 = vld [vmem:[#allocation4 + $0x1c4] ss:$8 sps:$4 sm:$0xff]  }
 0x12c   :  { %v4947_v26 = vpop.f32.mrf.mxu0  ;;  %1891 = vmatmul.mubr.bf16.vlgmr.msra.gmra.mxu0 %v4920_v12  ;;  %1932 = vmatmul.mubr.bf16.vlgmr.msra.gmra.mxu1 %v4920_v12  ;;  %v4954_v29 = vpop.f32.mrf.mxu1 }
 0x12d   :  { %3401 = vmatpush1.bf16.msra.mxu0 %v4430_v22  ;;  %3442 = vmatpush1.bf16.msra.mxu1 %v4433_v53  ;;  %v4496_v22 = vld [vmem:[#allocation4 + $0xc0] ss:$8 sps:$4 sm:$0xff]  }
 0x12e   :  { %v1648_v30 = vpop.f32.mrf.mxu0  ;;  %3402 = vmatprep.subr.bf16.mxu0 %v4438_v23  ;;  %3443 = vmatprep.subr.bf16.mxu1 %v4441_v25  ;;  %v1689_v35 = vpop.f32.mrf.mxu1  ;;  %v4499_v53 = vld [vmem:[#allocation4 + $0x1c0] ss:$8 sps:$4 sm:$0xff]   ;;  %v4504_v23 = vld [vmem:[#allocation4 + $0xb4] ss:$8 sps:$4 sm:$0xff]   ;;  %v4502_v25 = vld [vmem:[#allocation4 + $0xb0] ss:$8 sps:$4 sm:$0xff]  }
 0x12f   :  { %v2015_v33 = vadd.f32 %v1951_v24, %v1648_v30  ;;  %v2017_v37 = vadd.f32 %v1959_v27, %v1689_v35  ;;  %v4507_v24 = vld [vmem:[#allocation4 + $0x1b4] ss:$8 sps:$4 sm:$0xff]   ;;  %v1954_v27 = vsub.s32 2, %v4934_v14  ;;  %v4505_v30 = vld [vmem:[#allocation4 + $0x1b0] ss:$8 sps:$4 sm:$0xff]  }
 0x130   :  { %v1650_v36 = vpop.f32.mrf.mxu0  ;;  %v1691_v40 = vpop.f32.mrf.mxu1 }
 0x131   :  { %v2029_v38 = vmax.f32 %v2015_v33, 0.0  ;;  %3403 = vmatpush1.bf16.msra.mxu0 %v4436_v28  ;;  %3444 = vmatpush1.bf16.msra.mxu1 %v4439_v31  ;;  %v2031_v43 = vmax.f32 %v2017_v37, 0.0  ;;  %v4958_v28 = vsub.s32 0, %v4934_v14  ;;  %v4510_v31 = vld [vmem:[#allocation4 + $0xa4] ss:$8 sps:$4 sm:$0xff]  }
 0x132   :  { %v1651_v12 = vpop.f32.mrf.mxu0  ;;  %3404 = vmatprep.subr.bf16.mxu0 %v4444_v32  ;;  %3445 = vmatprep.subr.bf16.mxu1 %v4447_v34  ;;  %v1692_v46 = vpop.f32.mrf.mxu1  ;;  %v4513_v32 = vld [vmem:[#allocation4 + $0x1a4] ss:$8 sps:$4 sm:$0xff]   ;;  %v4508_v33 = vld [vmem:[#allocation4 + $0xa0] ss:$8 sps:$4 sm:$0xff]   ;;  %v1955_v34 = vrot.slane %v4942_v20, %v1954_v27  ;;  %v4516_v37 = vld [vmem:[#allocation4 + $0x94] ss:$8 sps:$4 sm:$0xff]  }
 0x133   :  { %v2043_v44 = vpack.c.bf16 %v2029_v38, %v2029_v38  ;;  %v2045_v47 = vpack.c.bf16 %v2031_v43, %v2031_v43  ;;  %v1947_v35 = vrot.slane %v4942_v20, %v4958_v28  ;;  %v4511_v36 = vld [vmem:[#allocation4 + $0x1a0] ss:$8 sps:$4 sm:$0xff]   ;;  %v4519_v38 = vld [vmem:[#allocation4 + $0x194] ss:$8 sps:$4 sm:$0xff]   ;;  %v4514_v40 = vld [vmem:[#allocation4 + $0x90] ss:$8 sps:$4 sm:$0xff]  }
 0x134   :  { %v4525_v43 = vld [vmem:[#allocation4 + $0x184] ss:$8 sps:$4 sm:$0xff]  }
 0x135   :  { %3405 = vmatpush1.bf16.msra.mxu0 %v4442_v39  ;;  %3432 = vmatprep.mubr.bf16.mxu0 %v2043_v44  ;;  %v2016_v39 = vadd.f32 %v1955_v34, %v4954_v29  ;;  %v2014_v12 = vadd.f32 %v1947_v35, %v4947_v26  ;;  %v1966_v29 = vsub.s32 5, %v4934_v14  ;;  %v1974_v26 = vsub.s32 7, %v4934_v14  ;;  %v4559_v34 = vld [vmem:[#allocation4 + $0x320] ss:$8 sps:$4 sm:$0xff]   ;;  %v4564_v35 = vld [vmem:[#allocation4 + $0x214] ss:$8 sps:$4 sm:$0xff]  }
 0x136   :  { %3446 = vmatpush1.bf16.msra.mxu1 %v4445_v41  ;;  %3406 = vmatprep.subr.bf16.mxu0 %v4450_v42  ;;  %v4517_v41 = vld [vmem:[#allocation4 + $0x190] ss:$8 sps:$4 sm:$0xff]   ;;  %v4522_v42 = vld [vmem:[#allocation4 + $0x84] ss:$8 sps:$4 sm:$0xff]  }
 0x137   :  { %3447 = vmatprep.subr.bf16.mxu1 %v4453_v45  ;;  %3473 = vmatprep.mubr.bf16.mxu1 %v2045_v47  ;;  %v2030_v44 = vmax.f32 %v2016_v39, 0.0  ;;  %v4520_v45 = vld [vmem:[#allocation4 + $0x80] ss:$8 sps:$4 sm:$0xff]   ;;  %v2028_v46 = vmax.f32 %v2014_v12, 0.0  ;;  %v4570_v39 = vld [vmem:[#allocation4 + $0x204] ss:$8 sps:$4 sm:$0xff]  }
 0x138   :  { %v4523_v47 = vld [vmem:[#allocation4 + $0x180] ss:$8 sps:$4 sm:$0xff]  }
 0x139   :  { %3407 = vmatpush1.bf16.msra.mxu0 %v4448_v48  ;;  %v4528_v48 = vld [vmem:[#allocation4 + $0x274] ss:$8 sps:$4 sm:$0xff]   ;;  %v4568_v12 = vld [vmem:[#allocation4 + $0x200] ss:$8 sps:$4 sm:$0xff]  }
 0x13a   :  { %3448 = vmatpush1.bf16.msra.mxu1 %v4451_v57  ;;  %3408 = vmatprep.subr.bf16.mxu0 %v4456_v49  ;;  %v4531_v57 = vld [vmem:[#allocation4 + $0x374] ss:$8 sps:$4 sm:$0xff]   ;;  %v2044_v49 = vpack.c.bf16 %v2030_v44, %v2030_v44  ;;  %v4574_v44 = vld [vmem:[#allocation4 + $0x2f0] ss:$8 sps:$4 sm:$0xff]  }
 0x13b   :  { %3449 = vmatprep.subr.bf16.mxu1 %v4459_v50  ;;  %v4526_v50 = vld [vmem:[#allocation4 + $0x270] ss:$8 sps:$4 sm:$0xff]  }
 0x13d   :  { %3409 = vmatpush1.bf16.msra.mxu0 %v4454_v51  ;;  %v2042_v51 = vpack.c.bf16 %v2028_v46, %v2028_v46  ;;  %v4582_v46 = vld [vmem:[#allocation4 + $0x2e4] ss:$8 sps:$4 sm:$0xff]  }
 0x13e   :  { %3450 = vmatpush1.bf16.msra.mxu1 %v4457_v52  ;;  %3410 = vmatprep.subr.bf16.mxu0 %v4462_v54  ;;  %v4529_v52 = vld [vmem:[#allocation4 + $0x370] ss:$8 sps:$4 sm:$0xff]   ;;  %v4534_v54 = vld [vmem:[#allocation4 + $0x264] ss:$8 sps:$4 sm:$0xff]  }
 0x13f   :  { %3451 = vmatprep.subr.bf16.mxu1 %v4465_v55  ;;  %v1967_v55 = vrot.slane %v4942_v20, %v1966_v29 }
 0x141   :  { %3411 = vmatpush1.bf16.msra.mxu0 %v4460_v56  ;;  %v4537_v56 = vld [vmem:[#allocation4 + $0x364] ss:$8 sps:$4 sm:$0xff]  }
 0x142   :  { %3452 = vmatpush1.bf16.msra.mxu1 %v4463_v58  ;;  %3412 = vmatprep.subr.bf16.mxu0 %v4468_v59  ;;  %v1975_v59 = vrot.slane %v4942_v20, %v1974_v26  ;;  %v4588_v26 = vld [vmem:[#allocation4 + $0x2d4] ss:$8 sps:$4 sm:$0xff]  }
 0x143   :  { %3453 = vmatprep.subr.bf16.mxu1 %v4471_v60  ;;  %v4532_v60 = vld [vmem:[#allocation4 + $0x260] ss:$8 sps:$4 sm:$0xff]  }
 0x145   :  { %3413 = vmatpush1.bf16.msra.mxu0 %v4466_v61 }
 0x146   :  { %3454 = vmatpush1.bf16.msra.mxu1 %v4469_v62  ;;  %3414 = vmatprep.subr.bf16.mxu0 %v4474_v63  ;;  %v4535_v63 = vld [vmem:[#allocation4 + $0x360] ss:$8 sps:$4 sm:$0xff]  }
 0x147   :  { %3455 = vmatprep.subr.bf16.mxu1 %v4477_v0  ;;  %v4540_v0 = vld [vmem:[#allocation4 + $0x254] ss:$8 sps:$4 sm:$0xff]  }
 0x149   :  { %3415 = vmatpush1.bf16.msra.mxu0 %v4472_v1 }
 0x14a   :  { %3456 = vmatpush1.bf16.msra.mxu1 %v4475_v2  ;;  %3416 = vmatprep.subr.bf16.mxu0 %v4480_v3  ;;  %v4543_v2 = vld [vmem:[#allocation4 + $0x354] ss:$8 sps:$4 sm:$0xff]  }
 0x14b   :  { %3457 = vmatprep.subr.bf16.mxu1 %v4483_v4 }
 0x14d   :  { %3417 = vmatpush2.bf16.msra.mxu0 %v4478_v5 }
 0x14e   :  { %3458 = vmatpush2.bf16.msra.mxu1 %v4481_v6  ;;  %3418 = vmatprep.subr.bf16.mxu0 %v4486_v7  ;;  %v4538_v7 = vld [vmem:[#allocation4 + $0x250] ss:$8 sps:$4 sm:$0xff]  }
 0x14f   :  { %3459 = vmatprep.subr.bf16.mxu1 %v4489_v8 }
 0x151   :  { %3419 = vmatpush2.bf16.msra.mxu0 %v4484_v9 }
 0x152   :  { %3460 = vmatpush2.bf16.msra.mxu1 %v4487_v10  ;;  %3420 = vmatprep.subr.bf16.mxu0 %v4492_v11  ;;  %v4541_v10 = vld [vmem:[#allocation4 + $0x350] ss:$8 sps:$4 sm:$0xff]   ;;  %v4546_v11 = vld [vmem:[#allocation4 + $0x244] ss:$8 sps:$4 sm:$0xff]  }
 0x153   :  { %3461 = vmatprep.subr.bf16.mxu1 %v4495_v13 }
 0x155   :  { %3421 = vmatpush2.bf16.msra.mxu0 %v4490_v15 }
 0x156   :  { %3462 = vmatpush2.bf16.msra.mxu1 %v4493_v16  ;;  %3422 = vmatprep.subr.bf16.mxu0 %v4498_v17  ;;  %v4549_v16 = vld [vmem:[#allocation4 + $0x344] ss:$8 sps:$4 sm:$0xff]  }
 0x157   :  { %3463 = vmatprep.subr.bf16.mxu1 %v4501_v18 }
 0x159   :  { %3423 = vmatpush2.bf16.msra.mxu0 %v4496_v22  ;;  %v4544_v22 = vld [vmem:[#allocation4 + $0x240] ss:$8 sps:$4 sm:$0xff]  }
 0x15a   :  { %3464 = vmatpush2.bf16.msra.mxu1 %v4499_v53  ;;  %3424 = vmatprep.subr.bf16.mxu0 %v4504_v23  ;;  %v4547_v53 = vld [vmem:[#allocation4 + $0x340] ss:$8 sps:$4 sm:$0xff]   ;;  %v4552_v23 = vld [vmem:[#allocation4 + $0x234] ss:$8 sps:$4 sm:$0xff]  }
 0x15b   :  { %3465 = vmatprep.subr.bf16.mxu1 %v4507_v24  ;;  %v4555_v24 = vld [vmem:[#allocation4 + $0x334] ss:$8 sps:$4 sm:$0xff]  }
 0x15d   :  { %3425 = vmatpush2.bf16.msra.mxu0 %v4502_v25  ;;  %v4550_v25 = vld [vmem:[#allocation4 + $0x230] ss:$8 sps:$4 sm:$0xff]  }
 0x15e   :  { %3466 = vmatpush2.bf16.msra.mxu1 %v4505_v30  ;;  %3426 = vmatprep.subr.bf16.mxu0 %v4510_v31  ;;  %v4553_v30 = vld [vmem:[#allocation4 + $0x330] ss:$8 sps:$4 sm:$0xff]   ;;  %v4558_v31 = vld [vmem:[#allocation4 + $0x224] ss:$8 sps:$4 sm:$0xff]  }
 0x15f   :  { %3467 = vmatprep.subr.bf16.mxu1 %v4513_v32  ;;  %v4561_v32 = vld [vmem:[#allocation4 + $0x324] ss:$8 sps:$4 sm:$0xff]  }
 0x161   :  { %3427 = vmatpush2.bf16.msra.mxu0 %v4508_v33  ;;  %v4556_v33 = vld [vmem:[#allocation4 + $0x220] ss:$8 sps:$4 sm:$0xff]  }
 0x162   :  { %3468 = vmatpush2.bf16.msra.mxu1 %v4511_v36  ;;  %3428 = vmatprep.subr.bf16.mxu0 %v4516_v37  ;;  %v4567_v36 = vld [vmem:[#allocation4 + $0x314] ss:$8 sps:$4 sm:$0xff]   ;;  %v4562_v37 = vld [vmem:[#allocation4 + $0x210] ss:$8 sps:$4 sm:$0xff]  }
 0x163   :  { %3469 = vmatprep.subr.bf16.mxu1 %v4519_v38  ;;  %v4565_v38 = vld [vmem:[#allocation4 + $0x310] ss:$8 sps:$4 sm:$0xff]  }
 0x165   :  { %3429 = vmatpush2.bf16.msra.mxu0 %v4514_v40  ;;  %v4573_v40 = vld [vmem:[#allocation4 + $0x304] ss:$8 sps:$4 sm:$0xff]  }
 0x166   :  { %3470 = vmatpush2.bf16.msra.mxu1 %v4517_v41  ;;  %3430 = vmatprep.subr.bf16.mxu0 %v4522_v42  ;;  %v4571_v41 = vld [vmem:[#allocation4 + $0x300] ss:$8 sps:$4 sm:$0xff]   ;;  %v4576_v42 = vld [vmem:[#allocation4 + $0x2f4] ss:$8 sps:$4 sm:$0xff]  }
 0x167   :  { %3471 = vmatprep.subr.bf16.mxu1 %v4525_v43  ;;  %v4579_v43 = vld [vmem:[#allocation4 + $0x3f4] ss:$8 sps:$4 sm:$0xff]  }
 0x169   :  { %3431 = vmatpush2.bf16.msra.mxu0 %v4520_v45  ;;  %v4577_v45 = vld [vmem:[#allocation4 + $0x3f0] ss:$8 sps:$4 sm:$0xff]  }
 0x16a   :  { %3472 = vmatpush2.bf16.msra.mxu1 %v4523_v47  ;;  %3482 = vmatprep.subr.bf16.mxu0 %v4528_v48  ;;  %v4585_v47 = vld [vmem:[#allocation4 + $0x3e4] ss:$8 sps:$4 sm:$0xff]   ;;  %v4580_v48 = vld [vmem:[#allocation4 + $0x2e0] ss:$8 sps:$4 sm:$0xff]  }
 0x16b   :  { %3523 = vmatprep.subr.bf16.mxu1 %v4531_v57  ;;  %v4583_v57 = vld [vmem:[#allocation4 + $0x3e0] ss:$8 sps:$4 sm:$0xff]  }
 0x16c   :  { %v4972_v58 = vpop.f32.mrf.mxu0  ;;  %3433 = vmatmul.mubr.bf16.vlgmr.msra.gmra.mxu0 %v2042_v51  ;;  %v4975_v61 = vpop.f32.mrf.mxu1  ;;  %v4589_v51 = vld [vmem:[#allocation4 + $0x3d0] ss:$8 sps:$4 sm:$0xff]  }
 0x16d   :  { %3474 = vmatmul.mubr.bf16.vlgmr.msra.gmra.mxu1 %v2044_v49  ;;  %3483 = vmatpush1.bf16.msra.mxu0 %v4526_v50  ;;  %v4591_v49 = vld [vmem:[#allocation4 + $0x3d4] ss:$8 sps:$4 sm:$0xff]   ;;  %v4586_v50 = vld [vmem:[#allocation4 + $0x2d0] ss:$8 sps:$4 sm:$0xff]  }
 0x16e   :  { %3524 = vmatpush1.bf16.msra.mxu1 %v4529_v52  ;;  %v1730_v62 = vpop.f32.mrf.mxu0  ;;  %3484 = vmatprep.subr.bf16.mxu0 %v4534_v54  ;;  %v1771_v3 = vpop.f32.mrf.mxu1  ;;  %v4594_v52 = vld [vmem:[#allocation4 + $0x2c4] ss:$8 sps:$4 sm:$0xff]  }
 0x16f   :  { %v2019_v1 = vadd.f32 %v1967_v55, %v1730_v62  ;;  %3525 = vmatprep.subr.bf16.mxu1 %v4537_v56  ;;  %v2021_v5 = vadd.f32 %v1975_v59, %v1771_v3  ;;  %v4597_v54 = vld [vmem:[#allocation4 + $0x3c4] ss:$8 sps:$4 sm:$0xff]   ;;  %v4592_v55 = vld [vmem:[#allocation4 + $0x2c0] ss:$8 sps:$4 sm:$0xff]   ;;  %v4600_v59 = vld [vmem:[#allocation4 + $0x2b4] ss:$8 sps:$4 sm:$0xff]  }
 0x170   :  { %v1732_v4 = vpop.f32.mrf.mxu0  ;;  %v1773_v8 = vpop.f32.mrf.mxu1  ;;  %v4595_v56 = vld [vmem:[#allocation4 + $0x3c0] ss:$8 sps:$4 sm:$0xff]   ;;  %v4598_v62 = vld [vmem:[#allocation4 + $0x2b0] ss:$8 sps:$4 sm:$0xff]   ;;  %v4609_v3 = vld [vmem:[#allocation4 + $0x3a4] ss:$8 sps:$4 sm:$0xff]  }
 0x171   :  { %v2033_v6 = vmax.f32 %v2019_v1, 0.0  ;;  %3485 = vmatpush1.bf16.msra.mxu0 %v4532_v60  ;;  %v2035_v13 = vmax.f32 %v2021_v5, 0.0  ;;  %v4603_v60 = vld [vmem:[#allocation4 + $0x3b4] ss:$8 sps:$4 sm:$0xff]   ;;  %v4601_v1 = vld [vmem:[#allocation4 + $0x3b0] ss:$8 sps:$4 sm:$0xff]  }
 0x172   :  { %3526 = vmatpush1.bf16.msra.mxu1 %v4535_v63  ;;  %v1733_v9 = vpop.f32.mrf.mxu0  ;;  %3486 = vmatprep.subr.bf16.mxu0 %v4540_v0  ;;  %v1774_v17 = vpop.f32.mrf.mxu1  ;;  %v1970_v63 = vsub.s32 6, %v4934_v14  ;;  %v1962_v0 = vsub.s32 4, %v4934_v14  ;;  %v4604_v4 = vld [vmem:[#allocation4 + $0x2a0] ss:$8 sps:$4 sm:$0xff]   ;;  %v4612_v8 = vld [vmem:[#allocation4 + $0x294] ss:$8 sps:$4 sm:$0xff]  }
 0x173   :  { %v2047_v15 = vpack.c.bf16 %v2033_v6, %v2033_v6  ;;  %3527 = vmatprep.subr.bf16.mxu1 %v4543_v2  ;;  %v2049_v18 = vpack.c.bf16 %v2035_v13, %v2035_v13  ;;  %v4606_v2 = vld [vmem:[#allocation4 + $0x2a4] ss:$8 sps:$4 sm:$0xff]   ;;  %v4615_v9 = vld [vmem:[#allocation4 + $0x394] ss:$8 sps:$4 sm:$0xff]  }
 0x174   :  { %v1971_v5 = vrot.slane %v4942_v20, %v1970_v63  ;;  %v1963_v6 = vrot.slane %v4942_v20, %v1962_v0  ;;  %v4621_v17 = vld [vmem:[#allocation4 + $0x384] ss:$8 sps:$4 sm:$0xff]   ;;  %v4616_v20 = vld [vmem:[#allocation4 + $0x280] ss:$8 sps:$4 sm:$0xff]   ;;  %v4649_v63 = vld [vmem:[#allocation4 + $0x530] ss:$8 sps:$4 sm:$0xff]  }
 0x175   :  { %3487 = vmatpush1.bf16.msra.mxu0 %v4538_v7  ;;  %3514 = vmatprep.mubr.bf16.mxu0 %v2047_v15  ;;  %v4607_v7 = vld [vmem:[#allocation4 + $0x3a0] ss:$8 sps:$4 sm:$0xff]   ;;  %v4613_v15 = vld [vmem:[#allocation4 + $0x390] ss:$8 sps:$4 sm:$0xff]  }
 0x176   :  { %3528 = vmatpush1.bf16.msra.mxu1 %v4541_v10  ;;  %3488 = vmatprep.subr.bf16.mxu0 %v4546_v11  ;;  %v2020_v10 = vadd.f32 %v1971_v5, %v4975_v61  ;;  %v4610_v11 = vld [vmem:[#allocation4 + $0x290] ss:$8 sps:$4 sm:$0xff]   ;;  %v2018_v13 = vadd.f32 %v1963_v6, %v4972_v58  ;;  %v4988_v58 = vld [vmem:[%s5034_s2 + $0x8] sm:$0x3f]  ;;  %v4660_v5 = vld [vmem:[#allocation4 + $0x414] ss:$8 sps:$4 sm:$0xff]  }
 0x177   :  { %3529 = vmatprep.subr.bf16.mxu1 %v4549_v16  ;;  %3555 = vmatprep.mubr.bf16.mxu1 %v2049_v18  ;;  %v4618_v16 = vld [vmem:[#allocation4 + $0x284] ss:$8 sps:$4 sm:$0xff]   ;;  %v4663_v6 = vld [vmem:[#allocation4 + $0x514] ss:$8 sps:$4 sm:$0xff]  }
 0x178   :  { %v2034_v18 = vmax.f32 %v2020_v10, 0.0  ;;  %v4669_v10 = vld [vmem:[#allocation4 + $0x504] ss:$8 sps:$4 sm:$0xff]  }
 0x179   :  { %3489 = vmatpush1.bf16.msra.mxu0 %v4544_v22  ;;  %v2032_v22 = vmax.f32 %v2018_v13, 0.0  ;;  %v4667_v13 = vld [vmem:[#allocation4 + $0x500] ss:$8 sps:$4 sm:$0xff]  }
 0x17a   :  { %3530 = vmatpush1.bf16.msra.mxu1 %v4547_v53  ;;  %3490 = vmatprep.subr.bf16.mxu0 %v4552_v23  ;;  %v4619_v53 = vld [vmem:[#allocation4 + $0x380] ss:$8 sps:$4 sm:$0xff]   ;;  %v4624_v23 = vld [vmem:[#allocation4 + $0x474] ss:$8 sps:$4 sm:$0xff]   ;;  %v2048_v61 = vpack.c.bf16 %v2034_v18, %v2034_v18  ;;  %v4673_v18 = vld [vmem:[#allocation4 + $0x5f0] ss:$8 sps:$4 sm:$0xff]  }
 0x17b   :  { %3531 = vmatprep.subr.bf16.mxu1 %v4555_v24  ;;  %v4627_v24 = vld [vmem:[#allocation4 + $0x574] ss:$8 sps:$4 sm:$0xff]  }
 0x17d   :  { %3491 = vmatpush1.bf16.msra.mxu0 %v4550_v25  ;;  %v4622_v25 = vld [vmem:[#allocation4 + $0x470] ss:$8 sps:$4 sm:$0xff]  }
 0x17e   :  { %3532 = vmatpush1.bf16.msra.mxu1 %v4553_v30  ;;  %3492 = vmatprep.subr.bf16.mxu0 %v4558_v31  ;;  %v2046_v30 = vpack.c.bf16 %v2032_v22, %v2032_v22  ;;  %v4625_v31 = vld [vmem:[#allocation4 + $0x570] ss:$8 sps:$4 sm:$0xff]   ;;  %v4681_v22 = vld [vmem:[#allocation4 + $0x5e4] ss:$8 sps:$4 sm:$0xff]  }
 0x17f   :  { %3533 = vmatprep.subr.bf16.mxu1 %v4561_v32  ;;  %v4630_v32 = vld [vmem:[#allocation4 + $0x464] ss:$8 sps:$4 sm:$0xff]  }
 0x181   :  { %3493 = vmatpush1.bf16.msra.mxu0 %v4556_v33  ;;  %v1983_v33 = vrot.slane %v4988_v58, %v4937_v19 }
 0x182   :  { %3534 = vmatpush1.bf16.msra.mxu1 %v4559_v34  ;;  %3494 = vmatprep.subr.bf16.mxu0 %v4564_v35  ;;  %v4633_v34 = vld [vmem:[#allocation4 + $0x564] ss:$8 sps:$4 sm:$0xff]  }
 0x183   :  { %3535 = vmatprep.subr.bf16.mxu1 %v4567_v36  ;;  %v1991_v36 = vrot.slane %v4988_v58, %v1958_v21 }
 0x185   :  { %3495 = vmatpush1.bf16.msra.mxu0 %v4562_v37  ;;  %v4628_v37 = vld [vmem:[#allocation4 + $0x460] ss:$8 sps:$4 sm:$0xff]  }
 0x186   :  { %3536 = vmatpush1.bf16.msra.mxu1 %v4565_v38  ;;  %3496 = vmatprep.subr.bf16.mxu0 %v4570_v39 }
 0x187   :  { %3537 = vmatprep.subr.bf16.mxu1 %v4573_v40  ;;  %v4631_v40 = vld [vmem:[#allocation4 + $0x560] ss:$8 sps:$4 sm:$0xff]  }
 0x189   :  { %3497 = vmatpush1.bf16.msra.mxu0 %v4568_v12  ;;  %v4636_v12 = vld [vmem:[#allocation4 + $0x454] ss:$8 sps:$4 sm:$0xff]  }
 0x18a   :  { %3538 = vmatpush1.bf16.msra.mxu1 %v4571_v41  ;;  %3498 = vmatprep.subr.bf16.mxu0 %v4576_v42  ;;  %v4639_v42 = vld [vmem:[#allocation4 + $0x554] ss:$8 sps:$4 sm:$0xff]  }
 0x18b   :  { %3539 = vmatprep.subr.bf16.mxu1 %v4579_v43 }
 0x18d   :  { %3499 = vmatpush2.bf16.msra.mxu0 %v4574_v44 }
 0x18e   :  { %3540 = vmatpush2.bf16.msra.mxu1 %v4577_v45  ;;  %3500 = vmatprep.subr.bf16.mxu0 %v4582_v46 }
 0x18f   :  { %3541 = vmatprep.subr.bf16.mxu1 %v4585_v47  ;;  %v4634_v47 = vld [vmem:[#allocation4 + $0x450] ss:$8 sps:$4 sm:$0xff]  }
 0x191   :  { %3501 = vmatpush2.bf16.msra.mxu0 %v4580_v48 }
 0x192   :  { %3542 = vmatpush2.bf16.msra.mxu1 %v4583_v57  ;;  %3502 = vmatprep.subr.bf16.mxu0 %v4588_v26  ;;  %v4637_v57 = vld [vmem:[#allocation4 + $0x550] ss:$8 sps:$4 sm:$0xff]   ;;  %v4642_v26 = vld [vmem:[#allocation4 + $0x444] ss:$8 sps:$4 sm:$0xff]  }
 0x193   :  { %3543 = vmatprep.subr.bf16.mxu1 %v4591_v49 }
 0x195   :  { %3503 = vmatpush2.bf16.msra.mxu0 %v4586_v50 }
 0x196   :  { %3544 = vmatpush2.bf16.msra.mxu1 %v4589_v51  ;;  %3504 = vmatprep.subr.bf16.mxu0 %v4594_v52  ;;  %v4645_v51 = vld [vmem:[#allocation4 + $0x544] ss:$8 sps:$4 sm:$0xff]  }
 0x197   :  { %3545 = vmatprep.subr.bf16.mxu1 %v4597_v54 }
 0x199   :  { %3505 = vmatpush2.bf16.msra.mxu0 %v4592_v55  ;;  %v4640_v55 = vld [vmem:[#allocation4 + $0x440] ss:$8 sps:$4 sm:$0xff]  }
 0x19a   :  { %3546 = vmatpush2.bf16.msra.mxu1 %v4595_v56  ;;  %3506 = vmatprep.subr.bf16.mxu0 %v4600_v59  ;;  %v4643_v56 = vld [vmem:[#allocation4 + $0x540] ss:$8 sps:$4 sm:$0xff]   ;;  %v4648_v59 = vld [vmem:[#allocation4 + $0x434] ss:$8 sps:$4 sm:$0xff]  }
 0x19b   :  { %3547 = vmatprep.subr.bf16.mxu1 %v4603_v60  ;;  %v4651_v60 = vld [vmem:[#allocation4 + $0x534] ss:$8 sps:$4 sm:$0xff]  }
 0x19d   :  { %3507 = vmatpush2.bf16.msra.mxu0 %v4598_v62  ;;  %v4646_v62 = vld [vmem:[#allocation4 + $0x430] ss:$8 sps:$4 sm:$0xff]  }
 0x19e   :  { %3548 = vmatpush2.bf16.msra.mxu1 %v4601_v1  ;;  %3508 = vmatprep.subr.bf16.mxu0 %v4606_v2  ;;  %v4654_v1 = vld [vmem:[#allocation4 + $0x424] ss:$8 sps:$4 sm:$0xff]  }
 0x19f   :  { %3549 = vmatprep.subr.bf16.mxu1 %v4609_v3  ;;  %v4657_v2 = vld [vmem:[#allocation4 + $0x524] ss:$8 sps:$4 sm:$0xff]   ;;  %v4652_v3 = vld [vmem:[#allocation4 + $0x420] ss:$8 sps:$4 sm:$0xff]  }
 0x1a1   :  { %3509 = vmatpush2.bf16.msra.mxu0 %v4604_v4  ;;  %v4655_v4 = vld [vmem:[#allocation4 + $0x520] ss:$8 sps:$4 sm:$0xff]  }
 0x1a2   :  { %3550 = vmatpush2.bf16.msra.mxu1 %v4607_v7  ;;  %3510 = vmatprep.subr.bf16.mxu0 %v4612_v8  ;;  %v4658_v7 = vld [vmem:[#allocation4 + $0x410] ss:$8 sps:$4 sm:$0xff]  }
 0x1a3   :  { %3551 = vmatprep.subr.bf16.mxu1 %v4615_v9  ;;  %v4661_v8 = vld [vmem:[#allocation4 + $0x510] ss:$8 sps:$4 sm:$0xff]   ;;  %v4666_v9 = vld [vmem:[#allocation4 + $0x404] ss:$8 sps:$4 sm:$0xff]  }
 0x1a5   :  { %3511 = vmatpush2.bf16.msra.mxu0 %v4610_v11  ;;  %v4664_v11 = vld [vmem:[#allocation4 + $0x400] ss:$8 sps:$4 sm:$0xff]  }
 0x1a6   :  { %3552 = vmatpush2.bf16.msra.mxu1 %v4613_v15  ;;  %3512 = vmatprep.subr.bf16.mxu0 %v4618_v16  ;;  %v4672_v15 = vld [vmem:[#allocation4 + $0x4f4] ss:$8 sps:$4 sm:$0xff]  }
 0x1a7   :  { %3553 = vmatprep.subr.bf16.mxu1 %v4621_v17  ;;  %v4675_v16 = vld [vmem:[#allocation4 + $0x5f4] ss:$8 sps:$4 sm:$0xff]   ;;  %v4670_v17 = vld [vmem:[#allocation4 + $0x4f0] ss:$8 sps:$4 sm:$0xff]  }
 0x1a9   :  { %3513 = vmatpush2.bf16.msra.mxu0 %v4616_v20  ;;  %v4678_v20 = vld [vmem:[#allocation4 + $0x4e4] ss:$8 sps:$4 sm:$0xff]  }
 0x1aa   :  { %3554 = vmatpush2.bf16.msra.mxu1 %v4619_v53  ;;  %3564 = vmatprep.subr.bf16.mxu0 %v4624_v23  ;;  %v4676_v53 = vld [vmem:[#allocation4 + $0x4e0] ss:$8 sps:$4 sm:$0xff]  }
 0x1ab   :  { %3605 = vmatprep.subr.bf16.mxu1 %v4627_v24  ;;  %v4679_v23 = vld [vmem:[#allocation4 + $0x5e0] ss:$8 sps:$4 sm:$0xff]   ;;  %v4684_v24 = vld [vmem:[#allocation4 + $0x4d4] ss:$8 sps:$4 sm:$0xff]  }
 0x1ac   :  { %v4992_v35 = vpop.f32.mrf.mxu0  ;;  %3515 = vmatmul.mubr.bf16.vlgmr.msra.gmra.mxu0 %v2046_v30  ;;  %v4997_v38 = vpop.f32.mrf.mxu1  ;;  %v4685_v30 = vld [vmem:[#allocation4 + $0x5d0] ss:$8 sps:$4 sm:$0xff]  }
 0x1ad   :  { %3556 = vmatmul.mubr.bf16.vlgmr.msra.gmra.mxu1 %v2048_v61  ;;  %3565 = vmatpush1.bf16.msra.mxu0 %v4622_v25  ;;  %v4687_v61 = vld [vmem:[#allocation4 + $0x5d4] ss:$8 sps:$4 sm:$0xff]   ;;  %v4682_v25 = vld [vmem:[#allocation4 + $0x4d0] ss:$8 sps:$4 sm:$0xff]  }
 0x1ae   :  { %3606 = vmatpush1.bf16.msra.mxu1 %v4625_v31  ;;  %v1812_v39 = vpop.f32.mrf.mxu0  ;;  %3566 = vmatprep.subr.bf16.mxu0 %v4630_v32  ;;  %v1853_v43 = vpop.f32.mrf.mxu1  ;;  %v4690_v31 = vld [vmem:[#allocation4 + $0x4c4] ss:$8 sps:$4 sm:$0xff]  }
 0x1af   :  { %v2023_v41 = vadd.f32 %v1983_v33, %v1812_v39  ;;  %3607 = vmatprep.subr.bf16.mxu1 %v4633_v34  ;;  %v2025_v45 = vadd.f32 %v1991_v36, %v1853_v43  ;;  %v4693_v32 = vld [vmem:[#allocation4 + $0x5c4] ss:$8 sps:$4 sm:$0xff]   ;;  %v4688_v33 = vld [vmem:[#allocation4 + $0x4c0] ss:$8 sps:$4 sm:$0xff]   ;;  %v4696_v36 = vld [vmem:[#allocation4 + $0x4b4] ss:$8 sps:$4 sm:$0xff]   ;;  %v1987_v43 = vrot.slane %v4988_v58, %v1954_v27 }
 0x1b0   :  { %v1814_v44 = vpop.f32.mrf.mxu0  ;;  %v1855_v21 = vpop.f32.mrf.mxu1  ;;  %v4691_v34 = vld [vmem:[#allocation4 + $0x5c0] ss:$8 sps:$4 sm:$0xff]   ;;  %v4694_v39 = vld [vmem:[#allocation4 + $0x4b0] ss:$8 sps:$4 sm:$0xff]   ;;  %v4717_v27 = vld [vmem:[#allocation4 + $0x584] ss:$8 sps:$4 sm:$0xff]  }
 0x1b1   :  { %v2037_v46 = vmax.f32 %v2023_v41, 0.0  ;;  %3567 = vmatpush1.bf16.msra.mxu0 %v4628_v37  ;;  %v2039_v49 = vmax.f32 %v2025_v45, 0.0  ;;  %v4699_v37 = vld [vmem:[#allocation4 + $0x5b4] ss:$8 sps:$4 sm:$0xff]   ;;  %v4705_v41 = vld [vmem:[#allocation4 + $0x5a4] ss:$8 sps:$4 sm:$0xff]   ;;  %v1979_v44 = vrot.slane %v4988_v58, %v4958_v28  ;;  %v2024_v21 = vadd.f32 %v1987_v43, %v4997_v38 }
 0x1b2   :  { %3608 = vmatpush1.bf16.msra.mxu1 %v4631_v40  ;;  %v1815_v48 = vpop.f32.mrf.mxu0  ;;  %3568 = vmatprep.subr.bf16.mxu0 %v4636_v12  ;;  %v1856_v52 = vpop.f32.mrf.mxu1  ;;  %v4697_v40 = vld [vmem:[#allocation4 + $0x5b0] ss:$8 sps:$4 sm:$0xff]   ;;  %v4702_v12 = vld [vmem:[#allocation4 + $0x4a4] ss:$8 sps:$4 sm:$0xff]   ;;  %v4703_v45 = vld [vmem:[#allocation4 + $0x5a0] ss:$8 sps:$4 sm:$0xff]  }
 0x1b3   :  { %v2051_v50 = vpack.c.bf16 %v2037_v46, %v2037_v46  ;;  %3609 = vmatprep.subr.bf16.mxu1 %v4639_v42  ;;  %v2053_v54 = vpack.c.bf16 %v2039_v49, %v2039_v49  ;;  %v4700_v42 = vld [vmem:[#allocation4 + $0x4a0] ss:$8 sps:$4 sm:$0xff]   ;;  %v4708_v46 = vld [vmem:[#allocation4 + $0x494] ss:$8 sps:$4 sm:$0xff]   ;;  %v4706_v48 = vld [vmem:[#allocation4 + $0x490] ss:$8 sps:$4 sm:$0xff]  }
 0x1b4   :  { %v4714_v49 = vld [vmem:[#allocation4 + $0x484] ss:$8 sps:$4 sm:$0xff]   ;;  %v4718_v38 = vld [vmem:[#allocation4 + $0x670] ss:$8 sps:$4 sm:$0xff]  }
 0x1b5   :  { %3569 = vmatpush1.bf16.msra.mxu0 %v4634_v47  ;;  %3596 = vmatprep.mubr.bf16.mxu0 %v2051_v50  ;;  %v4711_v47 = vld [vmem:[#allocation4 + $0x594] ss:$8 sps:$4 sm:$0xff]   ;;  %v2038_v50 = vmax.f32 %v2024_v21, 0.0  ;;  %v4760_v43 = vld [vmem:[#allocation4 + $0x690] ss:$8 sps:$4 sm:$0xff]  }
 0x1b6   :  { %3610 = vmatpush1.bf16.msra.mxu1 %v4637_v57  ;;  %3570 = vmatprep.subr.bf16.mxu0 %v4642_v26  ;;  %v2022_v57 = vadd.f32 %v1979_v44, %v4992_v35  ;;  %v4709_v26 = vld [vmem:[#allocation4 + $0x590] ss:$8 sps:$4 sm:$0xff]   ;;  %v4723_v35 = vld [vmem:[#allocation4 + $0x664] ss:$8 sps:$4 sm:$0xff]  }
 0x1b7   :  { %3611 = vmatprep.subr.bf16.mxu1 %v4645_v51  ;;  %3637 = vmatprep.mubr.bf16.mxu1 %v2053_v54  ;;  %v4712_v51 = vld [vmem:[#allocation4 + $0x480] ss:$8 sps:$4 sm:$0xff]  }
 0x1b8   :  { %v2036_v52 = vmax.f32 %v2022_v57, 0.0  ;;  %v4715_v54 = vld [vmem:[#allocation4 + $0x580] ss:$8 sps:$4 sm:$0xff]  }
 0x1b9   :  { %3571 = vmatpush1.bf16.msra.mxu0 %v4640_v55  ;;  %v4720_v55 = vld [vmem:[#allocation4 + $0x674] ss:$8 sps:$4 sm:$0xff]  }
 0x1ba   :  { %3612 = vmatpush1.bf16.msra.mxu1 %v4643_v56  ;;  %3572 = vmatprep.subr.bf16.mxu0 %v4648_v59  ;;  %v2052_v56 = vpack.c.bf16 %v2038_v50, %v2038_v50  ;;  %v2050_v59 = vpack.c.bf16 %v2036_v52, %v2036_v52  ;;  %v4766_v52 = vld [vmem:[#allocation6 + $0x78] sm:$0xff]  }
 0x1bb   :  { %3613 = vmatprep.subr.bf16.mxu1 %v4651_v60  ;;  %v1999_v60 = vrot.slane %v4988_v58, %v1966_v29 }
 0x1bd   :  { %3573 = vmatpush1.bf16.msra.mxu0 %v4646_v62 }
 0x1be   :  { %3614 = vmatpush1.bf16.msra.mxu1 %v4649_v63  ;;  %3574 = vmatprep.subr.bf16.mxu0 %v4654_v1  ;;  %v4721_v63 = vld [vmem:[#allocation4 + $0x660] ss:$8 sps:$4 sm:$0xff]  }
 0x1bf   :  { %3615 = vmatprep.subr.bf16.mxu1 %v4657_v2 }
 0x1c1   :  { %3575 = vmatpush1.bf16.msra.mxu0 %v4652_v3  ;;  %v4726_v3 = vld [vmem:[#allocation4 + $0x654] ss:$8 sps:$4 sm:$0xff]  }
 0x1c2   :  { %3616 = vmatpush1.bf16.msra.mxu1 %v4655_v4  ;;  %3576 = vmatprep.subr.bf16.mxu0 %v4660_v5 }
 0x1c3   :  { %3617 = vmatprep.subr.bf16.mxu1 %v4663_v6 }
 0x1c5   :  { %3577 = vmatpush1.bf16.msra.mxu0 %v4658_v7 }
 0x1c6   :  { %3618 = vmatpush1.bf16.msra.mxu1 %v4661_v8  ;;  %3578 = vmatprep.subr.bf16.mxu0 %v4666_v9  ;;  %v4724_v8 = vld [vmem:[#allocation4 + $0x650] ss:$8 sps:$4 sm:$0xff]  }
 0x1c7   :  { %3619 = vmatprep.subr.bf16.mxu1 %v4669_v10  ;;  %v4729_v10 = vld [vmem:[#allocation4 + $0x644] ss:$8 sps:$4 sm:$0xff]  }
 0x1c9   :  { %3579 = vmatpush1.bf16.msra.mxu0 %v4664_v11 }
 0x1ca   :  { %3620 = vmatpush1.bf16.msra.mxu1 %v4667_v13  ;;  %3580 = vmatprep.subr.bf16.mxu0 %v4672_v15  ;;  %v4727_v15 = vld [vmem:[#allocation4 + $0x640] ss:$8 sps:$4 sm:$0xff]  }
 0x1cb   :  { %3621 = vmatprep.subr.bf16.mxu1 %v4675_v16  ;;  %v4732_v16 = vld [vmem:[#allocation4 + $0x634] ss:$8 sps:$4 sm:$0xff]  }
 0x1cd   :  { %3581 = vmatpush2.bf16.msra.mxu0 %v4670_v17  ;;  %v4730_v17 = vld [vmem:[#allocation4 + $0x630] ss:$8 sps:$4 sm:$0xff]  }
 0x1ce   :  { %3622 = vmatpush2.bf16.msra.mxu1 %v4673_v18  ;;  %3582 = vmatprep.subr.bf16.mxu0 %v4678_v20  ;;  %v4735_v18 = vld [vmem:[#allocation4 + $0x624] ss:$8 sps:$4 sm:$0xff]   ;;  %v4733_v20 = vld [vmem:[#allocation4 + $0x620] ss:$8 sps:$4 sm:$0xff]  }
 0x1cf   :  { %3623 = vmatprep.subr.bf16.mxu1 %v4681_v22  ;;  %v4738_v22 = vld [vmem:[#allocation4 + $0x614] ss:$8 sps:$4 sm:$0xff]  }
 0x1d1   :  { %3583 = vmatpush2.bf16.msra.mxu0 %v4676_v53  ;;  %v4736_v53 = vld [vmem:[#allocation4 + $0x610] ss:$8 sps:$4 sm:$0xff]  }
 0x1d2   :  { %3624 = vmatpush2.bf16.msra.mxu1 %v4679_v23  ;;  %3584 = vmatprep.subr.bf16.mxu0 %v4684_v24  ;;  %v4741_v23 = vld [vmem:[#allocation4 + $0x604] ss:$8 sps:$4 sm:$0xff]   ;;  %v4739_v24 = vld [vmem:[#allocation4 + $0x600] ss:$8 sps:$4 sm:$0xff]  }
 0x1d3   :  { %3625 = vmatprep.subr.bf16.mxu1 %v4687_v61  ;;  %v4744_v61 = vld [vmem:[#allocation4 + $0x6f4] ss:$8 sps:$4 sm:$0xff]  }
 0x1d5   :  { %3585 = vmatpush2.bf16.msra.mxu0 %v4682_v25  ;;  %v4742_v25 = vld [vmem:[#allocation4 + $0x6f0] ss:$8 sps:$4 sm:$0xff]  }
 0x1d6   :  { %3626 = vmatpush2.bf16.msra.mxu1 %v4685_v30  ;;  %3586 = vmatprep.subr.bf16.mxu0 %v4690_v31  ;;  %v4747_v30 = vld [vmem:[#allocation4 + $0x6e4] ss:$8 sps:$4 sm:$0xff]   ;;  %v4745_v31 = vld [vmem:[#allocation4 + $0x6e0] ss:$8 sps:$4 sm:$0xff]  }
 0x1d7   :  { %3627 = vmatprep.subr.bf16.mxu1 %v4693_v32  ;;  %v4750_v32 = vld [vmem:[#allocation4 + $0x6d4] ss:$8 sps:$4 sm:$0xff]  }
 0x1d9   :  { %3587 = vmatpush2.bf16.msra.mxu0 %v4688_v33  ;;  %v4748_v33 = vld [vmem:[#allocation4 + $0x6d0] ss:$8 sps:$4 sm:$0xff]  }
 0x1da   :  { %3628 = vmatpush2.bf16.msra.mxu1 %v4691_v34  ;;  %3588 = vmatprep.subr.bf16.mxu0 %v4696_v36  ;;  %v4753_v34 = vld [vmem:[#allocation4 + $0x6c4] ss:$8 sps:$4 sm:$0xff]   ;;  %v4751_v36 = vld [vmem:[#allocation4 + $0x6c0] ss:$8 sps:$4 sm:$0xff]  }
 0x1db   :  { %3629 = vmatprep.subr.bf16.mxu1 %v4699_v37  ;;  %v4756_v37 = vld [vmem:[#allocation4 + $0x6b4] ss:$8 sps:$4 sm:$0xff]  }
 0x1dd   :  { %3589 = vmatpush2.bf16.msra.mxu0 %v4694_v39  ;;  %v4754_v39 = vld [vmem:[#allocation4 + $0x6b0] ss:$8 sps:$4 sm:$0xff]  }
 0x1de   :  { %3630 = vmatpush2.bf16.msra.mxu1 %v4697_v40  ;;  %3590 = vmatprep.subr.bf16.mxu0 %v4702_v12  ;;  %v4759_v40 = vld [vmem:[#allocation4 + $0x6a4] ss:$8 sps:$4 sm:$0xff]   ;;  %v4757_v12 = vld [vmem:[#allocation4 + $0x6a0] ss:$8 sps:$4 sm:$0xff]  }
 0x1df   :  { %3631 = vmatprep.subr.bf16.mxu1 %v4705_v41  ;;  %v1995_v41 = vrot.slane %v4988_v58, %v1962_v0 }
 0x1e1   :  { %3591 = vmatpush2.bf16.msra.mxu0 %v4700_v42  ;;  %v4762_v42 = vld [vmem:[#allocation4 + $0x694] ss:$8 sps:$4 sm:$0xff]  }
 0x1e2   :  { %3632 = vmatpush2.bf16.msra.mxu1 %v4703_v45  ;;  %3592 = vmatprep.subr.bf16.mxu0 %v4708_v46  ;;  %v4765_v45 = vld [vmem:[#allocation4 + $0x684] ss:$8 sps:$4 sm:$0xff]   ;;  %v4763_v46 = vld [vmem:[#allocation4 + $0x680] ss:$8 sps:$4 sm:$0xff]  }
 0x1e3   :  { %3633 = vmatprep.subr.bf16.mxu1 %v4711_v47 }
 0x1e5   :  { %3593 = vmatpush2.bf16.msra.mxu0 %v4706_v48 }
 0x1e6   :  { %3634 = vmatpush2.bf16.msra.mxu1 %v4709_v26  ;;  %3594 = vmatprep.subr.bf16.mxu0 %v4714_v49 }
 0x1e7   :  { %3635 = vmatprep.subr.bf16.mxu1 %v4717_v27 }
 0x1e9   :  { %3595 = vmatpush2.bf16.msra.mxu0 %v4712_v51 }
 0x1ea   :  { %3636 = vmatpush2.bf16.msra.mxu1 %v4715_v54  ;;  %3646 = vmatprep.subr.bf16.mxu0 %v4720_v55  ;;  %v4767_v54 = vld [vmem:[#allocation6 + $0x38] sm:$0xff]   ;;  %v4768_v55 = vld [vmem:[#allocation6 + $0x70] sm:$0xff]  }
 0x1eb   :  { %4398 = vmatprep.subr.bf16.mxu1 %v4766_v52 }
 0x1ec   :  { %v5009_v62 = vpop.f32.mrf.mxu0  ;;  %3597 = vmatmul.mubr.bf16.vlgmr.msra.gmra.mxu0 %v2050_v59  ;;  %v5011_v1 = vpop.f32.mrf.mxu1  ;;  %v4771_v59 = vld [vmem:[#allocation6 + $0x28] sm:$0xff]  }
 0x1ed   :  { %3638 = vmatmul.mubr.bf16.vlgmr.msra.gmra.mxu1 %v2052_v56  ;;  %3647 = vmatpush1.bf16.msra.mxu0 %v4718_v38  ;;  %v2026_v44 = vadd.f32 %v1995_v41, %v5009_v62  ;;  %v4769_v56 = vld [vmem:[#allocation6 + $0x30] sm:$0xff]   ;;  %v4770_v38 = vld [vmem:[#allocation6 + $0x68] sm:$0xff]   ;;  %v4774_v62 = vld [vmem:[#allocation6 + $0x58] sm:$0xff]  }
 0x1ee   :  { %v1894_v2 = vpop.f32.mrf.mxu0  ;;  %3648 = vmatprep.subr.bf16.mxu0 %v4723_v35  ;;  %v5013_v5 = vpop.f32.mrf.mxu1  ;;  %4399 = vmatpush3.bf16.msra.mxu1 %v4767_v54  ;;  %v4772_v35 = vld [vmem:[#allocation6 + $0x60] sm:$0xff]  }
 0x1ef   :  { %v2027_v4 = vadd.f32 %v1999_v60, %v1894_v2  ;;  %v2040_v47 = vmax.f32 %v2026_v44, 0.0  ;;  %4400 = vmatprep.subr.bf16.mxu1 %v4768_v55  ;;  %v4773_v60 = vld [vmem:[#allocation6 + $0x20] sm:$0xff]  }
 0x1f0   :  { %v1896_v6 = vpop.f32.mrf.mxu0  ;;  %v1937_v9 = vpop.f32.mrf.mxu1 }
 0x1f1   :  { %v2041_v7 = vmax.f32 %v2027_v4, 0.0  ;;  %3649 = vmatpush1.bf16.msra.mxu0 %v4721_v63  ;;  %v2054_v21 = vpack.c.bf16 %v2040_v47, %v2040_v47  ;;  %v4775_v63 = vld [vmem:[#allocation6 + $0x18] sm:$0xff]   ;;  %v4776_v6 = vld [vmem:[#allocation6 + $0x50] sm:$0xff]  }
 0x1f2   :  { %v1897_v29 = vpop.f32.mrf.mxu0  ;;  %3650 = vmatprep.subr.bf16.mxu0 %v4726_v3  ;;  %v1938_v13 = vpop.f32.mrf.mxu1  ;;  %4401 = vmatpush3.bf16.msra.mxu1 %v4769_v56 }
 0x1f3   :  { %v2055_v11 = vpack.c.bf16 %v2041_v7, %v2041_v7  ;;  %4402 = vmatprep.subr.bf16.mxu1 %v4770_v38 }
 0x1f5   :  { %3651 = vmatpush1.bf16.msra.mxu0 %v4724_v8  ;;  %3678 = vmatprep.mubr.bf16.mxu0 %v2055_v11  ;;  %v4777_v8 = vld [vmem:[#allocation6 + $0x10] sm:$0xff]  }
 0x1f6   :  { %3652 = vmatprep.subr.bf16.mxu0 %v4729_v10  ;;  %4403 = vmatpush3.bf16.msra.mxu1 %v4771_v59 }
 0x1f7   :  { %4404 = vmatprep.subr.bf16.mxu1 %v4772_v35 }
 0x1f9   :  { %3653 = vmatpush1.bf16.msra.mxu0 %v4727_v15 }
 0x1fa   :  { %3654 = vmatprep.subr.bf16.mxu0 %v4732_v16  ;;  %4405 = vmatpush3.bf16.msra.mxu1 %v4773_v60  ;;  %v4778_v16 = vld [vmem:[#allocation6 + $0x48] sm:$0xff]  }
 0x1fb   :  { %4406 = vmatprep.subr.bf16.mxu1 %v4774_v62 }
 0x1fd   :  { %3655 = vmatpush1.bf16.msra.mxu0 %v4730_v17 }
 0x1fe   :  { %3656 = vmatprep.subr.bf16.mxu0 %v4735_v18  ;;  %4407 = vmatpush3.bf16.msra.mxu1 %v4775_v63  ;;  %v4779_v18 = vld [vmem:[#allocation6 + $0x8] sm:$0xff]  }
 0x1ff   :  { %4408 = vmatprep.subr.bf16.mxu1 %v4776_v6 }
 0x201   :  { %3657 = vmatpush1.bf16.msra.mxu0 %v4733_v20 }
 0x202   :  { %3658 = vmatprep.subr.bf16.mxu0 %v4738_v22  ;;  %4409 = vmatpush3.bf16.msra.mxu1 %v4777_v8  ;;  %v4780_v22 = vld [vmem:[#allocation6 + $0x40] sm:$0xff]  }
 0x203   :  { %4410 = vmatprep.subr.bf16.mxu1 %v4778_v16 }
 0x205   :  { %3659 = vmatpush1.bf16.msra.mxu0 %v4736_v53  ;;  %v4781_v53 = vld [vmem:[#allocation6] sm:$0xff]  }
 0x206   :  { %3660 = vmatprep.subr.bf16.mxu0 %v4741_v23  ;;  %4411 = vmatpush3.bf16.msra.mxu1 %v4779_v18 }
 0x207   :  { %4412 = vmatprep.subr.bf16.mxu1 %v4780_v22 }
 0x209   :  { %3661 = vmatpush1.bf16.msra.mxu0 %v4739_v24 }
 0x20a   :  { %3662 = vmatprep.subr.bf16.mxu0 %v4744_v61  ;;  %4413 = vmatpush3.bf16.msra.mxu1 %v4781_v53 }
 0x20d   :  { %3663 = vmatpush2.bf16.msra.mxu0 %v4742_v25 }
 0x20e   :  { %3664 = vmatprep.subr.bf16.mxu0 %v4747_v30 }
 0x211   :  { %3665 = vmatpush2.bf16.msra.mxu0 %v4745_v31 }
 0x212   :  { %3666 = vmatprep.subr.bf16.mxu0 %v4750_v32 }
 0x215   :  { %3667 = vmatpush2.bf16.msra.mxu0 %v4748_v33 }
 0x216   :  { %3668 = vmatprep.subr.bf16.mxu0 %v4753_v34 }
 0x219   :  { %3669 = vmatpush2.bf16.msra.mxu0 %v4751_v36 }
 0x21a   :  { %3670 = vmatprep.subr.bf16.mxu0 %v4756_v37 }
 0x21d   :  { %3671 = vmatpush2.bf16.msra.mxu0 %v4754_v39  ;;  %v3689_v39 = vld [vmem:[%s5036_s4] sm:$0x3] }
 0x21e   :  { %3672 = vmatprep.subr.bf16.mxu0 %v4759_v40 }
 0x221   :  { %3673 = vmatpush2.bf16.msra.mxu0 %v4757_v12 }
 0x222   :  { %3674 = vmatprep.subr.bf16.mxu0 %v4762_v42  ;;  %v3694_v42 = vrot.slane %v3689_v39, %v4958_v28 }
 0x225   :  { %3675 = vmatpush2.bf16.msra.mxu0 %v4760_v43 }
 0x226   :  { %3676 = vmatprep.subr.bf16.mxu0 %v4765_v45 }
 0x229   :  { %3677 = vmatpush2.bf16.msra.mxu0 %v4763_v46  ;;  %v3698_v46 = vrot.slane %v3689_v39, %v4937_v19 }
 0x22c   :  { %v3434_v48 = vpop.f32.mrf.mxu0  ;;  %3679 = vmatmul.mubr.bf16.vlgmr.msra.gmra.mxu0 %v2054_v21 }
 0x22d   :  { %v3475_v57 = vpop.f32.mrf.mxu1 }
 0x22e   :  { %v3476_v14 = vadd.f32 %v3475_v57, %v3434_v48  ;;  %v3436_v26 = vpop.f32.mrf.mxu0 }
 0x22f   :  { %v3477_v0 = vpop.f32.mrf.mxu1 }
 0x230   :  { %v3478_v58 = vadd.f32 %v3477_v0, %v3436_v26  ;;  %v3438_v49 = vpop.f32.mrf.mxu0 }
 0x231   :  { %v3479_v27 = vpop.f32.mrf.mxu1 }
 0x232   :  { %v3439_v50 = vpop.f32.mrf.mxu0 }
 0x233   :  { %v3480_v51 = vpop.f32.mrf.mxu1 }
 0x26c   :  { %v3516_v2 = vpop.f32.mrf.mxu0 }
 0x26d   :  { %v3517_v3 = vadd.f32 %v3516_v2, %v3476_v14  ;;  %v3557_v4 = vpop.f32.mrf.mxu1 }
 0x26e   :  { %v3518_v7 = vpop.f32.mrf.mxu0 }
 0x26f   :  { %v3558_v9 = vadd.f32 %v3557_v4, %v3517_v3  ;;  %v3519_v29 = vadd.f32 %v3518_v7, %v3478_v58  ;;  %v3559_v10 = vpop.f32.mrf.mxu1 }
 0x270   :  { %v3520_v11 = vpop.f32.mrf.mxu0 }
 0x271   :  { %v3560_v13 = vadd.f32 %v3559_v10, %v3519_v29  ;;  %v3561_v15 = vpop.f32.mrf.mxu1 }
 0x272   :  { %v3521_v17 = vpop.f32.mrf.mxu0 }
 0x273   :  { %v3562_v20 = vpop.f32.mrf.mxu1 }
 0x2ac   :  { %v3598_v23 = vpop.f32.mrf.mxu0 }
 0x2ad   :  { %v3599_v24 = vadd.f32 %v3598_v23, %v3558_v9  ;;  %v3639_v61 = vpop.f32.mrf.mxu1 }
 0x2ae   :  { %v3600_v25 = vpop.f32.mrf.mxu0 }
 0x2af   :  { %v3640_v30 = vadd.f32 %v3639_v61, %v3599_v24  ;;  %v3641_v31 = vpop.f32.mrf.mxu1  ;;  %v3601_v37 = vadd.f32 %v3600_v25, %v3560_v13 }
 0x2b0   :  { %v3602_v32 = vpop.f32.mrf.mxu0 }
 0x2b1   :  { %v3643_v33 = vpop.f32.mrf.mxu1  ;;  %v3642_v12 = vadd.f32 %v3641_v31, %v3601_v37 }
 0x2b2   :  { %v3603_v34 = vpop.f32.mrf.mxu0 }
 0x2b3   :  { %v3644_v36 = vpop.f32.mrf.mxu1 }
 0x2ec   :  { %v3680_v40 = vpop.f32.mrf.mxu0 }
 0x2ed   :  { %v3681_v41 = vadd.f32 %v3680_v40, %v3640_v30 }
 0x2ee   :  { %v3682_v43 = vpop.f32.mrf.mxu0 }
 0x2ef   :  { %v3687_v44 = vadd.f32 %v3681_v41, %v5011_v1  ;;  %v3683_v45 = vadd.f32 %v3682_v43, %v3642_v12  ;;  %v4381_v1 = vld [vmem:[%s5038_s6] ss:$0 sm:$0xff] }
 0x2f0   :  { %v3684_v47 = vpop.f32.mrf.mxu0 }
 0x2f1   :  { %v3701_v21 = vadd.f32 %v3694_v42, %v3687_v44  ;;  %v3688_v48 = vadd.f32 %v3683_v45, %v5013_v5 }
 0x2f2   :  { %v3685_v57 = vpop.f32.mrf.mxu0 }
 0x2f3   :  { %v3702_v14 = vadd.f32 %v3698_v46, %v3688_v48  ;;  %v3703_v26 = vmax.f32 %v3701_v21, 0.0 }
 0x2f5   :  { %v3704_v0 = vmax.f32 %v3702_v14, 0.0  ;;  %v3705_v49 = vpack.c.bf16 %v3703_v26, %v3703_v26 }
 0x2f7   :  { %v3706_v58 = vpack.c.bf16 %v3704_v0, %v3704_v0 }
 0x2f9   :  { %3874 = vmatprep.mubr.bf16.mxu1 %v3706_v58 }
 0x2fa   :  { %3875 = vmatmul.mubr.bf16.vlgmr.msra.gmra.mxu1 %v3705_v49 }
 0x3ba   :  { %v4414_v27 = vpop.f32.mrf.mxu1 }
 0x3bc   :  { %v4415_v28 = vpop.f32.mrf.mxu1 }
 0x3bd   :  { %v4416_v50 = vadd.f32 %v4415_v28, %v4414_v27 }
 0x3be   :  { %v4417_v19 = vpop.f32.mrf.mxu1 }
 0x3bf   :  { %v3877_v51 = vadd.f32 %v4416_v50, %v4381_v1 }
 0x3c0   :  { %v4418_v52 = vpop.f32.mrf.mxu1 }
 0x3c1   :  { %3882 = vmax.xlane.f32.xlu0 %v3877_v51 }
 0x44a   :  { %v3883_v5 = vpop.xlane.xlu0 %3882 }
 0x44b   :  { %v3884_v54 = vsub.f32 %v3877_v51, %v3883_v5 }
 0x44d   :  { %v3885_v55 = vmul.f32 1.442695, %v3884_v54 }
 0x44f   :  { %4782 = vpow2.f32 %v3885_v55 }
 0x45c   :  { %v4783_v56 = vpop.eup %4782 }
 0x45d   :  { %3887 = vadd.xlane.f32.xlu0 %v4783_v56 }
 0x4e6   :  { %v3888_v38 = vpop.xlane.xlu0 %3887 }
 0x4e7   :  { %4784 = vrcp.f32 %v3888_v38 }
 0x4f4   :  { %v4785_v59 = vpop.eup %4784 }
 0x4f5   :  { %v3890_v35 = vmul.f32 %v4785_v59, %v4783_v56 }
 0x4f7   :  { %v3891_v60 = vpack.c.bf16 %v3890_v35, %v3890_v35 }
 0x4f9   :  { %3892 = vst [vmem:[%s5039_s7] sm:$0xf] %v3891_v60 }
 0x4fa   :  { %3897 = vsyncpa [#allocation3], 1 }
 0x4fb   :  { %3898 = vsyncpa [#allocation5], 1 }

</bundles_post_ra>
